<compile_context>
chip_gen: v6e
topology: v6e:2x2x1
jax: 0.10.0
libtpu: 0.0.40
codegen_flags: <defaults>
</compile_context>

<pallas_src>
import jax
import jax.numpy as jnp
from jax import lax
from jax.experimental import pallas as pl
from jax.experimental.pallas import tpu as pltpu

R = 16          # disp_resolution  (cfg.MODEL.DISPNET.RESOLUTIONS[0])
MIN_DISP = 0    # cfg.MODEL.DISPNET.MIN_DISP
MAX_DISP = 8    # cfg.MODEL.DISPNET.MAX_DISP
FEAT = 8        # stand-in feature width for the dispnet hot path
MEAN = (0.485, 0.456, 0.406)
STD = (0.229, 0.224, 0.225)
C_IMG = 3
TN_MAX = 128    # max ROIs per grid step (lane-dense (TN, 256) slabs)

# the `col >= d` mask only covers lane-wrap artifacts of pltpu.roll while the
# disparity range stays inside one R-pixel row; the d == 0 term keeps the
# soft-argmin denominator strictly positive.
assert MIN_DISP == 0 and MAX_DISP <= R


# ----------------------------------------------------------------------------
# Fused kernel: (folded) normalize + projection + streaming cost-volume
# soft-argmin.  One grid step processes `tn` ROIs for both image sides.
# ----------------------------------------------------------------------------
def _fused_kernel(wb_ref, lpix_ref, rpix_ref, out_ref, fl_ref, fr_ref):
    # wb_ref   : SMEM (FEAT*4,)       -- [f*4+0..2] = W/(std*FEAT), [f*4+3] = bias
    # lpix_ref : VMEM (3, tn, R*R)    -- bilinear-interpolated left ROI pixels
    # rpix_ref : VMEM (3, tn, R*R)    -- same for the right image
    # out_ref  : VMEM (tn, R*R)       -- lane-dense disparity slab
    # fl_ref/fr_ref: VMEM scratch (FEAT, tn, R*R) -- staged feature maps

    # ---- projection (mean/std and 1/FEAT already folded into wb) -----------
    def project(pix_ref, feat_ref):
        p0 = pix_ref[0]
        p1 = pix_ref[1]
        p2 = pix_ref[2]
        for f in range(FEAT):
            feat_ref[f] = (p0 * wb_ref[4 * f + 0]
                           + p1 * wb_ref[4 * f + 1]
                           + p2 * wb_ref[4 * f + 2]
                           + wb_ref[4 * f + 3])

    project(lpix_ref, fl_ref)
    project(rpix_ref, fr_ref)

    tn = out_ref.shape[0]
    col = lax.broadcasted_iota(jnp.int32, (tn, R * R), 1) % R   # x within row

    # ---- streaming soft-argmin over disparities [MIN_DISP, MAX_DISP) -------
    num = jnp.zeros((tn, R * R), jnp.float32)
    den = jnp.zeros((tn, R * R), jnp.float32)
    for d in range(MIN_DISP, MAX_DISP):
        # mean-L1 cost: accumulate per-feature slices read back from VMEM
        # scratch so only the accumulator stays live across iterations.
        def cost_body(f, acc, _d=d):
            fr_f = fr_ref[f]
            if _d != 0:
                fr_f = pltpu.roll(fr_f, shift=_d, axis=1)
            return acc + jnp.abs(fl_ref[f] - fr_f)

        cost = lax.fori_loop(0, FEAT, cost_body,
                             jnp.zeros((tn, R * R), jnp.float32), unroll=True)
        e = jnp.exp(-cost)                       # cost >= 0 -> e in (0, 1]
        if d != 0:
            # multiplicative 0/1 mask for lane-wrap / invalid disparities
            e = e * (col >= d).astype(jnp.float32)
            num = num + jnp.float32(d) * e
        den = den + e

    # den >= exp(-cost_{d=0}) > 0; exact reciprocal (EUP cost negligible and
    # the disparity feeds downstream 3D estimation).
    out_ref[...] = num * pl.reciprocal(den, approx=False)


def fused_roi_dispnet(w_proj, lpix, rpix, tn_max=TN_MAX):
    """lpix/rpix: (3, N, R*R) interpolated ROI pixels; returns (N, R*R)."""
    n = lpix.shape[1]
    if n == 0:
        return jnp.zeros((0, R * R), jnp.float32)

    # adaptive ROI block: big enough to amortize the ~600-cycle step overhead,
    # small enough that N > TN_MAX still yields >= 2 grid steps (v7x megacore).
    tn = min(((n + 7) // 8) * 8, tn_max)
    n_pad = ((n + tn - 1) // tn) * tn
    pad = n_pad - n
    if pad:
        lpix = jnp.pad(lpix, ((0, 0), (0, pad), (0, 0)))
        rpix = jnp.pad(rpix, ((0, 0), (0, pad), (0, 0)))

    # fold ImageNet mean/std AND the 1/FEAT cost normalization into the
    # projection (done once in the wrapper; abs-diff is linear in scale)
    std = jnp.asarray(STD, jnp.float32)
    mean = jnp.asarray(MEAN, jnp.float32)
    wp = w_proj.astype(jnp.float32) / std[None, :] / jnp.float32(FEAT)   # (FEAT,3)
    bp = -jnp.sum(wp * mean[None, :], axis=1)                            # (FEAT,)
    wb = jnp.concatenate([wp, bp[:, None]], axis=1).reshape(-1)          # (FEAT*4,)

    n_disp = MAX_DISP - MIN_DISP
    flops_per_elem = 2 * FEAT * 7 + n_disp * (FEAT * 3 + 5)
    cost_est = pl.CostEstimate(
        flops=int(n_pad * R * R * flops_per_elem),
        transcendentals=int(n_pad * R * R * (n_disp + 1)),
        bytes_accessed=int(n_pad * R * R * 4 * (2 * C_IMG + 1)))

    out = pl.pallas_call(
        _fused_kernel,
        out_shape=jax.ShapeDtypeStruct((n_pad, R * R), jnp.float32),
        grid=(n_pad // tn,),
        in_specs=[
            pl.BlockSpec(memory_space=pltpu.MemorySpace.SMEM),      # wb (32 f32)
            pl.BlockSpec((C_IMG, tn, R * R), lambda i: (0, i, 0)),  # left pixels
            pl.BlockSpec((C_IMG, tn, R * R), lambda i: (0, i, 0)),  # right pixels
        ],
        out_specs=pl.BlockSpec((tn, R * R), lambda i: (i, 0)),
        scratch_shapes=[pltpu.VMEM((FEAT, tn, R * R), jnp.float32),  # fl
                        pltpu.VMEM((FEAT, tn, R * R), jnp.float32)], # fr
        compiler_params=pltpu.CompilerParams(
            dimension_semantics=("parallel",)),
        cost_estimate=cost_est,
    )(wb, lpix, rpix)
    return out[:n]


# ----------------------------------------------------------------------------
# JAX glue: box arithmetic + bilinear corner gather (+ fused combine)
# ----------------------------------------------------------------------------
def _expand_box_to_integer(box):
    x1, y1, x2, y2 = box[..., 0], box[..., 1], box[..., 2], box[..., 3]
    return jnp.floor(x1), jnp.floor(y1), jnp.ceil(x2), jnp.ceil(y2)


def prepare_rois(lbox, rbox, box_img_idx, height, width):
    """prepare_psmnet_input_and_target box arithmetic (require_mask_tgts=False)."""
    x1, y1, x2, y2 = _expand_box_to_integer(lbox)
    x1p, _, x2p, _ = _expand_box_to_integer(rbox)
    x1 = jnp.maximum(0.0, x1)
    x1p = jnp.maximum(0.0, x1p)
    y1 = jnp.maximum(0.0, y1)
    y2 = jnp.minimum(y2, height - 1.0)
    x2 = jnp.minimum(x2, width - 1.0)
    x2p = jnp.minimum(x2p, width - 1.0)
    max_width = jnp.maximum(x2 - x1, x2p - x1p)
    allow = jnp.minimum(width - x1, width - x1p)
    max_width = jnp.minimum(max_width, allow)
    bi = box_img_idx.astype(jnp.float32)
    rois_left = jnp.stack([bi, x1, y1, x1 + max_width, y2], axis=1)
    rois_right = jnp.stack([bi, x1p, y1, x1p + max_width, y2], axis=1)
    return rois_left, rois_right, x1, x1p, x1 + max_width, x1p + max_width


def roi_align_gather(images, rois):
    """Gather 4 corner pixels per ROI bin and bilinearly combine them here
    (fuses with the gather in XLA), returning (C, N, R*R) interpolated pixels.
    TODO(synk): ROIAlign with sampling_ratio=0 uses an adaptive number of
    samples per bin; approximated with one sample at each bin center."""
    B, C, H, W_img = images.shape
    b = rois[:, 0].astype(jnp.int32)
    x1, y1, x2, y2 = rois[:, 1], rois[:, 2], rois[:, 3], rois[:, 4]
    roi_w = jnp.maximum(x2 - x1, 1.0)
    roi_h = jnp.maximum(y2 - y1, 1.0)
    bin_w = roi_w / R
    bin_h = roi_h / R
    grid = jnp.arange(R, dtype=jnp.float32) + 0.5
    xs = jnp.clip(x1[:, None] + grid[None, :] * bin_w[:, None], 0.0, W_img - 1.0)
    ys = jnp.clip(y1[:, None] + grid[None, :] * bin_h[:, None], 0.0, H - 1.0)
    x0 = jnp.floor(xs).astype(jnp.int32)
    y0 = jnp.floor(ys).astype(jnp.int32)
    x1i = jnp.minimum(x0 + 1, W_img - 1)
    y1i = jnp.minimum(y0 + 1, H - 1)
    lx = xs - x0.astype(jnp.float32)        # (N, R)  fractional x
    ly = ys - y0.astype(jnp.float32)        # (N, R)  fractional y

    ch = jnp.arange(C)

    def gather(yi, xi):
        return images[b[:, None, None, None], ch[None, :, None, None],
                      yi[:, None, :, None], xi[:, None, None, :]]   # (N,C,R,R)

    v00 = gather(y0, x0)
    v01 = gather(y0, x1i)
    v10 = gather(y1i, x0)
    v11 = gather(y1i, x1i)
    lxb = lx[:, None, None, :]              # x varies along the last axis
    lyb = ly[:, None, :, None]              # y varies along the row axis
    top = v00 + (v01 - v00) * lxb
    bot = v10 + (v11 - v10) * lxb
    pix = top + (bot - top) * lyb           # (N, C, R, R)

    n = pix.shape[0]
    # channel-major lane-dense layout for the kernel: (C, N, R*R)
    return pix.transpose(1, 0, 2, 3).reshape(C, n, R * R).astype(jnp.float32)


# ----------------------------------------------------------------------------
# DispRCNN3D._forward_eval equivalent
# ----------------------------------------------------------------------------
def disprcnn3d_forward(left_images, right_images, lbox, rbox, box_img_idx, w_proj):
    B, C, H, W_img = left_images.shape
    n = lbox.shape[0]

    # remove_illegal_detections: TPU needs static shapes, so illegal ROIs are
    # carried as a keep mask (4 compares -> plain JAX) and their disparity is
    # zeroed instead of being compacted away.
    lk = (lbox[:, 2] > lbox[:, 0] + 1.0) & (lbox[:, 3] > lbox[:, 1] + 1.0)
    rk = (rbox[:, 2] > rbox[:, 0] + 1.0) & (rbox[:, 3] > rbox[:, 1] + 1.0)
    keep = (lk & rk).astype(jnp.float32)                            # (N,)

    rois_l, rois_r, x1s, x1ps, x2s, x2ps = prepare_rois(
        lbox, rbox, box_img_idx, float(H), float(W_img))

    lpix = roi_align_gather(left_images, rois_l)                    # (3, N, R*R)
    rpix = roi_align_gather(right_images, rois_r)                   # (3, N, R*R)

    # TODO(synk): full PSMNet (feature CNN + 3D hourglass) is an external
    # submodule; the dispnet hot path is represented by the fused normalize +
    # projection + cost-volume soft-argmin kernel above.
    disp = fused_roi_dispnet(w_proj, lpix, rpix)                    # (N, R*R)
    disp = (disp * keep[:, None]).reshape(n, R, R)

    # TODO(synk): PointRCNN (cfg.MODEL.DET3D_ON) 3D box refinement has no clean
    # Pallas equivalent here; eval path returns disparity-augmented results.
    return {
        'left': {'bbox': lbox, 'disparity': disp, 'keep': keep,
                 'x1s': x1s, 'x1ps': x1ps, 'x2s': x2s, 'x2ps': x2ps},
        'right': {'bbox': rbox, 'keep': keep},
    }


if __name__ == "__main__":
    key = jax.random.PRNGKey(0)
    k1, k2, k3 = jax.random.split(key, 3)
    B, H, W_img = 2, 32, 48
    left_images = jax.random.normal(k1, (B, 3, H, W_img), jnp.float32) * 0.5 + 0.5
    right_images = jax.random.normal(k2, (B, 3, H, W_img), jnp.float32) * 0.5 + 0.5

    # two detections per image: [x1, y1, x2, y2]
    lbox = jnp.array([[4.3, 3.1, 26.7, 25.2],
                      [10.0, 6.0, 40.0, 30.0],
                      [2.0, 2.0, 20.0, 28.0],
                      [15.5, 5.5, 44.0, 29.5]], jnp.float32)
    rbox = lbox.at[:, 0].add(-3.0).at[:, 2].add(-3.0)   # right view shifted 3px
    box_img_idx = jnp.array([0, 0, 1, 1], jnp.int32)

    # deterministic stand-in dispnet parameters
    w_proj = jax.random.normal(k3, (FEAT, 3), jnp.float32) * 0.1

    result = disprcnn3d_forward(left_images, right_images, lbox, rbox,
                                box_img_idx, w_proj)
    jax.block_until_ready(result['left']['disparity'])
    jax.block_until_ready(result['left']['keep'])
    print("KERNEL_OK")
</pallas_src>

<mosaic_0001>
module attributes {stable_mosaic.version = 11 : i64} {
  func.func @_fused_kernel(%arg0: i32, %arg1: memref<32xf32, #tpu.memory_space<smem>>, %arg2: memref<3x8x256xf32, #tpu.memory_space<vmem>>, %arg3: memref<3x8x256xf32, #tpu.memory_space<vmem>>, %arg4: memref<8x256xf32, #tpu.memory_space<vmem>>, %arg5: memref<8x8x256xf32, #tpu.memory_space<vmem>>, %arg6: memref<8x8x256xf32, #tpu.memory_space<vmem>>) attributes {dimension_semantics = [#tpu.dimension_semantics<parallel>], iteration_bounds = array<i64: 1>, scalar_prefetch = 0 : i64, scratch_operands = 2 : i64, tpu.core_type = #tpu.core_type<tc>, window_params = [{transform_indices = @transform_0, window_bounds = array<i64: 32>}, {transform_indices = @transform_1, window_bounds = array<i64: 3, 8, 256>}, {transform_indices = @transform_2, window_bounds = array<i64: 3, 8, 256>}, {transform_indices = @transform_3, window_bounds = array<i64: 8, 256>}]} {
    %c0 = arith.constant 0 : index
    %c0_0 = arith.constant 0 : index
    %c0_1 = arith.constant 0 : index
    %0 = vector.load %arg2[%c0, %c0_0, %c0_1] : memref<3x8x256xf32, #tpu.memory_space<vmem>>, vector<1x8x256xf32>
    %1 = vector.shape_cast %0 : vector<1x8x256xf32> to vector<8x256xf32>
    %c1 = arith.constant 1 : index
    %c0_2 = arith.constant 0 : index
    %c0_3 = arith.constant 0 : index
    %2 = vector.load %arg2[%c1, %c0_2, %c0_3] : memref<3x8x256xf32, #tpu.memory_space<vmem>>, vector<1x8x256xf32>
    %3 = vector.shape_cast %2 : vector<1x8x256xf32> to vector<8x256xf32>
    %c2 = arith.constant 2 : index
    %c0_4 = arith.constant 0 : index
    %c0_5 = arith.constant 0 : index
    %4 = vector.load %arg2[%c2, %c0_4, %c0_5] : memref<3x8x256xf32, #tpu.memory_space<vmem>>, vector<1x8x256xf32>
    %5 = vector.shape_cast %4 : vector<1x8x256xf32> to vector<8x256xf32>
    %c0_6 = arith.constant 0 : index
    %6 = memref.load %arg1[%c0_6] : memref<32xf32, #tpu.memory_space<smem>>
    %7 = vector.broadcast %6 : f32 to vector<8x256xf32>
    %8 = arith.mulf %1, %7 : vector<8x256xf32>
    %c1_7 = arith.constant 1 : index
    %9 = memref.load %arg1[%c1_7] : memref<32xf32, #tpu.memory_space<smem>>
    %10 = vector.broadcast %9 : f32 to vector<8x256xf32>
    %11 = arith.mulf %3, %10 : vector<8x256xf32>
    %12 = arith.addf %8, %11 : vector<8x256xf32>
    %c2_8 = arith.constant 2 : index
    %13 = memref.load %arg1[%c2_8] : memref<32xf32, #tpu.memory_space<smem>>
    %14 = vector.broadcast %13 : f32 to vector<8x256xf32>
    %15 = arith.mulf %5, %14 : vector<8x256xf32>
    %16 = arith.addf %12, %15 : vector<8x256xf32>
    %c3 = arith.constant 3 : index
    %17 = memref.load %arg1[%c3] : memref<32xf32, #tpu.memory_space<smem>>
    %18 = vector.broadcast %17 : f32 to vector<8x256xf32>
    %19 = arith.addf %16, %18 : vector<8x256xf32>
    %c0_9 = arith.constant 0 : index
    %c0_10 = arith.constant 0 : index
    %c0_11 = arith.constant 0 : index
    %20 = vector.load %arg5[%c0_9, %c0_10, %c0_11] : memref<8x8x256xf32, #tpu.memory_space<vmem>>, vector<1x8x256xf32>
    %21 = vector.shape_cast %20 : vector<1x8x256xf32> to vector<8x256xf32>
    %22 = vector.shape_cast %19 : vector<8x256xf32> to vector<1x8x256xf32>
    tpu.vector_store %arg5[%c0_9, %c0_10, %c0_11], %22 {strides = array<i32>} : memref<8x8x256xf32, #tpu.memory_space<vmem>>, vector<1x8x256xf32>,
    %c4 = arith.constant 4 : index
    %23 = memref.load %arg1[%c4] : memref<32xf32, #tpu.memory_space<smem>>
    %24 = vector.broadcast %23 : f32 to vector<8x256xf32>
    %25 = arith.mulf %1, %24 : vector<8x256xf32>
    %c5 = arith.constant 5 : index
    %26 = memref.load %arg1[%c5] : memref<32xf32, #tpu.memory_space<smem>>
    %27 = vector.broadcast %26 : f32 to vector<8x256xf32>
    %28 = arith.mulf %3, %27 : vector<8x256xf32>
    %29 = arith.addf %25, %28 : vector<8x256xf32>
    %c6 = arith.constant 6 : index
    %30 = memref.load %arg1[%c6] : memref<32xf32, #tpu.memory_space<smem>>
    %31 = vector.broadcast %30 : f32 to vector<8x256xf32>
    %32 = arith.mulf %5, %31 : vector<8x256xf32>
    %33 = arith.addf %29, %32 : vector<8x256xf32>
    %c7 = arith.constant 7 : index
    %34 = memref.load %arg1[%c7] : memref<32xf32, #tpu.memory_space<smem>>
    %35 = vector.broadcast %34 : f32 to vector<8x256xf32>
    %36 = arith.addf %33, %35 : vector<8x256xf32>
    %c1_12 = arith.constant 1 : index
    %c0_13 = arith.constant 0 : index
    %c0_14 = arith.constant 0 : index
    %37 = vector.load %arg5[%c1_12, %c0_13, %c0_14] : memref<8x8x256xf32, #tpu.memory_space<vmem>>, vector<1x8x256xf32>
    %38 = vector.shape_cast %37 : vector<1x8x256xf32> to vector<8x256xf32>
    %39 = vector.shape_cast %36 : vector<8x256xf32> to vector<1x8x256xf32>
    tpu.vector_store %arg5[%c1_12, %c0_13, %c0_14], %39 {strides = array<i32>} : memref<8x8x256xf32, #tpu.memory_space<vmem>>, vector<1x8x256xf32>,
    %c8 = arith.constant 8 : index
    %40 = memref.load %arg1[%c8] : memref<32xf32, #tpu.memory_space<smem>>
    %41 = vector.broadcast %40 : f32 to vector<8x256xf32>
    %42 = arith.mulf %1, %41 : vector<8x256xf32>
    %c9 = arith.constant 9 : index
    %43 = memref.load %arg1[%c9] : memref<32xf32, #tpu.memory_space<smem>>
    %44 = vector.broadcast %43 : f32 to vector<8x256xf32>
    %45 = arith.mulf %3, %44 : vector<8x256xf32>
    %46 = arith.addf %42, %45 : vector<8x256xf32>
    %c10 = arith.constant 10 : index
    %47 = memref.load %arg1[%c10] : memref<32xf32, #tpu.memory_space<smem>>
    %48 = vector.broadcast %47 : f32 to vector<8x256xf32>
    %49 = arith.mulf %5, %48 : vector<8x256xf32>
    %50 = arith.addf %46, %49 : vector<8x256xf32>
    %c11 = arith.constant 11 : index
    %51 = memref.load %arg1[%c11] : memref<32xf32, #tpu.memory_space<smem>>
    %52 = vector.broadcast %51 : f32 to vector<8x256xf32>
    %53 = arith.addf %50, %52 : vector<8x256xf32>
    %c2_15 = arith.constant 2 : index
    %c0_16 = arith.constant 0 : index
    %c0_17 = arith.constant 0 : index
    %54 = vector.load %arg5[%c2_15, %c0_16, %c0_17] : memref<8x8x256xf32, #tpu.memory_space<vmem>>, vector<1x8x256xf32>
    %55 = vector.shape_cast %54 : vector<1x8x256xf32> to vector<8x256xf32>
    %56 = vector.shape_cast %53 : vector<8x256xf32> to vector<1x8x256xf32>
    tpu.vector_store %arg5[%c2_15, %c0_16, %c0_17], %56 {strides = array<i32>} : memref<8x8x256xf32, #tpu.memory_space<vmem>>, vector<1x8x256xf32>,
    %c12 = arith.constant 12 : index
    %57 = memref.load %arg1[%c12] : memref<32xf32, #tpu.memory_space<smem>>
    %58 = vector.broadcast %57 : f32 to vector<8x256xf32>
    %59 = arith.mulf %1, %58 : vector<8x256xf32>
    %c13 = arith.constant 13 : index
    %60 = memref.load %arg1[%c13] : memref<32xf32, #tpu.memory_space<smem>>
    %61 = vector.broadcast %60 : f32 to vector<8x256xf32>
    %62 = arith.mulf %3, %61 : vector<8x256xf32>
    %63 = arith.addf %59, %62 : vector<8x256xf32>
    %c14 = arith.constant 14 : index
    %64 = memref.load %arg1[%c14] : memref<32xf32, #tpu.memory_space<smem>>
    %65 = vector.broadcast %64 : f32 to vector<8x256xf32>
    %66 = arith.mulf %5, %65 : vector<8x256xf32>
    %67 = arith.addf %63, %66 : vector<8x256xf32>
    %c15 = arith.constant 15 : index
    %68 = memref.load %arg1[%c15] : memref<32xf32, #tpu.memory_space<smem>>
    %69 = vector.broadcast %68 : f32 to vector<8x256xf32>
    %70 = arith.addf %67, %69 : vector<8x256xf32>
    %c3_18 = arith.constant 3 : index
    %c0_19 = arith.constant 0 : index
    %c0_20 = arith.constant 0 : index
    %71 = vector.load %arg5[%c3_18, %c0_19, %c0_20] : memref<8x8x256xf32, #tpu.memory_space<vmem>>, vector<1x8x256xf32>
    %72 = vector.shape_cast %71 : vector<1x8x256xf32> to vector<8x256xf32>
    %73 = vector.shape_cast %70 : vector<8x256xf32> to vector<1x8x256xf32>
    tpu.vector_store %arg5[%c3_18, %c0_19, %c0_20], %73 {strides = array<i32>} : memref<8x8x256xf32, #tpu.memory_space<vmem>>, vector<1x8x256xf32>,
    %c16 = arith.constant 16 : index
    %74 = memref.load %arg1[%c16] : memref<32xf32, #tpu.memory_space<smem>>
    %75 = vector.broadcast %74 : f32 to vector<8x256xf32>
    %76 = arith.mulf %1, %75 : vector<8x256xf32>
    %c17 = arith.constant 17 : index
    %77 = memref.load %arg1[%c17] : memref<32xf32, #tpu.memory_space<smem>>
    %78 = vector.broadcast %77 : f32 to vector<8x256xf32>
    %79 = arith.mulf %3, %78 : vector<8x256xf32>
    %80 = arith.addf %76, %79 : vector<8x256xf32>
    %c18 = arith.constant 18 : index
    %81 = memref.load %arg1[%c18] : memref<32xf32, #tpu.memory_space<smem>>
    %82 = vector.broadcast %81 : f32 to vector<8x256xf32>
    %83 = arith.mulf %5, %82 : vector<8x256xf32>
    %84 = arith.addf %80, %83 : vector<8x256xf32>
    %c19 = arith.constant 19 : index
    %85 = memref.load %arg1[%c19] : memref<32xf32, #tpu.memory_space<smem>>
    %86 = vector.broadcast %85 : f32 to vector<8x256xf32>
    %87 = arith.addf %84, %86 : vector<8x256xf32>
    %c4_21 = arith.constant 4 : index
    %c0_22 = arith.constant 0 : index
    %c0_23 = arith.constant 0 : index
    %88 = vector.load %arg5[%c4_21, %c0_22, %c0_23] : memref<8x8x256xf32, #tpu.memory_space<vmem>>, vector<1x8x256xf32>
    %89 = vector.shape_cast %88 : vector<1x8x256xf32> to vector<8x256xf32>
    %90 = vector.shape_cast %87 : vector<8x256xf32> to vector<1x8x256xf32>
    tpu.vector_store %arg5[%c4_21, %c0_22, %c0_23], %90 {strides = array<i32>} : memref<8x8x256xf32, #tpu.memory_space<vmem>>, vector<1x8x256xf32>,
    %c20 = arith.constant 20 : index
    %91 = memref.load %arg1[%c20] : memref<32xf32, #tpu.memory_space<smem>>
    %92 = vector.broadcast %91 : f32 to vector<8x256xf32>
    %93 = arith.mulf %1, %92 : vector<8x256xf32>
    %c21 = arith.constant 21 : index
    %94 = memref.load %arg1[%c21] : memref<32xf32, #tpu.memory_space<smem>>
    %95 = vector.broadcast %94 : f32 to vector<8x256xf32>
    %96 = arith.mulf %3, %95 : vector<8x256xf32>
    %97 = arith.addf %93, %96 : vector<8x256xf32>
    %c22 = arith.constant 22 : index
    %98 = memref.load %arg1[%c22] : memref<32xf32, #tpu.memory_space<smem>>
    %99 = vector.broadcast %98 : f32 to vector<8x256xf32>
    %100 = arith.mulf %5, %99 : vector<8x256xf32>
    %101 = arith.addf %97, %100 : vector<8x256xf32>
    %c23 = arith.constant 23 : index
    %102 = memref.load %arg1[%c23] : memref<32xf32, #tpu.memory_space<smem>>
    %103 = vector.broadcast %102 : f32 to vector<8x256xf32>
    %104 = arith.addf %101, %103 : vector<8x256xf32>
    %c5_24 = arith.constant 5 : index
    %c0_25 = arith.constant 0 : index
    %c0_26 = arith.constant 0 : index
    %105 = vector.load %arg5[%c5_24, %c0_25, %c0_26] : memref<8x8x256xf32, #tpu.memory_space<vmem>>, vector<1x8x256xf32>
    %106 = vector.shape_cast %105 : vector<1x8x256xf32> to vector<8x256xf32>
    %107 = vector.shape_cast %104 : vector<8x256xf32> to vector<1x8x256xf32>
    tpu.vector_store %arg5[%c5_24, %c0_25, %c0_26], %107 {strides = array<i32>} : memref<8x8x256xf32, #tpu.memory_space<vmem>>, vector<1x8x256xf32>,
    %c24 = arith.constant 24 : index
    %108 = memref.load %arg1[%c24] : memref<32xf32, #tpu.memory_space<smem>>
    %109 = vector.broadcast %108 : f32 to vector<8x256xf32>
    %110 = arith.mulf %1, %109 : vector<8x256xf32>
    %c25 = arith.constant 25 : index
    %111 = memref.load %arg1[%c25] : memref<32xf32, #tpu.memory_space<smem>>
    %112 = vector.broadcast %111 : f32 to vector<8x256xf32>
    %113 = arith.mulf %3, %112 : vector<8x256xf32>
    %114 = arith.addf %110, %113 : vector<8x256xf32>
    %c26 = arith.constant 26 : index
    %115 = memref.load %arg1[%c26] : memref<32xf32, #tpu.memory_space<smem>>
    %116 = vector.broadcast %115 : f32 to vector<8x256xf32>
    %117 = arith.mulf %5, %116 : vector<8x256xf32>
    %118 = arith.addf %114, %117 : vector<8x256xf32>
    %c27 = arith.constant 27 : index
    %119 = memref.load %arg1[%c27] : memref<32xf32, #tpu.memory_space<smem>>
    %120 = vector.broadcast %119 : f32 to vector<8x256xf32>
    %121 = arith.addf %118, %120 : vector<8x256xf32>
    %c6_27 = arith.constant 6 : index
    %c0_28 = arith.constant 0 : index
    %c0_29 = arith.constant 0 : index
    %122 = vector.load %arg5[%c6_27, %c0_28, %c0_29] : memref<8x8x256xf32, #tpu.memory_space<vmem>>, vector<1x8x256xf32>
    %123 = vector.shape_cast %122 : vector<1x8x256xf32> to vector<8x256xf32>
    %124 = vector.shape_cast %121 : vector<8x256xf32> to vector<1x8x256xf32>
    tpu.vector_store %arg5[%c6_27, %c0_28, %c0_29], %124 {strides = array<i32>} : memref<8x8x256xf32, #tpu.memory_space<vmem>>, vector<1x8x256xf32>,
    %c28 = arith.constant 28 : index
    %125 = memref.load %arg1[%c28] : memref<32xf32, #tpu.memory_space<smem>>
    %126 = vector.broadcast %125 : f32 to vector<8x256xf32>
    %127 = arith.mulf %1, %126 : vector<8x256xf32>
    %c29 = arith.constant 29 : index
    %128 = memref.load %arg1[%c29] : memref<32xf32, #tpu.memory_space<smem>>
    %129 = vector.broadcast %128 : f32 to vector<8x256xf32>
    %130 = arith.mulf %3, %129 : vector<8x256xf32>
    %131 = arith.addf %127, %130 : vector<8x256xf32>
    %c30 = arith.constant 30 : index
    %132 = memref.load %arg1[%c30] : memref<32xf32, #tpu.memory_space<smem>>
    %133 = vector.broadcast %132 : f32 to vector<8x256xf32>
    %134 = arith.mulf %5, %133 : vector<8x256xf32>
    %135 = arith.addf %131, %134 : vector<8x256xf32>
    %c31 = arith.constant 31 : index
    %136 = memref.load %arg1[%c31] : memref<32xf32, #tpu.memory_space<smem>>
    %137 = vector.broadcast %136 : f32 to vector<8x256xf32>
    %138 = arith.addf %135, %137 : vector<8x256xf32>
    %c7_30 = arith.constant 7 : index
    %c0_31 = arith.constant 0 : index
    %c0_32 = arith.constant 0 : index
    %139 = vector.load %arg5[%c7_30, %c0_31, %c0_32] : memref<8x8x256xf32, #tpu.memory_space<vmem>>, vector<1x8x256xf32>
    %140 = vector.shape_cast %139 : vector<1x8x256xf32> to vector<8x256xf32>
    %141 = vector.shape_cast %138 : vector<8x256xf32> to vector<1x8x256xf32>
    tpu.vector_store %arg5[%c7_30, %c0_31, %c0_32], %141 {strides = array<i32>} : memref<8x8x256xf32, #tpu.memory_space<vmem>>, vector<1x8x256xf32>,
    %c0_33 = arith.constant 0 : index
    %c0_34 = arith.constant 0 : index
    %c0_35 = arith.constant 0 : index
    %142 = vector.load %arg3[%c0_33, %c0_34, %c0_35] : memref<3x8x256xf32, #tpu.memory_space<vmem>>, vector<1x8x256xf32>
    %143 = vector.shape_cast %142 : vector<1x8x256xf32> to vector<8x256xf32>
    %c1_36 = arith.constant 1 : index
    %c0_37 = arith.constant 0 : index
    %c0_38 = arith.constant 0 : index
    %144 = vector.load %arg3[%c1_36, %c0_37, %c0_38] : memref<3x8x256xf32, #tpu.memory_space<vmem>>, vector<1x8x256xf32>
    %145 = vector.shape_cast %144 : vector<1x8x256xf32> to vector<8x256xf32>
    %c2_39 = arith.constant 2 : index
    %c0_40 = arith.constant 0 : index
    %c0_41 = arith.constant 0 : index
    %146 = vector.load %arg3[%c2_39, %c0_40, %c0_41] : memref<3x8x256xf32, #tpu.memory_space<vmem>>, vector<1x8x256xf32>
    %147 = vector.shape_cast %146 : vector<1x8x256xf32> to vector<8x256xf32>
    %c0_42 = arith.constant 0 : index
    %148 = memref.load %arg1[%c0_42] : memref<32xf32, #tpu.memory_space<smem>>
    %149 = vector.broadcast %148 : f32 to vector<8x256xf32>
    %150 = arith.mulf %143, %149 : vector<8x256xf32>
    %c1_43 = arith.constant 1 : index
    %151 = memref.load %arg1[%c1_43] : memref<32xf32, #tpu.memory_space<smem>>
    %152 = vector.broadcast %151 : f32 to vector<8x256xf32>
    %153 = arith.mulf %145, %152 : vector<8x256xf32>
    %154 = arith.addf %150, %153 : vector<8x256xf32>
    %c2_44 = arith.constant 2 : index
    %155 = memref.load %arg1[%c2_44] : memref<32xf32, #tpu.memory_space<smem>>
    %156 = vector.broadcast %155 : f32 to vector<8x256xf32>
    %157 = arith.mulf %147, %156 : vector<8x256xf32>
    %158 = arith.addf %154, %157 : vector<8x256xf32>
    %c3_45 = arith.constant 3 : index
    %159 = memref.load %arg1[%c3_45] : memref<32xf32, #tpu.memory_space<smem>>
    %160 = vector.broadcast %159 : f32 to vector<8x256xf32>
    %161 = arith.addf %158, %160 : vector<8x256xf32>
    %c0_46 = arith.constant 0 : index
    %c0_47 = arith.constant 0 : index
    %c0_48 = arith.constant 0 : index
    %162 = vector.load %arg6[%c0_46, %c0_47, %c0_48] : memref<8x8x256xf32, #tpu.memory_space<vmem>>, vector<1x8x256xf32>
    %163 = vector.shape_cast %162 : vector<1x8x256xf32> to vector<8x256xf32>
    %164 = vector.shape_cast %161 : vector<8x256xf32> to vector<1x8x256xf32>
    tpu.vector_store %arg6[%c0_46, %c0_47, %c0_48], %164 {strides = array<i32>} : memref<8x8x256xf32, #tpu.memory_space<vmem>>, vector<1x8x256xf32>,
    %c4_49 = arith.constant 4 : index
    %165 = memref.load %arg1[%c4_49] : memref<32xf32, #tpu.memory_space<smem>>
    %166 = vector.broadcast %165 : f32 to vector<8x256xf32>
    %167 = arith.mulf %143, %166 : vector<8x256xf32>
    %c5_50 = arith.constant 5 : index
    %168 = memref.load %arg1[%c5_50] : memref<32xf32, #tpu.memory_space<smem>>
    %169 = vector.broadcast %168 : f32 to vector<8x256xf32>
    %170 = arith.mulf %145, %169 : vector<8x256xf32>
    %171 = arith.addf %167, %170 : vector<8x256xf32>
    %c6_51 = arith.constant 6 : index
    %172 = memref.load %arg1[%c6_51] : memref<32xf32, #tpu.memory_space<smem>>
    %173 = vector.broadcast %172 : f32 to vector<8x256xf32>
    %174 = arith.mulf %147, %173 : vector<8x256xf32>
    %175 = arith.addf %171, %174 : vector<8x256xf32>
    %c7_52 = arith.constant 7 : index
    %176 = memref.load %arg1[%c7_52] : memref<32xf32, #tpu.memory_space<smem>>
    %177 = vector.broadcast %176 : f32 to vector<8x256xf32>
    %178 = arith.addf %175, %177 : vector<8x256xf32>
    %c1_53 = arith.constant 1 : index
    %c0_54 = arith.constant 0 : index
    %c0_55 = arith.constant 0 : index
    %179 = vector.load %arg6[%c1_53, %c0_54, %c0_55] : memref<8x8x256xf32, #tpu.memory_space<vmem>>, vector<1x8x256xf32>
    %180 = vector.shape_cast %179 : vector<1x8x256xf32> to vector<8x256xf32>
    %181 = vector.shape_cast %178 : vector<8x256xf32> to vector<1x8x256xf32>
    tpu.vector_store %arg6[%c1_53, %c0_54, %c0_55], %181 {strides = array<i32>} : memref<8x8x256xf32, #tpu.memory_space<vmem>>, vector<1x8x256xf32>,
    %c8_56 = arith.constant 8 : index
    %182 = memref.load %arg1[%c8_56] : memref<32xf32, #tpu.memory_space<smem>>
    %183 = vector.broadcast %182 : f32 to vector<8x256xf32>
    %184 = arith.mulf %143, %183 : vector<8x256xf32>
    %c9_57 = arith.constant 9 : index
    %185 = memref.load %arg1[%c9_57] : memref<32xf32, #tpu.memory_space<smem>>
    %186 = vector.broadcast %185 : f32 to vector<8x256xf32>
    %187 = arith.mulf %145, %186 : vector<8x256xf32>
    %188 = arith.addf %184, %187 : vector<8x256xf32>
    %c10_58 = arith.constant 10 : index
    %189 = memref.load %arg1[%c10_58] : memref<32xf32, #tpu.memory_space<smem>>
    %190 = vector.broadcast %189 : f32 to vector<8x256xf32>
    %191 = arith.mulf %147, %190 : vector<8x256xf32>
    %192 = arith.addf %188, %191 : vector<8x256xf32>
    %c11_59 = arith.constant 11 : index
    %193 = memref.load %arg1[%c11_59] : memref<32xf32, #tpu.memory_space<smem>>
    %194 = vector.broadcast %193 : f32 to vector<8x256xf32>
    %195 = arith.addf %192, %194 : vector<8x256xf32>
    %c2_60 = arith.constant 2 : index
    %c0_61 = arith.constant 0 : index
    %c0_62 = arith.constant 0 : index
    %196 = vector.load %arg6[%c2_60, %c0_61, %c0_62] : memref<8x8x256xf32, #tpu.memory_space<vmem>>, vector<1x8x256xf32>
    %197 = vector.shape_cast %196 : vector<1x8x256xf32> to vector<8x256xf32>
    %198 = vector.shape_cast %195 : vector<8x256xf32> to vector<1x8x256xf32>
    tpu.vector_store %arg6[%c2_60, %c0_61, %c0_62], %198 {strides = array<i32>} : memref<8x8x256xf32, #tpu.memory_space<vmem>>, vector<1x8x256xf32>,
    %c12_63 = arith.constant 12 : index
    %199 = memref.load %arg1[%c12_63] : memref<32xf32, #tpu.memory_space<smem>>
    %200 = vector.broadcast %199 : f32 to vector<8x256xf32>
    %201 = arith.mulf %143, %200 : vector<8x256xf32>
    %c13_64 = arith.constant 13 : index
    %202 = memref.load %arg1[%c13_64] : memref<32xf32, #tpu.memory_space<smem>>
    %203 = vector.broadcast %202 : f32 to vector<8x256xf32>
    %204 = arith.mulf %145, %203 : vector<8x256xf32>
    %205 = arith.addf %201, %204 : vector<8x256xf32>
    %c14_65 = arith.constant 14 : index
    %206 = memref.load %arg1[%c14_65] : memref<32xf32, #tpu.memory_space<smem>>
    %207 = vector.broadcast %206 : f32 to vector<8x256xf32>
    %208 = arith.mulf %147, %207 : vector<8x256xf32>
    %209 = arith.addf %205, %208 : vector<8x256xf32>
    %c15_66 = arith.constant 15 : index
    %210 = memref.load %arg1[%c15_66] : memref<32xf32, #tpu.memory_space<smem>>
    %211 = vector.broadcast %210 : f32 to vector<8x256xf32>
    %212 = arith.addf %209, %211 : vector<8x256xf32>
    %c3_67 = arith.constant 3 : index
    %c0_68 = arith.constant 0 : index
    %c0_69 = arith.constant 0 : index
    %213 = vector.load %arg6[%c3_67, %c0_68, %c0_69] : memref<8x8x256xf32, #tpu.memory_space<vmem>>, vector<1x8x256xf32>
    %214 = vector.shape_cast %213 : vector<1x8x256xf32> to vector<8x256xf32>
    %215 = vector.shape_cast %212 : vector<8x256xf32> to vector<1x8x256xf32>
    tpu.vector_store %arg6[%c3_67, %c0_68, %c0_69], %215 {strides = array<i32>} : memref<8x8x256xf32, #tpu.memory_space<vmem>>, vector<1x8x256xf32>,
    %c16_70 = arith.constant 16 : index
    %216 = memref.load %arg1[%c16_70] : memref<32xf32, #tpu.memory_space<smem>>
    %217 = vector.broadcast %216 : f32 to vector<8x256xf32>
    %218 = arith.mulf %143, %217 : vector<8x256xf32>
    %c17_71 = arith.constant 17 : index
    %219 = memref.load %arg1[%c17_71] : memref<32xf32, #tpu.memory_space<smem>>
    %220 = vector.broadcast %219 : f32 to vector<8x256xf32>
    %221 = arith.mulf %145, %220 : vector<8x256xf32>
    %222 = arith.addf %218, %221 : vector<8x256xf32>
    %c18_72 = arith.constant 18 : index
    %223 = memref.load %arg1[%c18_72] : memref<32xf32, #tpu.memory_space<smem>>
    %224 = vector.broadcast %223 : f32 to vector<8x256xf32>
    %225 = arith.mulf %147, %224 : vector<8x256xf32>
    %226 = arith.addf %222, %225 : vector<8x256xf32>
    %c19_73 = arith.constant 19 : index
    %227 = memref.load %arg1[%c19_73] : memref<32xf32, #tpu.memory_space<smem>>
    %228 = vector.broadcast %227 : f32 to vector<8x256xf32>
    %229 = arith.addf %226, %228 : vector<8x256xf32>
    %c4_74 = arith.constant 4 : index
    %c0_75 = arith.constant 0 : index
    %c0_76 = arith.constant 0 : index
    %230 = vector.load %arg6[%c4_74, %c0_75, %c0_76] : memref<8x8x256xf32, #tpu.memory_space<vmem>>, vector<1x8x256xf32>
    %231 = vector.shape_cast %230 : vector<1x8x256xf32> to vector<8x256xf32>
    %232 = vector.shape_cast %229 : vector<8x256xf32> to vector<1x8x256xf32>
    tpu.vector_store %arg6[%c4_74, %c0_75, %c0_76], %232 {strides = array<i32>} : memref<8x8x256xf32, #tpu.memory_space<vmem>>, vector<1x8x256xf32>,
    %c20_77 = arith.constant 20 : index
    %233 = memref.load %arg1[%c20_77] : memref<32xf32, #tpu.memory_space<smem>>
    %234 = vector.broadcast %233 : f32 to vector<8x256xf32>
    %235 = arith.mulf %143, %234 : vector<8x256xf32>
    %c21_78 = arith.constant 21 : index
    %236 = memref.load %arg1[%c21_78] : memref<32xf32, #tpu.memory_space<smem>>
    %237 = vector.broadcast %236 : f32 to vector<8x256xf32>
    %238 = arith.mulf %145, %237 : vector<8x256xf32>
    %239 = arith.addf %235, %238 : vector<8x256xf32>
    %c22_79 = arith.constant 22 : index
    %240 = memref.load %arg1[%c22_79] : memref<32xf32, #tpu.memory_space<smem>>
    %241 = vector.broadcast %240 : f32 to vector<8x256xf32>
    %242 = arith.mulf %147, %241 : vector<8x256xf32>
    %243 = arith.addf %239, %242 : vector<8x256xf32>
    %c23_80 = arith.constant 23 : index
    %244 = memref.load %arg1[%c23_80] : memref<32xf32, #tpu.memory_space<smem>>
    %245 = vector.broadcast %244 : f32 to vector<8x256xf32>
    %246 = arith.addf %243, %245 : vector<8x256xf32>
    %c5_81 = arith.constant 5 : index
    %c0_82 = arith.constant 0 : index
    %c0_83 = arith.constant 0 : index
    %247 = vector.load %arg6[%c5_81, %c0_82, %c0_83] : memref<8x8x256xf32, #tpu.memory_space<vmem>>, vector<1x8x256xf32>
    %248 = vector.shape_cast %247 : vector<1x8x256xf32> to vector<8x256xf32>
    %249 = vector.shape_cast %246 : vector<8x256xf32> to vector<1x8x256xf32>
    tpu.vector_store %arg6[%c5_81, %c0_82, %c0_83], %249 {strides = array<i32>} : memref<8x8x256xf32, #tpu.memory_space<vmem>>, vector<1x8x256xf32>,
    %c24_84 = arith.constant 24 : index
    %250 = memref.load %arg1[%c24_84] : memref<32xf32, #tpu.memory_space<smem>>
    %251 = vector.broadcast %250 : f32 to vector<8x256xf32>
    %252 = arith.mulf %143, %251 : vector<8x256xf32>
    %c25_85 = arith.constant 25 : index
    %253 = memref.load %arg1[%c25_85] : memref<32xf32, #tpu.memory_space<smem>>
    %254 = vector.broadcast %253 : f32 to vector<8x256xf32>
    %255 = arith.mulf %145, %254 : vector<8x256xf32>
    %256 = arith.addf %252, %255 : vector<8x256xf32>
    %c26_86 = arith.constant 26 : index
    %257 = memref.load %arg1[%c26_86] : memref<32xf32, #tpu.memory_space<smem>>
    %258 = vector.broadcast %257 : f32 to vector<8x256xf32>
    %259 = arith.mulf %147, %258 : vector<8x256xf32>
    %260 = arith.addf %256, %259 : vector<8x256xf32>
    %c27_87 = arith.constant 27 : index
    %261 = memref.load %arg1[%c27_87] : memref<32xf32, #tpu.memory_space<smem>>
    %262 = vector.broadcast %261 : f32 to vector<8x256xf32>
    %263 = arith.addf %260, %262 : vector<8x256xf32>
    %c6_88 = arith.constant 6 : index
    %c0_89 = arith.constant 0 : index
    %c0_90 = arith.constant 0 : index
    %264 = vector.load %arg6[%c6_88, %c0_89, %c0_90] : memref<8x8x256xf32, #tpu.memory_space<vmem>>, vector<1x8x256xf32>
    %265 = vector.shape_cast %264 : vector<1x8x256xf32> to vector<8x256xf32>
    %266 = vector.shape_cast %263 : vector<8x256xf32> to vector<1x8x256xf32>
    tpu.vector_store %arg6[%c6_88, %c0_89, %c0_90], %266 {strides = array<i32>} : memref<8x8x256xf32, #tpu.memory_space<vmem>>, vector<1x8x256xf32>,
    %c28_91 = arith.constant 28 : index
    %267 = memref.load %arg1[%c28_91] : memref<32xf32, #tpu.memory_space<smem>>
    %268 = vector.broadcast %267 : f32 to vector<8x256xf32>
    %269 = arith.mulf %143, %268 : vector<8x256xf32>
    %c29_92 = arith.constant 29 : index
    %270 = memref.load %arg1[%c29_92] : memref<32xf32, #tpu.memory_space<smem>>
    %271 = vector.broadcast %270 : f32 to vector<8x256xf32>
    %272 = arith.mulf %145, %271 : vector<8x256xf32>
    %273 = arith.addf %269, %272 : vector<8x256xf32>
    %c30_93 = arith.constant 30 : index
    %274 = memref.load %arg1[%c30_93] : memref<32xf32, #tpu.memory_space<smem>>
    %275 = vector.broadcast %274 : f32 to vector<8x256xf32>
    %276 = arith.mulf %147, %275 : vector<8x256xf32>
    %277 = arith.addf %273, %276 : vector<8x256xf32>
    %c31_94 = arith.constant 31 : index
    %278 = memref.load %arg1[%c31_94] : memref<32xf32, #tpu.memory_space<smem>>
    %279 = vector.broadcast %278 : f32 to vector<8x256xf32>
    %280 = arith.addf %277, %279 : vector<8x256xf32>
    %c7_95 = arith.constant 7 : index
    %c0_96 = arith.constant 0 : index
    %c0_97 = arith.constant 0 : index
    %281 = vector.load %arg6[%c7_95, %c0_96, %c0_97] : memref<8x8x256xf32, #tpu.memory_space<vmem>>, vector<1x8x256xf32>
    %282 = vector.shape_cast %281 : vector<1x8x256xf32> to vector<8x256xf32>
    %283 = vector.shape_cast %280 : vector<8x256xf32> to vector<1x8x256xf32>
    tpu.vector_store %arg6[%c7_95, %c0_96, %c0_97], %283 {strides = array<i32>} : memref<8x8x256xf32, #tpu.memory_space<vmem>>, vector<1x8x256xf32>,
    %284 = tpu.iota {dimensions = array<i32: 1>} : vector<8x256xi32>
    %c16_i32 = arith.constant 16 : i32
    %c0_i32 = arith.constant 0 : i32
    %285 = arith.cmpi eq, %c16_i32, %c0_i32 : i32
    %c1_i32 = arith.constant 1 : i32
    %286 = arith.select %285, %c1_i32, %c16_i32 : i32
    %287 = vector.broadcast %286 : i32 to vector<8x256xi32>
    %288 = arith.remsi %284, %287 : vector<8x256xi32>
    %c0_i32_98 = arith.constant 0 : i32
    %289 = vector.broadcast %c0_i32_98 : i32 to vector<8x256xi32>
    %290 = arith.cmpi ne, %288, %289 : vector<8x256xi32>
    %c0_i32_99 = arith.constant 0 : i32
    %291 = vector.broadcast %c0_i32_99 : i32 to vector<8x256xi32>
    %292 = arith.cmpi slt, %288, %291 : vector<8x256xi32>
    %c0_i32_100 = arith.constant 0 : i32
    %293 = arith.cmpi slt, %286, %c0_i32_100 : i32
    %294 = vector.broadcast %293 : i1 to vector<8x256xi1>
    %295 = vector.broadcast %294 : vector<8x256xi1> to vector<8x256xi1>
    %296 = arith.xori %292, %295 : vector<8x256xi1>
    %297 = arith.andi %296, %290 : vector<8x256xi1>
    %298 = vector.broadcast %286 : i32 to vector<8x256xi32>
    %299 = arith.addi %288, %298 : vector<8x256xi32>
    %300 = arith.select %297, %299, %288 : vector<8x256xi1>, vector<8x256xi32>
    %cst = arith.constant 0.000000e+00 : f32
    %301 = vector.broadcast %cst : f32 to vector<8x256xf32>
    %cst_101 = arith.constant 0.000000e+00 : f32
    %302 = vector.broadcast %cst_101 : f32 to vector<8x256xf32>
    %cst_102 = arith.constant 0.000000e+00 : f32
    %303 = vector.broadcast %cst_102 : f32 to vector<8x256xf32>
    %c0_i32_103 = arith.constant 0 : i32
    %304 = arith.index_cast %c0_i32_103 : i32 to index
    %c0_104 = arith.constant 0 : index
    %c0_105 = arith.constant 0 : index
    %305 = vector.load %arg6[%304, %c0_104, %c0_105] : memref<8x8x256xf32, #tpu.memory_space<vmem>>, vector<1x8x256xf32>
    %306 = vector.shape_cast %305 : vector<1x8x256xf32> to vector<8x256xf32>
    %307 = arith.index_cast %c0_i32_103 : i32 to index
    %c0_106 = arith.constant 0 : index
    %c0_107 = arith.constant 0 : index
    %308 = vector.load %arg5[%307, %c0_106, %c0_107] : memref<8x8x256xf32, #tpu.memory_space<vmem>>, vector<1x8x256xf32>
    %309 = vector.shape_cast %308 : vector<1x8x256xf32> to vector<8x256xf32>
    %310 = arith.subf %309, %306 : vector<8x256xf32>
    %311 = math.absf %310 : vector<8x256xf32>
    %312 = arith.addf %303, %311 : vector<8x256xf32>
    %c1_i32_108 = arith.constant 1 : i32
    %313 = arith.index_cast %c1_i32_108 : i32 to index
    %c0_109 = arith.constant 0 : index
    %c0_110 = arith.constant 0 : index
    %314 = vector.load %arg6[%313, %c0_109, %c0_110] : memref<8x8x256xf32, #tpu.memory_space<vmem>>, vector<1x8x256xf32>
    %315 = vector.shape_cast %314 : vector<1x8x256xf32> to vector<8x256xf32>
    %316 = arith.index_cast %c1_i32_108 : i32 to index
    %c0_111 = arith.constant 0 : index
    %c0_112 = arith.constant 0 : index
    %317 = vector.load %arg5[%316, %c0_111, %c0_112] : memref<8x8x256xf32, #tpu.memory_space<vmem>>, vector<1x8x256xf32>
    %318 = vector.shape_cast %317 : vector<1x8x256xf32> to vector<8x256xf32>
    %319 = arith.subf %318, %315 : vector<8x256xf32>
    %320 = math.absf %319 : vector<8x256xf32>
    %321 = arith.addf %312, %320 : vector<8x256xf32>
    %c2_i32 = arith.constant 2 : i32
    %322 = arith.index_cast %c2_i32 : i32 to index
    %c0_113 = arith.constant 0 : index
    %c0_114 = arith.constant 0 : index
    %323 = vector.load %arg6[%322, %c0_113, %c0_114] : memref<8x8x256xf32, #tpu.memory_space<vmem>>, vector<1x8x256xf32>
    %324 = vector.shape_cast %323 : vector<1x8x256xf32> to vector<8x256xf32>
    %325 = arith.index_cast %c2_i32 : i32 to index
    %c0_115 = arith.constant 0 : index
    %c0_116 = arith.constant 0 : index
    %326 = vector.load %arg5[%325, %c0_115, %c0_116] : memref<8x8x256xf32, #tpu.memory_space<vmem>>, vector<1x8x256xf32>
    %327 = vector.shape_cast %326 : vector<1x8x256xf32> to vector<8x256xf32>
    %328 = arith.subf %327, %324 : vector<8x256xf32>
    %329 = math.absf %328 : vector<8x256xf32>
    %330 = arith.addf %321, %329 : vector<8x256xf32>
    %c3_i32 = arith.constant 3 : i32
    %331 = arith.index_cast %c3_i32 : i32 to index
    %c0_117 = arith.constant 0 : index
    %c0_118 = arith.constant 0 : index
    %332 = vector.load %arg6[%331, %c0_117, %c0_118] : memref<8x8x256xf32, #tpu.memory_space<vmem>>, vector<1x8x256xf32>
    %333 = vector.shape_cast %332 : vector<1x8x256xf32> to vector<8x256xf32>
    %334 = arith.index_cast %c3_i32 : i32 to index
    %c0_119 = arith.constant 0 : index
    %c0_120 = arith.constant 0 : index
    %335 = vector.load %arg5[%334, %c0_119, %c0_120] : memref<8x8x256xf32, #tpu.memory_space<vmem>>, vector<1x8x256xf32>
    %336 = vector.shape_cast %335 : vector<1x8x256xf32> to vector<8x256xf32>
    %337 = arith.subf %336, %333 : vector<8x256xf32>
    %338 = math.absf %337 : vector<8x256xf32>
    %339 = arith.addf %330, %338 : vector<8x256xf32>
    %c4_i32 = arith.constant 4 : i32
    %340 = arith.index_cast %c4_i32 : i32 to index
    %c0_121 = arith.constant 0 : index
    %c0_122 = arith.constant 0 : index
    %341 = vector.load %arg6[%340, %c0_121, %c0_122] : memref<8x8x256xf32, #tpu.memory_space<vmem>>, vector<1x8x256xf32>
    %342 = vector.shape_cast %341 : vector<1x8x256xf32> to vector<8x256xf32>
    %343 = arith.index_cast %c4_i32 : i32 to index
    %c0_123 = arith.constant 0 : index
    %c0_124 = arith.constant 0 : index
    %344 = vector.load %arg5[%343, %c0_123, %c0_124] : memref<8x8x256xf32, #tpu.memory_space<vmem>>, vector<1x8x256xf32>
    %345 = vector.shape_cast %344 : vector<1x8x256xf32> to vector<8x256xf32>
    %346 = arith.subf %345, %342 : vector<8x256xf32>
    %347 = math.absf %346 : vector<8x256xf32>
    %348 = arith.addf %339, %347 : vector<8x256xf32>
    %c5_i32 = arith.constant 5 : i32
    %349 = arith.index_cast %c5_i32 : i32 to index
    %c0_125 = arith.constant 0 : index
    %c0_126 = arith.constant 0 : index
    %350 = vector.load %arg6[%349, %c0_125, %c0_126] : memref<8x8x256xf32, #tpu.memory_space<vmem>>, vector<1x8x256xf32>
    %351 = vector.shape_cast %350 : vector<1x8x256xf32> to vector<8x256xf32>
    %352 = arith.index_cast %c5_i32 : i32 to index
    %c0_127 = arith.constant 0 : index
    %c0_128 = arith.constant 0 : index
    %353 = vector.load %arg5[%352, %c0_127, %c0_128] : memref<8x8x256xf32, #tpu.memory_space<vmem>>, vector<1x8x256xf32>
    %354 = vector.shape_cast %353 : vector<1x8x256xf32> to vector<8x256xf32>
    %355 = arith.subf %354, %351 : vector<8x256xf32>
    %356 = math.absf %355 : vector<8x256xf32>
    %357 = arith.addf %348, %356 : vector<8x256xf32>
    %c6_i32 = arith.constant 6 : i32
    %358 = arith.index_cast %c6_i32 : i32 to index
    %c0_129 = arith.constant 0 : index
    %c0_130 = arith.constant 0 : index
    %359 = vector.load %arg6[%358, %c0_129, %c0_130] : memref<8x8x256xf32, #tpu.memory_space<vmem>>, vector<1x8x256xf32>
    %360 = vector.shape_cast %359 : vector<1x8x256xf32> to vector<8x256xf32>
    %361 = arith.index_cast %c6_i32 : i32 to index
    %c0_131 = arith.constant 0 : index
    %c0_132 = arith.constant 0 : index
    %362 = vector.load %arg5[%361, %c0_131, %c0_132] : memref<8x8x256xf32, #tpu.memory_space<vmem>>, vector<1x8x256xf32>
    %363 = vector.shape_cast %362 : vector<1x8x256xf32> to vector<8x256xf32>
    %364 = arith.subf %363, %360 : vector<8x256xf32>
    %365 = math.absf %364 : vector<8x256xf32>
    %366 = arith.addf %357, %365 : vector<8x256xf32>
    %c7_i32 = arith.constant 7 : i32
    %367 = arith.index_cast %c7_i32 : i32 to index
    %c0_133 = arith.constant 0 : index
    %c0_134 = arith.constant 0 : index
    %368 = vector.load %arg6[%367, %c0_133, %c0_134] : memref<8x8x256xf32, #tpu.memory_space<vmem>>, vector<1x8x256xf32>
    %369 = vector.shape_cast %368 : vector<1x8x256xf32> to vector<8x256xf32>
    %370 = arith.index_cast %c7_i32 : i32 to index
    %c0_135 = arith.constant 0 : index
    %c0_136 = arith.constant 0 : index
    %371 = vector.load %arg5[%370, %c0_135, %c0_136] : memref<8x8x256xf32, #tpu.memory_space<vmem>>, vector<1x8x256xf32>
    %372 = vector.shape_cast %371 : vector<1x8x256xf32> to vector<8x256xf32>
    %373 = arith.subf %372, %369 : vector<8x256xf32>
    %374 = math.absf %373 : vector<8x256xf32>
    %375 = arith.addf %366, %374 : vector<8x256xf32>
    %c8_i32 = arith.constant 8 : i32
    %cst_137 = arith.constant 0.000000e+00 : f32
    %376 = vector.broadcast %cst_137 : f32 to vector<8x256xf32>
    %377 = arith.subf %376, %375 : vector<8x256xf32>
    %378 = math.exp %377 : vector<8x256xf32>
    %379 = arith.addf %302, %378 : vector<8x256xf32>
    %cst_138 = arith.constant 0.000000e+00 : f32
    %380 = vector.broadcast %cst_138 : f32 to vector<8x256xf32>
    %c0_i32_139 = arith.constant 0 : i32
    %381 = arith.index_cast %c0_i32_139 : i32 to index
    %c0_140 = arith.constant 0 : index
    %c0_141 = arith.constant 0 : index
    %382 = vector.load %arg6[%381, %c0_140, %c0_141] : memref<8x8x256xf32, #tpu.memory_space<vmem>>, vector<1x8x256xf32>
    %383 = vector.shape_cast %382 : vector<1x8x256xf32> to vector<8x256xf32>
    %c1_i32_142 = arith.constant 1 : i32
    %384 = tpu.dynamic_rotate %383 by %c1_i32_142 dim 1 : vector<8x256xf32>, i32 -> vector<8x256xf32>
    %385 = arith.index_cast %c0_i32_139 : i32 to index
    %c0_143 = arith.constant 0 : index
    %c0_144 = arith.constant 0 : index
    %386 = vector.load %arg5[%385, %c0_143, %c0_144] : memref<8x8x256xf32, #tpu.memory_space<vmem>>, vector<1x8x256xf32>
    %387 = vector.shape_cast %386 : vector<1x8x256xf32> to vector<8x256xf32>
    %388 = arith.subf %387, %384 : vector<8x256xf32>
    %389 = math.absf %388 : vector<8x256xf32>
    %390 = arith.addf %380, %389 : vector<8x256xf32>
    %c1_i32_145 = arith.constant 1 : i32
    %391 = arith.index_cast %c1_i32_145 : i32 to index
    %c0_146 = arith.constant 0 : index
    %c0_147 = arith.constant 0 : index
    %392 = vector.load %arg6[%391, %c0_146, %c0_147] : memref<8x8x256xf32, #tpu.memory_space<vmem>>, vector<1x8x256xf32>
    %393 = vector.shape_cast %392 : vector<1x8x256xf32> to vector<8x256xf32>
    %c1_i32_148 = arith.constant 1 : i32
    %394 = tpu.dynamic_rotate %393 by %c1_i32_148 dim 1 : vector<8x256xf32>, i32 -> vector<8x256xf32>
    %395 = arith.index_cast %c1_i32_145 : i32 to index
    %c0_149 = arith.constant 0 : index
    %c0_150 = arith.constant 0 : index
    %396 = vector.load %arg5[%395, %c0_149, %c0_150] : memref<8x8x256xf32, #tpu.memory_space<vmem>>, vector<1x8x256xf32>
    %397 = vector.shape_cast %396 : vector<1x8x256xf32> to vector<8x256xf32>
    %398 = arith.subf %397, %394 : vector<8x256xf32>
    %399 = math.absf %398 : vector<8x256xf32>
    %400 = arith.addf %390, %399 : vector<8x256xf32>
    %c2_i32_151 = arith.constant 2 : i32
    %401 = arith.index_cast %c2_i32_151 : i32 to index
    %c0_152 = arith.constant 0 : index
    %c0_153 = arith.constant 0 : index
    %402 = vector.load %arg6[%401, %c0_152, %c0_153] : memref<8x8x256xf32, #tpu.memory_space<vmem>>, vector<1x8x256xf32>
    %403 = vector.shape_cast %402 : vector<1x8x256xf32> to vector<8x256xf32>
    %c1_i32_154 = arith.constant 1 : i32
    %404 = tpu.dynamic_rotate %403 by %c1_i32_154 dim 1 : vector<8x256xf32>, i32 -> vector<8x256xf32>
    %405 = arith.index_cast %c2_i32_151 : i32 to index
    %c0_155 = arith.constant 0 : index
    %c0_156 = arith.constant 0 : index
    %406 = vector.load %arg5[%405, %c0_155, %c0_156] : memref<8x8x256xf32, #tpu.memory_space<vmem>>, vector<1x8x256xf32>
    %407 = vector.shape_cast %406 : vector<1x8x256xf32> to vector<8x256xf32>
    %408 = arith.subf %407, %404 : vector<8x256xf32>
    %409 = math.absf %408 : vector<8x256xf32>
    %410 = arith.addf %400, %409 : vector<8x256xf32>
    %c3_i32_157 = arith.constant 3 : i32
    %411 = arith.index_cast %c3_i32_157 : i32 to index
    %c0_158 = arith.constant 0 : index
    %c0_159 = arith.constant 0 : index
    %412 = vector.load %arg6[%411, %c0_158, %c0_159] : memref<8x8x256xf32, #tpu.memory_space<vmem>>, vector<1x8x256xf32>
    %413 = vector.shape_cast %412 : vector<1x8x256xf32> to vector<8x256xf32>
    %c1_i32_160 = arith.constant 1 : i32
    %414 = tpu.dynamic_rotate %413 by %c1_i32_160 dim 1 : vector<8x256xf32>, i32 -> vector<8x256xf32>
    %415 = arith.index_cast %c3_i32_157 : i32 to index
    %c0_161 = arith.constant 0 : index
    %c0_162 = arith.constant 0 : index
    %416 = vector.load %arg5[%415, %c0_161, %c0_162] : memref<8x8x256xf32, #tpu.memory_space<vmem>>, vector<1x8x256xf32>
    %417 = vector.shape_cast %416 : vector<1x8x256xf32> to vector<8x256xf32>
    %418 = arith.subf %417, %414 : vector<8x256xf32>
    %419 = math.absf %418 : vector<8x256xf32>
    %420 = arith.addf %410, %419 : vector<8x256xf32>
    %c4_i32_163 = arith.constant 4 : i32
    %421 = arith.index_cast %c4_i32_163 : i32 to index
    %c0_164 = arith.constant 0 : index
    %c0_165 = arith.constant 0 : index
    %422 = vector.load %arg6[%421, %c0_164, %c0_165] : memref<8x8x256xf32, #tpu.memory_space<vmem>>, vector<1x8x256xf32>
    %423 = vector.shape_cast %422 : vector<1x8x256xf32> to vector<8x256xf32>
    %c1_i32_166 = arith.constant 1 : i32
    %424 = tpu.dynamic_rotate %423 by %c1_i32_166 dim 1 : vector<8x256xf32>, i32 -> vector<8x256xf32>
    %425 = arith.index_cast %c4_i32_163 : i32 to index
    %c0_167 = arith.constant 0 : index
    %c0_168 = arith.constant 0 : index
    %426 = vector.load %arg5[%425, %c0_167, %c0_168] : memref<8x8x256xf32, #tpu.memory_space<vmem>>, vector<1x8x256xf32>
    %427 = vector.shape_cast %426 : vector<1x8x256xf32> to vector<8x256xf32>
    %428 = arith.subf %427, %424 : vector<8x256xf32>
    %429 = math.absf %428 : vector<8x256xf32>
    %430 = arith.addf %420, %429 : vector<8x256xf32>
    %c5_i32_169 = arith.constant 5 : i32
    %431 = arith.index_cast %c5_i32_169 : i32 to index
    %c0_170 = arith.constant 0 : index
    %c0_171 = arith.constant 0 : index
    %432 = vector.load %arg6[%431, %c0_170, %c0_171] : memref<8x8x256xf32, #tpu.memory_space<vmem>>, vector<1x8x256xf32>
    %433 = vector.shape_cast %432 : vector<1x8x256xf32> to vector<8x256xf32>
    %c1_i32_172 = arith.constant 1 : i32
    %434 = tpu.dynamic_rotate %433 by %c1_i32_172 dim 1 : vector<8x256xf32>, i32 -> vector<8x256xf32>
    %435 = arith.index_cast %c5_i32_169 : i32 to index
    %c0_173 = arith.constant 0 : index
    %c0_174 = arith.constant 0 : index
    %436 = vector.load %arg5[%435, %c0_173, %c0_174] : memref<8x8x256xf32, #tpu.memory_space<vmem>>, vector<1x8x256xf32>
    %437 = vector.shape_cast %436 : vector<1x8x256xf32> to vector<8x256xf32>
    %438 = arith.subf %437, %434 : vector<8x256xf32>
    %439 = math.absf %438 : vector<8x256xf32>
    %440 = arith.addf %430, %439 : vector<8x256xf32>
    %c6_i32_175 = arith.constant 6 : i32
    %441 = arith.index_cast %c6_i32_175 : i32 to index
    %c0_176 = arith.constant 0 : index
    %c0_177 = arith.constant 0 : index
    %442 = vector.load %arg6[%441, %c0_176, %c0_177] : memref<8x8x256xf32, #tpu.memory_space<vmem>>, vector<1x8x256xf32>
    %443 = vector.shape_cast %442 : vector<1x8x256xf32> to vector<8x256xf32>
    %c1_i32_178 = arith.constant 1 : i32
    %444 = tpu.dynamic_rotate %443 by %c1_i32_178 dim 1 : vector<8x256xf32>, i32 -> vector<8x256xf32>
    %445 = arith.index_cast %c6_i32_175 : i32 to index
    %c0_179 = arith.constant 0 : index
    %c0_180 = arith.constant 0 : index
    %446 = vector.load %arg5[%445, %c0_179, %c0_180] : memref<8x8x256xf32, #tpu.memory_space<vmem>>, vector<1x8x256xf32>
    %447 = vector.shape_cast %446 : vector<1x8x256xf32> to vector<8x256xf32>
    %448 = arith.subf %447, %444 : vector<8x256xf32>
    %449 = math.absf %448 : vector<8x256xf32>
    %450 = arith.addf %440, %449 : vector<8x256xf32>
    %c7_i32_181 = arith.constant 7 : i32
    %451 = arith.index_cast %c7_i32_181 : i32 to index
    %c0_182 = arith.constant 0 : index
    %c0_183 = arith.constant 0 : index
    %452 = vector.load %arg6[%451, %c0_182, %c0_183] : memref<8x8x256xf32, #tpu.memory_space<vmem>>, vector<1x8x256xf32>
    %453 = vector.shape_cast %452 : vector<1x8x256xf32> to vector<8x256xf32>
    %c1_i32_184 = arith.constant 1 : i32
    %454 = tpu.dynamic_rotate %453 by %c1_i32_184 dim 1 : vector<8x256xf32>, i32 -> vector<8x256xf32>
    %455 = arith.index_cast %c7_i32_181 : i32 to index
    %c0_185 = arith.constant 0 : index
    %c0_186 = arith.constant 0 : index
    %456 = vector.load %arg5[%455, %c0_185, %c0_186] : memref<8x8x256xf32, #tpu.memory_space<vmem>>, vector<1x8x256xf32>
    %457 = vector.shape_cast %456 : vector<1x8x256xf32> to vector<8x256xf32>
    %458 = arith.subf %457, %454 : vector<8x256xf32>
    %459 = math.absf %458 : vector<8x256xf32>
    %460 = arith.addf %450, %459 : vector<8x256xf32>
    %c8_i32_187 = arith.constant 8 : i32
    %cst_188 = arith.constant 0.000000e+00 : f32
    %461 = vector.broadcast %cst_188 : f32 to vector<8x256xf32>
    %462 = arith.subf %461, %460 : vector<8x256xf32>
    %463 = math.exp %462 : vector<8x256xf32>
    %c1_i32_189 = arith.constant 1 : i32
    %464 = vector.broadcast %c1_i32_189 : i32 to vector<8x256xi32>
    %465 = arith.cmpi sge, %300, %464 : vector<8x256xi32>
    %466 = arith.extui %465 : vector<8x256xi1> to vector<8x256xi32>
    %467 = arith.sitofp %466 : vector<8x256xi32> to vector<8x256xf32>
    %468 = arith.mulf %463, %467 : vector<8x256xf32>
    %cst_190 = arith.constant 1.000000e+00 : f32
    %469 = vector.broadcast %cst_190 : f32 to vector<8x256xf32>
    %470 = arith.mulf %469, %468 : vector<8x256xf32>
    %471 = arith.addf %301, %470 : vector<8x256xf32>
    %472 = arith.addf %379, %468 : vector<8x256xf32>
    %cst_191 = arith.constant 0.000000e+00 : f32
    %473 = vector.broadcast %cst_191 : f32 to vector<8x256xf32>
    %c0_i32_192 = arith.constant 0 : i32
    %474 = arith.index_cast %c0_i32_192 : i32 to index
    %c0_193 = arith.constant 0 : index
    %c0_194 = arith.constant 0 : index
    %475 = vector.load %arg6[%474, %c0_193, %c0_194] : memref<8x8x256xf32, #tpu.memory_space<vmem>>, vector<1x8x256xf32>
    %476 = vector.shape_cast %475 : vector<1x8x256xf32> to vector<8x256xf32>
    %c2_i32_195 = arith.constant 2 : i32
    %477 = tpu.dynamic_rotate %476 by %c2_i32_195 dim 1 : vector<8x256xf32>, i32 -> vector<8x256xf32>
    %478 = arith.index_cast %c0_i32_192 : i32 to index
    %c0_196 = arith.constant 0 : index
    %c0_197 = arith.constant 0 : index
    %479 = vector.load %arg5[%478, %c0_196, %c0_197] : memref<8x8x256xf32, #tpu.memory_space<vmem>>, vector<1x8x256xf32>
    %480 = vector.shape_cast %479 : vector<1x8x256xf32> to vector<8x256xf32>
    %481 = arith.subf %480, %477 : vector<8x256xf32>
    %482 = math.absf %481 : vector<8x256xf32>
    %483 = arith.addf %473, %482 : vector<8x256xf32>
    %c1_i32_198 = arith.constant 1 : i32
    %484 = arith.index_cast %c1_i32_198 : i32 to index
    %c0_199 = arith.constant 0 : index
    %c0_200 = arith.constant 0 : index
    %485 = vector.load %arg6[%484, %c0_199, %c0_200] : memref<8x8x256xf32, #tpu.memory_space<vmem>>, vector<1x8x256xf32>
    %486 = vector.shape_cast %485 : vector<1x8x256xf32> to vector<8x256xf32>
    %c2_i32_201 = arith.constant 2 : i32
    %487 = tpu.dynamic_rotate %486 by %c2_i32_201 dim 1 : vector<8x256xf32>, i32 -> vector<8x256xf32>
    %488 = arith.index_cast %c1_i32_198 : i32 to index
    %c0_202 = arith.constant 0 : index
    %c0_203 = arith.constant 0 : index
    %489 = vector.load %arg5[%488, %c0_202, %c0_203] : memref<8x8x256xf32, #tpu.memory_space<vmem>>, vector<1x8x256xf32>
    %490 = vector.shape_cast %489 : vector<1x8x256xf32> to vector<8x256xf32>
    %491 = arith.subf %490, %487 : vector<8x256xf32>
    %492 = math.absf %491 : vector<8x256xf32>
    %493 = arith.addf %483, %492 : vector<8x256xf32>
    %c2_i32_204 = arith.constant 2 : i32
    %494 = arith.index_cast %c2_i32_204 : i32 to index
    %c0_205 = arith.constant 0 : index
    %c0_206 = arith.constant 0 : index
    %495 = vector.load %arg6[%494, %c0_205, %c0_206] : memref<8x8x256xf32, #tpu.memory_space<vmem>>, vector<1x8x256xf32>
    %496 = vector.shape_cast %495 : vector<1x8x256xf32> to vector<8x256xf32>
    %c2_i32_207 = arith.constant 2 : i32
    %497 = tpu.dynamic_rotate %496 by %c2_i32_207 dim 1 : vector<8x256xf32>, i32 -> vector<8x256xf32>
    %498 = arith.index_cast %c2_i32_204 : i32 to index
    %c0_208 = arith.constant 0 : index
    %c0_209 = arith.constant 0 : index
    %499 = vector.load %arg5[%498, %c0_208, %c0_209] : memref<8x8x256xf32, #tpu.memory_space<vmem>>, vector<1x8x256xf32>
    %500 = vector.shape_cast %499 : vector<1x8x256xf32> to vector<8x256xf32>
    %501 = arith.subf %500, %497 : vector<8x256xf32>
    %502 = math.absf %501 : vector<8x256xf32>
    %503 = arith.addf %493, %502 : vector<8x256xf32>
    %c3_i32_210 = arith.constant 3 : i32
    %504 = arith.index_cast %c3_i32_210 : i32 to index
    %c0_211 = arith.constant 0 : index
    %c0_212 = arith.constant 0 : index
    %505 = vector.load %arg6[%504, %c0_211, %c0_212] : memref<8x8x256xf32, #tpu.memory_space<vmem>>, vector<1x8x256xf32>
    %506 = vector.shape_cast %505 : vector<1x8x256xf32> to vector<8x256xf32>
    %c2_i32_213 = arith.constant 2 : i32
    %507 = tpu.dynamic_rotate %506 by %c2_i32_213 dim 1 : vector<8x256xf32>, i32 -> vector<8x256xf32>
    %508 = arith.index_cast %c3_i32_210 : i32 to index
    %c0_214 = arith.constant 0 : index
    %c0_215 = arith.constant 0 : index
    %509 = vector.load %arg5[%508, %c0_214, %c0_215] : memref<8x8x256xf32, #tpu.memory_space<vmem>>, vector<1x8x256xf32>
    %510 = vector.shape_cast %509 : vector<1x8x256xf32> to vector<8x256xf32>
    %511 = arith.subf %510, %507 : vector<8x256xf32>
    %512 = math.absf %511 : vector<8x256xf32>
    %513 = arith.addf %503, %512 : vector<8x256xf32>
    %c4_i32_216 = arith.constant 4 : i32
    %514 = arith.index_cast %c4_i32_216 : i32 to index
    %c0_217 = arith.constant 0 : index
    %c0_218 = arith.constant 0 : index
    %515 = vector.load %arg6[%514, %c0_217, %c0_218] : memref<8x8x256xf32, #tpu.memory_space<vmem>>, vector<1x8x256xf32>
    %516 = vector.shape_cast %515 : vector<1x8x256xf32> to vector<8x256xf32>
    %c2_i32_219 = arith.constant 2 : i32
    %517 = tpu.dynamic_rotate %516 by %c2_i32_219 dim 1 : vector<8x256xf32>, i32 -> vector<8x256xf32>
    %518 = arith.index_cast %c4_i32_216 : i32 to index
    %c0_220 = arith.constant 0 : index
    %c0_221 = arith.constant 0 : index
    %519 = vector.load %arg5[%518, %c0_220, %c0_221] : memref<8x8x256xf32, #tpu.memory_space<vmem>>, vector<1x8x256xf32>
    %520 = vector.shape_cast %519 : vector<1x8x256xf32> to vector<8x256xf32>
    %521 = arith.subf %520, %517 : vector<8x256xf32>
    %522 = math.absf %521 : vector<8x256xf32>
    %523 = arith.addf %513, %522 : vector<8x256xf32>
    %c5_i32_222 = arith.constant 5 : i32
    %524 = arith.index_cast %c5_i32_222 : i32 to index
    %c0_223 = arith.constant 0 : index
    %c0_224 = arith.constant 0 : index
    %525 = vector.load %arg6[%524, %c0_223, %c0_224] : memref<8x8x256xf32, #tpu.memory_space<vmem>>, vector<1x8x256xf32>
    %526 = vector.shape_cast %525 : vector<1x8x256xf32> to vector<8x256xf32>
    %c2_i32_225 = arith.constant 2 : i32
    %527 = tpu.dynamic_rotate %526 by %c2_i32_225 dim 1 : vector<8x256xf32>, i32 -> vector<8x256xf32>
    %528 = arith.index_cast %c5_i32_222 : i32 to index
    %c0_226 = arith.constant 0 : index
    %c0_227 = arith.constant 0 : index
    %529 = vector.load %arg5[%528, %c0_226, %c0_227] : memref<8x8x256xf32, #tpu.memory_space<vmem>>, vector<1x8x256xf32>
    %530 = vector.shape_cast %529 : vector<1x8x256xf32> to vector<8x256xf32>
    %531 = arith.subf %530, %527 : vector<8x256xf32>
    %532 = math.absf %531 : vector<8x256xf32>
    %533 = arith.addf %523, %532 : vector<8x256xf32>
    %c6_i32_228 = arith.constant 6 : i32
    %534 = arith.index_cast %c6_i32_228 : i32 to index
    %c0_229 = arith.constant 0 : index
    %c0_230 = arith.constant 0 : index
    %535 = vector.load %arg6[%534, %c0_229, %c0_230] : memref<8x8x256xf32, #tpu.memory_space<vmem>>, vector<1x8x256xf32>
    %536 = vector.shape_cast %535 : vector<1x8x256xf32> to vector<8x256xf32>
    %c2_i32_231 = arith.constant 2 : i32
    %537 = tpu.dynamic_rotate %536 by %c2_i32_231 dim 1 : vector<8x256xf32>, i32 -> vector<8x256xf32>
    %538 = arith.index_cast %c6_i32_228 : i32 to index
    %c0_232 = arith.constant 0 : index
    %c0_233 = arith.constant 0 : index
    %539 = vector.load %arg5[%538, %c0_232, %c0_233] : memref<8x8x256xf32, #tpu.memory_space<vmem>>, vector<1x8x256xf32>
    %540 = vector.shape_cast %539 : vector<1x8x256xf32> to vector<8x256xf32>
    %541 = arith.subf %540, %537 : vector<8x256xf32>
    %542 = math.absf %541 : vector<8x256xf32>
    %543 = arith.addf %533, %542 : vector<8x256xf32>
    %c7_i32_234 = arith.constant 7 : i32
    %544 = arith.index_cast %c7_i32_234 : i32 to index
    %c0_235 = arith.constant 0 : index
    %c0_236 = arith.constant 0 : index
    %545 = vector.load %arg6[%544, %c0_235, %c0_236] : memref<8x8x256xf32, #tpu.memory_space<vmem>>, vector<1x8x256xf32>
    %546 = vector.shape_cast %545 : vector<1x8x256xf32> to vector<8x256xf32>
    %c2_i32_237 = arith.constant 2 : i32
    %547 = tpu.dynamic_rotate %546 by %c2_i32_237 dim 1 : vector<8x256xf32>, i32 -> vector<8x256xf32>
    %548 = arith.index_cast %c7_i32_234 : i32 to index
    %c0_238 = arith.constant 0 : index
    %c0_239 = arith.constant 0 : index
    %549 = vector.load %arg5[%548, %c0_238, %c0_239] : memref<8x8x256xf32, #tpu.memory_space<vmem>>, vector<1x8x256xf32>
    %550 = vector.shape_cast %549 : vector<1x8x256xf32> to vector<8x256xf32>
    %551 = arith.subf %550, %547 : vector<8x256xf32>
    %552 = math.absf %551 : vector<8x256xf32>
    %553 = arith.addf %543, %552 : vector<8x256xf32>
    %c8_i32_240 = arith.constant 8 : i32
    %cst_241 = arith.constant 0.000000e+00 : f32
    %554 = vector.broadcast %cst_241 : f32 to vector<8x256xf32>
    %555 = arith.subf %554, %553 : vector<8x256xf32>
    %556 = math.exp %555 : vector<8x256xf32>
    %c2_i32_242 = arith.constant 2 : i32
    %557 = vector.broadcast %c2_i32_242 : i32 to vector<8x256xi32>
    %558 = arith.cmpi sge, %300, %557 : vector<8x256xi32>
    %559 = arith.extui %558 : vector<8x256xi1> to vector<8x256xi32>
    %560 = arith.sitofp %559 : vector<8x256xi32> to vector<8x256xf32>
    %561 = arith.mulf %556, %560 : vector<8x256xf32>
    %cst_243 = arith.constant 2.000000e+00 : f32
    %562 = vector.broadcast %cst_243 : f32 to vector<8x256xf32>
    %563 = arith.mulf %562, %561 : vector<8x256xf32>
    %564 = arith.addf %471, %563 : vector<8x256xf32>
    %565 = arith.addf %472, %561 : vector<8x256xf32>
    %cst_244 = arith.constant 0.000000e+00 : f32
    %566 = vector.broadcast %cst_244 : f32 to vector<8x256xf32>
    %c0_i32_245 = arith.constant 0 : i32
    %567 = arith.index_cast %c0_i32_245 : i32 to index
    %c0_246 = arith.constant 0 : index
    %c0_247 = arith.constant 0 : index
    %568 = vector.load %arg6[%567, %c0_246, %c0_247] : memref<8x8x256xf32, #tpu.memory_space<vmem>>, vector<1x8x256xf32>
    %569 = vector.shape_cast %568 : vector<1x8x256xf32> to vector<8x256xf32>
    %c3_i32_248 = arith.constant 3 : i32
    %570 = tpu.dynamic_rotate %569 by %c3_i32_248 dim 1 : vector<8x256xf32>, i32 -> vector<8x256xf32>
    %571 = arith.index_cast %c0_i32_245 : i32 to index
    %c0_249 = arith.constant 0 : index
    %c0_250 = arith.constant 0 : index
    %572 = vector.load %arg5[%571, %c0_249, %c0_250] : memref<8x8x256xf32, #tpu.memory_space<vmem>>, vector<1x8x256xf32>
    %573 = vector.shape_cast %572 : vector<1x8x256xf32> to vector<8x256xf32>
    %574 = arith.subf %573, %570 : vector<8x256xf32>
    %575 = math.absf %574 : vector<8x256xf32>
    %576 = arith.addf %566, %575 : vector<8x256xf32>
    %c1_i32_251 = arith.constant 1 : i32
    %577 = arith.index_cast %c1_i32_251 : i32 to index
    %c0_252 = arith.constant 0 : index
    %c0_253 = arith.constant 0 : index
    %578 = vector.load %arg6[%577, %c0_252, %c0_253] : memref<8x8x256xf32, #tpu.memory_space<vmem>>, vector<1x8x256xf32>
    %579 = vector.shape_cast %578 : vector<1x8x256xf32> to vector<8x256xf32>
    %c3_i32_254 = arith.constant 3 : i32
    %580 = tpu.dynamic_rotate %579 by %c3_i32_254 dim 1 : vector<8x256xf32>, i32 -> vector<8x256xf32>
    %581 = arith.index_cast %c1_i32_251 : i32 to index
    %c0_255 = arith.constant 0 : index
    %c0_256 = arith.constant 0 : index
    %582 = vector.load %arg5[%581, %c0_255, %c0_256] : memref<8x8x256xf32, #tpu.memory_space<vmem>>, vector<1x8x256xf32>
    %583 = vector.shape_cast %582 : vector<1x8x256xf32> to vector<8x256xf32>
    %584 = arith.subf %583, %580 : vector<8x256xf32>
    %585 = math.absf %584 : vector<8x256xf32>
    %586 = arith.addf %576, %585 : vector<8x256xf32>
    %c2_i32_257 = arith.constant 2 : i32
    %587 = arith.index_cast %c2_i32_257 : i32 to index
    %c0_258 = arith.constant 0 : index
    %c0_259 = arith.constant 0 : index
    %588 = vector.load %arg6[%587, %c0_258, %c0_259] : memref<8x8x256xf32, #tpu.memory_space<vmem>>, vector<1x8x256xf32>
    %589 = vector.shape_cast %588 : vector<1x8x256xf32> to vector<8x256xf32>
    %c3_i32_260 = arith.constant 3 : i32
    %590 = tpu.dynamic_rotate %589 by %c3_i32_260 dim 1 : vector<8x256xf32>, i32 -> vector<8x256xf32>
    %591 = arith.index_cast %c2_i32_257 : i32 to index
    %c0_261 = arith.constant 0 : index
    %c0_262 = arith.constant 0 : index
    %592 = vector.load %arg5[%591, %c0_261, %c0_262] : memref<8x8x256xf32, #tpu.memory_space<vmem>>, vector<1x8x256xf32>
    %593 = vector.shape_cast %592 : vector<1x8x256xf32> to vector<8x256xf32>
    %594 = arith.subf %593, %590 : vector<8x256xf32>
    %595 = math.absf %594 : vector<8x256xf32>
    %596 = arith.addf %586, %595 : vector<8x256xf32>
    %c3_i32_263 = arith.constant 3 : i32
    %597 = arith.index_cast %c3_i32_263 : i32 to index
    %c0_264 = arith.constant 0 : index
    %c0_265 = arith.constant 0 : index
    %598 = vector.load %arg6[%597, %c0_264, %c0_265] : memref<8x8x256xf32, #tpu.memory_space<vmem>>, vector<1x8x256xf32>
    %599 = vector.shape_cast %598 : vector<1x8x256xf32> to vector<8x256xf32>
    %c3_i32_266 = arith.constant 3 : i32
    %600 = tpu.dynamic_rotate %599 by %c3_i32_266 dim 1 : vector<8x256xf32>, i32 -> vector<8x256xf32>
    %601 = arith.index_cast %c3_i32_263 : i32 to index
    %c0_267 = arith.constant 0 : index
    %c0_268 = arith.constant 0 : index
    %602 = vector.load %arg5[%601, %c0_267, %c0_268] : memref<8x8x256xf32, #tpu.memory_space<vmem>>, vector<1x8x256xf32>
    %603 = vector.shape_cast %602 : vector<1x8x256xf32> to vector<8x256xf32>
    %604 = arith.subf %603, %600 : vector<8x256xf32>
    %605 = math.absf %604 : vector<8x256xf32>
    %606 = arith.addf %596, %605 : vector<8x256xf32>
    %c4_i32_269 = arith.constant 4 : i32
    %607 = arith.index_cast %c4_i32_269 : i32 to index
    %c0_270 = arith.constant 0 : index
    %c0_271 = arith.constant 0 : index
    %608 = vector.load %arg6[%607, %c0_270, %c0_271] : memref<8x8x256xf32, #tpu.memory_space<vmem>>, vector<1x8x256xf32>
    %609 = vector.shape_cast %608 : vector<1x8x256xf32> to vector<8x256xf32>
    %c3_i32_272 = arith.constant 3 : i32
    %610 = tpu.dynamic_rotate %609 by %c3_i32_272 dim 1 : vector<8x256xf32>, i32 -> vector<8x256xf32>
    %611 = arith.index_cast %c4_i32_269 : i32 to index
    %c0_273 = arith.constant 0 : index
    %c0_274 = arith.constant 0 : index
    %612 = vector.load %arg5[%611, %c0_273, %c0_274] : memref<8x8x256xf32, #tpu.memory_space<vmem>>, vector<1x8x256xf32>
    %613 = vector.shape_cast %612 : vector<1x8x256xf32> to vector<8x256xf32>
    %614 = arith.subf %613, %610 : vector<8x256xf32>
    %615 = math.absf %614 : vector<8x256xf32>
    %616 = arith.addf %606, %615 : vector<8x256xf32>
    %c5_i32_275 = arith.constant 5 : i32
    %617 = arith.index_cast %c5_i32_275 : i32 to index
    %c0_276 = arith.constant 0 : index
    %c0_277 = arith.constant 0 : index
    %618 = vector.load %arg6[%617, %c0_276, %c0_277] : memref<8x8x256xf32, #tpu.memory_space<vmem>>, vector<1x8x256xf32>
    %619 = vector.shape_cast %618 : vector<1x8x256xf32> to vector<8x256xf32>
    %c3_i32_278 = arith.constant 3 : i32
    %620 = tpu.dynamic_rotate %619 by %c3_i32_278 dim 1 : vector<8x256xf32>, i32 -> vector<8x256xf32>
    %621 = arith.index_cast %c5_i32_275 : i32 to index
    %c0_279 = arith.constant 0 : index
    %c0_280 = arith.constant 0 : index
    %622 = vector.load %arg5[%621, %c0_279, %c0_280] : memref<8x8x256xf32, #tpu.memory_space<vmem>>, vector<1x8x256xf32>
    %623 = vector.shape_cast %622 : vector<1x8x256xf32> to vector<8x256xf32>
    %624 = arith.subf %623, %620 : vector<8x256xf32>
    %625 = math.absf %624 : vector<8x256xf32>
    %626 = arith.addf %616, %625 : vector<8x256xf32>
    %c6_i32_281 = arith.constant 6 : i32
    %627 = arith.index_cast %c6_i32_281 : i32 to index
    %c0_282 = arith.constant 0 : index
    %c0_283 = arith.constant 0 : index
    %628 = vector.load %arg6[%627, %c0_282, %c0_283] : memref<8x8x256xf32, #tpu.memory_space<vmem>>, vector<1x8x256xf32>
    %629 = vector.shape_cast %628 : vector<1x8x256xf32> to vector<8x256xf32>
    %c3_i32_284 = arith.constant 3 : i32
    %630 = tpu.dynamic_rotate %629 by %c3_i32_284 dim 1 : vector<8x256xf32>, i32 -> vector<8x256xf32>
    %631 = arith.index_cast %c6_i32_281 : i32 to index
    %c0_285 = arith.constant 0 : index
    %c0_286 = arith.constant 0 : index
    %632 = vector.load %arg5[%631, %c0_285, %c0_286] : memref<8x8x256xf32, #tpu.memory_space<vmem>>, vector<1x8x256xf32>
    %633 = vector.shape_cast %632 : vector<1x8x256xf32> to vector<8x256xf32>
    %634 = arith.subf %633, %630 : vector<8x256xf32>
    %635 = math.absf %634 : vector<8x256xf32>
    %636 = arith.addf %626, %635 : vector<8x256xf32>
    %c7_i32_287 = arith.constant 7 : i32
    %637 = arith.index_cast %c7_i32_287 : i32 to index
    %c0_288 = arith.constant 0 : index
    %c0_289 = arith.constant 0 : index
    %638 = vector.load %arg6[%637, %c0_288, %c0_289] : memref<8x8x256xf32, #tpu.memory_space<vmem>>, vector<1x8x256xf32>
    %639 = vector.shape_cast %638 : vector<1x8x256xf32> to vector<8x256xf32>
    %c3_i32_290 = arith.constant 3 : i32
    %640 = tpu.dynamic_rotate %639 by %c3_i32_290 dim 1 : vector<8x256xf32>, i32 -> vector<8x256xf32>
    %641 = arith.index_cast %c7_i32_287 : i32 to index
    %c0_291 = arith.constant 0 : index
    %c0_292 = arith.constant 0 : index
    %642 = vector.load %arg5[%641, %c0_291, %c0_292] : memref<8x8x256xf32, #tpu.memory_space<vmem>>, vector<1x8x256xf32>
    %643 = vector.shape_cast %642 : vector<1x8x256xf32> to vector<8x256xf32>
    %644 = arith.subf %643, %640 : vector<8x256xf32>
    %645 = math.absf %644 : vector<8x256xf32>
    %646 = arith.addf %636, %645 : vector<8x256xf32>
    %c8_i32_293 = arith.constant 8 : i32
    %cst_294 = arith.constant 0.000000e+00 : f32
    %647 = vector.broadcast %cst_294 : f32 to vector<8x256xf32>
    %648 = arith.subf %647, %646 : vector<8x256xf32>
    %649 = math.exp %648 : vector<8x256xf32>
    %c3_i32_295 = arith.constant 3 : i32
    %650 = vector.broadcast %c3_i32_295 : i32 to vector<8x256xi32>
    %651 = arith.cmpi sge, %300, %650 : vector<8x256xi32>
    %652 = arith.extui %651 : vector<8x256xi1> to vector<8x256xi32>
    %653 = arith.sitofp %652 : vector<8x256xi32> to vector<8x256xf32>
    %654 = arith.mulf %649, %653 : vector<8x256xf32>
    %cst_296 = arith.constant 3.000000e+00 : f32
    %655 = vector.broadcast %cst_296 : f32 to vector<8x256xf32>
    %656 = arith.mulf %655, %654 : vector<8x256xf32>
    %657 = arith.addf %564, %656 : vector<8x256xf32>
    %658 = arith.addf %565, %654 : vector<8x256xf32>
    %cst_297 = arith.constant 0.000000e+00 : f32
    %659 = vector.broadcast %cst_297 : f32 to vector<8x256xf32>
    %c0_i32_298 = arith.constant 0 : i32
    %660 = arith.index_cast %c0_i32_298 : i32 to index
    %c0_299 = arith.constant 0 : index
    %c0_300 = arith.constant 0 : index
    %661 = vector.load %arg6[%660, %c0_299, %c0_300] : memref<8x8x256xf32, #tpu.memory_space<vmem>>, vector<1x8x256xf32>
    %662 = vector.shape_cast %661 : vector<1x8x256xf32> to vector<8x256xf32>
    %c4_i32_301 = arith.constant 4 : i32
    %663 = tpu.dynamic_rotate %662 by %c4_i32_301 dim 1 : vector<8x256xf32>, i32 -> vector<8x256xf32>
    %664 = arith.index_cast %c0_i32_298 : i32 to index
    %c0_302 = arith.constant 0 : index
    %c0_303 = arith.constant 0 : index
    %665 = vector.load %arg5[%664, %c0_302, %c0_303] : memref<8x8x256xf32, #tpu.memory_space<vmem>>, vector<1x8x256xf32>
    %666 = vector.shape_cast %665 : vector<1x8x256xf32> to vector<8x256xf32>
    %667 = arith.subf %666, %663 : vector<8x256xf32>
    %668 = math.absf %667 : vector<8x256xf32>
    %669 = arith.addf %659, %668 : vector<8x256xf32>
    %c1_i32_304 = arith.constant 1 : i32
    %670 = arith.index_cast %c1_i32_304 : i32 to index
    %c0_305 = arith.constant 0 : index
    %c0_306 = arith.constant 0 : index
    %671 = vector.load %arg6[%670, %c0_305, %c0_306] : memref<8x8x256xf32, #tpu.memory_space<vmem>>, vector<1x8x256xf32>
    %672 = vector.shape_cast %671 : vector<1x8x256xf32> to vector<8x256xf32>
    %c4_i32_307 = arith.constant 4 : i32
    %673 = tpu.dynamic_rotate %672 by %c4_i32_307 dim 1 : vector<8x256xf32>, i32 -> vector<8x256xf32>
    %674 = arith.index_cast %c1_i32_304 : i32 to index
    %c0_308 = arith.constant 0 : index
    %c0_309 = arith.constant 0 : index
    %675 = vector.load %arg5[%674, %c0_308, %c0_309] : memref<8x8x256xf32, #tpu.memory_space<vmem>>, vector<1x8x256xf32>
    %676 = vector.shape_cast %675 : vector<1x8x256xf32> to vector<8x256xf32>
    %677 = arith.subf %676, %673 : vector<8x256xf32>
    %678 = math.absf %677 : vector<8x256xf32>
    %679 = arith.addf %669, %678 : vector<8x256xf32>
    %c2_i32_310 = arith.constant 2 : i32
    %680 = arith.index_cast %c2_i32_310 : i32 to index
    %c0_311 = arith.constant 0 : index
    %c0_312 = arith.constant 0 : index
    %681 = vector.load %arg6[%680, %c0_311, %c0_312] : memref<8x8x256xf32, #tpu.memory_space<vmem>>, vector<1x8x256xf32>
    %682 = vector.shape_cast %681 : vector<1x8x256xf32> to vector<8x256xf32>
    %c4_i32_313 = arith.constant 4 : i32
    %683 = tpu.dynamic_rotate %682 by %c4_i32_313 dim 1 : vector<8x256xf32>, i32 -> vector<8x256xf32>
    %684 = arith.index_cast %c2_i32_310 : i32 to index
    %c0_314 = arith.constant 0 : index
    %c0_315 = arith.constant 0 : index
    %685 = vector.load %arg5[%684, %c0_314, %c0_315] : memref<8x8x256xf32, #tpu.memory_space<vmem>>, vector<1x8x256xf32>
    %686 = vector.shape_cast %685 : vector<1x8x256xf32> to vector<8x256xf32>
    %687 = arith.subf %686, %683 : vector<8x256xf32>
    %688 = math.absf %687 : vector<8x256xf32>
    %689 = arith.addf %679, %688 : vector<8x256xf32>
    %c3_i32_316 = arith.constant 3 : i32
    %690 = arith.index_cast %c3_i32_316 : i32 to index
    %c0_317 = arith.constant 0 : index
    %c0_318 = arith.constant 0 : index
    %691 = vector.load %arg6[%690, %c0_317, %c0_318] : memref<8x8x256xf32, #tpu.memory_space<vmem>>, vector<1x8x256xf32>
    %692 = vector.shape_cast %691 : vector<1x8x256xf32> to vector<8x256xf32>
    %c4_i32_319 = arith.constant 4 : i32
    %693 = tpu.dynamic_rotate %692 by %c4_i32_319 dim 1 : vector<8x256xf32>, i32 -> vector<8x256xf32>
    %694 = arith.index_cast %c3_i32_316 : i32 to index
    %c0_320 = arith.constant 0 : index
    %c0_321 = arith.constant 0 : index
    %695 = vector.load %arg5[%694, %c0_320, %c0_321] : memref<8x8x256xf32, #tpu.memory_space<vmem>>, vector<1x8x256xf32>
    %696 = vector.shape_cast %695 : vector<1x8x256xf32> to vector<8x256xf32>
    %697 = arith.subf %696, %693 : vector<8x256xf32>
    %698 = math.absf %697 : vector<8x256xf32>
    %699 = arith.addf %689, %698 : vector<8x256xf32>
    %c4_i32_322 = arith.constant 4 : i32
    %700 = arith.index_cast %c4_i32_322 : i32 to index
    %c0_323 = arith.constant 0 : index
    %c0_324 = arith.constant 0 : index
    %701 = vector.load %arg6[%700, %c0_323, %c0_324] : memref<8x8x256xf32, #tpu.memory_space<vmem>>, vector<1x8x256xf32>
    %702 = vector.shape_cast %701 : vector<1x8x256xf32> to vector<8x256xf32>
    %c4_i32_325 = arith.constant 4 : i32
    %703 = tpu.dynamic_rotate %702 by %c4_i32_325 dim 1 : vector<8x256xf32>, i32 -> vector<8x256xf32>
    %704 = arith.index_cast %c4_i32_322 : i32 to index
    %c0_326 = arith.constant 0 : index
    %c0_327 = arith.constant 0 : index
    %705 = vector.load %arg5[%704, %c0_326, %c0_327] : memref<8x8x256xf32, #tpu.memory_space<vmem>>, vector<1x8x256xf32>
    %706 = vector.shape_cast %705 : vector<1x8x256xf32> to vector<8x256xf32>
    %707 = arith.subf %706, %703 : vector<8x256xf32>
    %708 = math.absf %707 : vector<8x256xf32>
    %709 = arith.addf %699, %708 : vector<8x256xf32>
    %c5_i32_328 = arith.constant 5 : i32
    %710 = arith.index_cast %c5_i32_328 : i32 to index
    %c0_329 = arith.constant 0 : index
    %c0_330 = arith.constant 0 : index
    %711 = vector.load %arg6[%710, %c0_329, %c0_330] : memref<8x8x256xf32, #tpu.memory_space<vmem>>, vector<1x8x256xf32>
    %712 = vector.shape_cast %711 : vector<1x8x256xf32> to vector<8x256xf32>
    %c4_i32_331 = arith.constant 4 : i32
    %713 = tpu.dynamic_rotate %712 by %c4_i32_331 dim 1 : vector<8x256xf32>, i32 -> vector<8x256xf32>
    %714 = arith.index_cast %c5_i32_328 : i32 to index
    %c0_332 = arith.constant 0 : index
    %c0_333 = arith.constant 0 : index
    %715 = vector.load %arg5[%714, %c0_332, %c0_333] : memref<8x8x256xf32, #tpu.memory_space<vmem>>, vector<1x8x256xf32>
    %716 = vector.shape_cast %715 : vector<1x8x256xf32> to vector<8x256xf32>
    %717 = arith.subf %716, %713 : vector<8x256xf32>
    %718 = math.absf %717 : vector<8x256xf32>
    %719 = arith.addf %709, %718 : vector<8x256xf32>
    %c6_i32_334 = arith.constant 6 : i32
    %720 = arith.index_cast %c6_i32_334 : i32 to index
    %c0_335 = arith.constant 0 : index
    %c0_336 = arith.constant 0 : index
    %721 = vector.load %arg6[%720, %c0_335, %c0_336] : memref<8x8x256xf32, #tpu.memory_space<vmem>>, vector<1x8x256xf32>
    %722 = vector.shape_cast %721 : vector<1x8x256xf32> to vector<8x256xf32>
    %c4_i32_337 = arith.constant 4 : i32
    %723 = tpu.dynamic_rotate %722 by %c4_i32_337 dim 1 : vector<8x256xf32>, i32 -> vector<8x256xf32>
    %724 = arith.index_cast %c6_i32_334 : i32 to index
    %c0_338 = arith.constant 0 : index
    %c0_339 = arith.constant 0 : index
    %725 = vector.load %arg5[%724, %c0_338, %c0_339] : memref<8x8x256xf32, #tpu.memory_space<vmem>>, vector<1x8x256xf32>
    %726 = vector.shape_cast %725 : vector<1x8x256xf32> to vector<8x256xf32>
    %727 = arith.subf %726, %723 : vector<8x256xf32>
    %728 = math.absf %727 : vector<8x256xf32>
    %729 = arith.addf %719, %728 : vector<8x256xf32>
    %c7_i32_340 = arith.constant 7 : i32
    %730 = arith.index_cast %c7_i32_340 : i32 to index
    %c0_341 = arith.constant 0 : index
    %c0_342 = arith.constant 0 : index
    %731 = vector.load %arg6[%730, %c0_341, %c0_342] : memref<8x8x256xf32, #tpu.memory_space<vmem>>, vector<1x8x256xf32>
    %732 = vector.shape_cast %731 : vector<1x8x256xf32> to vector<8x256xf32>
    %c4_i32_343 = arith.constant 4 : i32
    %733 = tpu.dynamic_rotate %732 by %c4_i32_343 dim 1 : vector<8x256xf32>, i32 -> vector<8x256xf32>
    %734 = arith.index_cast %c7_i32_340 : i32 to index
    %c0_344 = arith.constant 0 : index
    %c0_345 = arith.constant 0 : index
    %735 = vector.load %arg5[%734, %c0_344, %c0_345] : memref<8x8x256xf32, #tpu.memory_space<vmem>>, vector<1x8x256xf32>
    %736 = vector.shape_cast %735 : vector<1x8x256xf32> to vector<8x256xf32>
    %737 = arith.subf %736, %733 : vector<8x256xf32>
    %738 = math.absf %737 : vector<8x256xf32>
    %739 = arith.addf %729, %738 : vector<8x256xf32>
    %c8_i32_346 = arith.constant 8 : i32
    %cst_347 = arith.constant 0.000000e+00 : f32
    %740 = vector.broadcast %cst_347 : f32 to vector<8x256xf32>
    %741 = arith.subf %740, %739 : vector<8x256xf32>
    %742 = math.exp %741 : vector<8x256xf32>
    %c4_i32_348 = arith.constant 4 : i32
    %743 = vector.broadcast %c4_i32_348 : i32 to vector<8x256xi32>
    %744 = arith.cmpi sge, %300, %743 : vector<8x256xi32>
    %745 = arith.extui %744 : vector<8x256xi1> to vector<8x256xi32>
    %746 = arith.sitofp %745 : vector<8x256xi32> to vector<8x256xf32>
    %747 = arith.mulf %742, %746 : vector<8x256xf32>
    %cst_349 = arith.constant 4.000000e+00 : f32
    %748 = vector.broadcast %cst_349 : f32 to vector<8x256xf32>
    %749 = arith.mulf %748, %747 : vector<8x256xf32>
    %750 = arith.addf %657, %749 : vector<8x256xf32>
    %751 = arith.addf %658, %747 : vector<8x256xf32>
    %cst_350 = arith.constant 0.000000e+00 : f32
    %752 = vector.broadcast %cst_350 : f32 to vector<8x256xf32>
    %c0_i32_351 = arith.constant 0 : i32
    %753 = arith.index_cast %c0_i32_351 : i32 to index
    %c0_352 = arith.constant 0 : index
    %c0_353 = arith.constant 0 : index
    %754 = vector.load %arg6[%753, %c0_352, %c0_353] : memref<8x8x256xf32, #tpu.memory_space<vmem>>, vector<1x8x256xf32>
    %755 = vector.shape_cast %754 : vector<1x8x256xf32> to vector<8x256xf32>
    %c5_i32_354 = arith.constant 5 : i32
    %756 = tpu.dynamic_rotate %755 by %c5_i32_354 dim 1 : vector<8x256xf32>, i32 -> vector<8x256xf32>
    %757 = arith.index_cast %c0_i32_351 : i32 to index
    %c0_355 = arith.constant 0 : index
    %c0_356 = arith.constant 0 : index
    %758 = vector.load %arg5[%757, %c0_355, %c0_356] : memref<8x8x256xf32, #tpu.memory_space<vmem>>, vector<1x8x256xf32>
    %759 = vector.shape_cast %758 : vector<1x8x256xf32> to vector<8x256xf32>
    %760 = arith.subf %759, %756 : vector<8x256xf32>
    %761 = math.absf %760 : vector<8x256xf32>
    %762 = arith.addf %752, %761 : vector<8x256xf32>
    %c1_i32_357 = arith.constant 1 : i32
    %763 = arith.index_cast %c1_i32_357 : i32 to index
    %c0_358 = arith.constant 0 : index
    %c0_359 = arith.constant 0 : index
    %764 = vector.load %arg6[%763, %c0_358, %c0_359] : memref<8x8x256xf32, #tpu.memory_space<vmem>>, vector<1x8x256xf32>
    %765 = vector.shape_cast %764 : vector<1x8x256xf32> to vector<8x256xf32>
    %c5_i32_360 = arith.constant 5 : i32
    %766 = tpu.dynamic_rotate %765 by %c5_i32_360 dim 1 : vector<8x256xf32>, i32 -> vector<8x256xf32>
    %767 = arith.index_cast %c1_i32_357 : i32 to index
    %c0_361 = arith.constant 0 : index
    %c0_362 = arith.constant 0 : index
    %768 = vector.load %arg5[%767, %c0_361, %c0_362] : memref<8x8x256xf32, #tpu.memory_space<vmem>>, vector<1x8x256xf32>
    %769 = vector.shape_cast %768 : vector<1x8x256xf32> to vector<8x256xf32>
    %770 = arith.subf %769, %766 : vector<8x256xf32>
    %771 = math.absf %770 : vector<8x256xf32>
    %772 = arith.addf %762, %771 : vector<8x256xf32>
    %c2_i32_363 = arith.constant 2 : i32
    %773 = arith.index_cast %c2_i32_363 : i32 to index
    %c0_364 = arith.constant 0 : index
    %c0_365 = arith.constant 0 : index
    %774 = vector.load %arg6[%773, %c0_364, %c0_365] : memref<8x8x256xf32, #tpu.memory_space<vmem>>, vector<1x8x256xf32>
    %775 = vector.shape_cast %774 : vector<1x8x256xf32> to vector<8x256xf32>
    %c5_i32_366 = arith.constant 5 : i32
    %776 = tpu.dynamic_rotate %775 by %c5_i32_366 dim 1 : vector<8x256xf32>, i32 -> vector<8x256xf32>
    %777 = arith.index_cast %c2_i32_363 : i32 to index
    %c0_367 = arith.constant 0 : index
    %c0_368 = arith.constant 0 : index
    %778 = vector.load %arg5[%777, %c0_367, %c0_368] : memref<8x8x256xf32, #tpu.memory_space<vmem>>, vector<1x8x256xf32>
    %779 = vector.shape_cast %778 : vector<1x8x256xf32> to vector<8x256xf32>
    %780 = arith.subf %779, %776 : vector<8x256xf32>
    %781 = math.absf %780 : vector<8x256xf32>
    %782 = arith.addf %772, %781 : vector<8x256xf32>
    %c3_i32_369 = arith.constant 3 : i32
    %783 = arith.index_cast %c3_i32_369 : i32 to index
    %c0_370 = arith.constant 0 : index
    %c0_371 = arith.constant 0 : index
    %784 = vector.load %arg6[%783, %c0_370, %c0_371] : memref<8x8x256xf32, #tpu.memory_space<vmem>>, vector<1x8x256xf32>
    %785 = vector.shape_cast %784 : vector<1x8x256xf32> to vector<8x256xf32>
    %c5_i32_372 = arith.constant 5 : i32
    %786 = tpu.dynamic_rotate %785 by %c5_i32_372 dim 1 : vector<8x256xf32>, i32 -> vector<8x256xf32>
    %787 = arith.index_cast %c3_i32_369 : i32 to index
    %c0_373 = arith.constant 0 : index
    %c0_374 = arith.constant 0 : index
    %788 = vector.load %arg5[%787, %c0_373, %c0_374] : memref<8x8x256xf32, #tpu.memory_space<vmem>>, vector<1x8x256xf32>
    %789 = vector.shape_cast %788 : vector<1x8x256xf32> to vector<8x256xf32>
    %790 = arith.subf %789, %786 : vector<8x256xf32>
    %791 = math.absf %790 : vector<8x256xf32>
    %792 = arith.addf %782, %791 : vector<8x256xf32>
    %c4_i32_375 = arith.constant 4 : i32
    %793 = arith.index_cast %c4_i32_375 : i32 to index
    %c0_376 = arith.constant 0 : index
    %c0_377 = arith.constant 0 : index
    %794 = vector.load %arg6[%793, %c0_376, %c0_377] : memref<8x8x256xf32, #tpu.memory_space<vmem>>, vector<1x8x256xf32>
    %795 = vector.shape_cast %794 : vector<1x8x256xf32> to vector<8x256xf32>
    %c5_i32_378 = arith.constant 5 : i32
    %796 = tpu.dynamic_rotate %795 by %c5_i32_378 dim 1 : vector<8x256xf32>, i32 -> vector<8x256xf32>
    %797 = arith.index_cast %c4_i32_375 : i32 to index
    %c0_379 = arith.constant 0 : index
    %c0_380 = arith.constant 0 : index
    %798 = vector.load %arg5[%797, %c0_379, %c0_380] : memref<8x8x256xf32, #tpu.memory_space<vmem>>, vector<1x8x256xf32>
    %799 = vector.shape_cast %798 : vector<1x8x256xf32> to vector<8x256xf32>
    %800 = arith.subf %799, %796 : vector<8x256xf32>
    %801 = math.absf %800 : vector<8x256xf32>
    %802 = arith.addf %792, %801 : vector<8x256xf32>
    %c5_i32_381 = arith.constant 5 : i32
    %803 = arith.index_cast %c5_i32_381 : i32 to index
    %c0_382 = arith.constant 0 : index
    %c0_383 = arith.constant 0 : index
    %804 = vector.load %arg6[%803, %c0_382, %c0_383] : memref<8x8x256xf32, #tpu.memory_space<vmem>>, vector<1x8x256xf32>
    %805 = vector.shape_cast %804 : vector<1x8x256xf32> to vector<8x256xf32>
    %c5_i32_384 = arith.constant 5 : i32
    %806 = tpu.dynamic_rotate %805 by %c5_i32_384 dim 1 : vector<8x256xf32>, i32 -> vector<8x256xf32>
    %807 = arith.index_cast %c5_i32_381 : i32 to index
    %c0_385 = arith.constant 0 : index
    %c0_386 = arith.constant 0 : index
    %808 = vector.load %arg5[%807, %c0_385, %c0_386] : memref<8x8x256xf32, #tpu.memory_space<vmem>>, vector<1x8x256xf32>
    %809 = vector.shape_cast %808 : vector<1x8x256xf32> to vector<8x256xf32>
    %810 = arith.subf %809, %806 : vector<8x256xf32>
    %811 = math.absf %810 : vector<8x256xf32>
    %812 = arith.addf %802, %811 : vector<8x256xf32>
    %c6_i32_387 = arith.constant 6 : i32
    %813 = arith.index_cast %c6_i32_387 : i32 to index
    %c0_388 = arith.constant 0 : index
    %c0_389 = arith.constant 0 : index
    %814 = vector.load %arg6[%813, %c0_388, %c0_389] : memref<8x8x256xf32, #tpu.memory_space<vmem>>, vector<1x8x256xf32>
    %815 = vector.shape_cast %814 : vector<1x8x256xf32> to vector<8x256xf32>
    %c5_i32_390 = arith.constant 5 : i32
    %816 = tpu.dynamic_rotate %815 by %c5_i32_390 dim 1 : vector<8x256xf32>, i32 -> vector<8x256xf32>
    %817 = arith.index_cast %c6_i32_387 : i32 to index
    %c0_391 = arith.constant 0 : index
    %c0_392 = arith.constant 0 : index
    %818 = vector.load %arg5[%817, %c0_391, %c0_392] : memref<8x8x256xf32, #tpu.memory_space<vmem>>, vector<1x8x256xf32>
    %819 = vector.shape_cast %818 : vector<1x8x256xf32> to vector<8x256xf32>
    %820 = arith.subf %819, %816 : vector<8x256xf32>
    %821 = math.absf %820 : vector<8x256xf32>
    %822 = arith.addf %812, %821 : vector<8x256xf32>
    %c7_i32_393 = arith.constant 7 : i32
    %823 = arith.index_cast %c7_i32_393 : i32 to index
    %c0_394 = arith.constant 0 : index
    %c0_395 = arith.constant 0 : index
    %824 = vector.load %arg6[%823, %c0_394, %c0_395] : memref<8x8x256xf32, #tpu.memory_space<vmem>>, vector<1x8x256xf32>
    %825 = vector.shape_cast %824 : vector<1x8x256xf32> to vector<8x256xf32>
    %c5_i32_396 = arith.constant 5 : i32
    %826 = tpu.dynamic_rotate %825 by %c5_i32_396 dim 1 : vector<8x256xf32>, i32 -> vector<8x256xf32>
    %827 = arith.index_cast %c7_i32_393 : i32 to index
    %c0_397 = arith.constant 0 : index
    %c0_398 = arith.constant 0 : index
    %828 = vector.load %arg5[%827, %c0_397, %c0_398] : memref<8x8x256xf32, #tpu.memory_space<vmem>>, vector<1x8x256xf32>
    %829 = vector.shape_cast %828 : vector<1x8x256xf32> to vector<8x256xf32>
    %830 = arith.subf %829, %826 : vector<8x256xf32>
    %831 = math.absf %830 : vector<8x256xf32>
    %832 = arith.addf %822, %831 : vector<8x256xf32>
    %c8_i32_399 = arith.constant 8 : i32
    %cst_400 = arith.constant 0.000000e+00 : f32
    %833 = vector.broadcast %cst_400 : f32 to vector<8x256xf32>
    %834 = arith.subf %833, %832 : vector<8x256xf32>
    %835 = math.exp %834 : vector<8x256xf32>
    %c5_i32_401 = arith.constant 5 : i32
    %836 = vector.broadcast %c5_i32_401 : i32 to vector<8x256xi32>
    %837 = arith.cmpi sge, %300, %836 : vector<8x256xi32>
    %838 = arith.extui %837 : vector<8x256xi1> to vector<8x256xi32>
    %839 = arith.sitofp %838 : vector<8x256xi32> to vector<8x256xf32>
    %840 = arith.mulf %835, %839 : vector<8x256xf32>
    %cst_402 = arith.constant 5.000000e+00 : f32
    %841 = vector.broadcast %cst_402 : f32 to vector<8x256xf32>
    %842 = arith.mulf %841, %840 : vector<8x256xf32>
    %843 = arith.addf %750, %842 : vector<8x256xf32>
    %844 = arith.addf %751, %840 : vector<8x256xf32>
    %cst_403 = arith.constant 0.000000e+00 : f32
    %845 = vector.broadcast %cst_403 : f32 to vector<8x256xf32>
    %c0_i32_404 = arith.constant 0 : i32
    %846 = arith.index_cast %c0_i32_404 : i32 to index
    %c0_405 = arith.constant 0 : index
    %c0_406 = arith.constant 0 : index
    %847 = vector.load %arg6[%846, %c0_405, %c0_406] : memref<8x8x256xf32, #tpu.memory_space<vmem>>, vector<1x8x256xf32>
    %848 = vector.shape_cast %847 : vector<1x8x256xf32> to vector<8x256xf32>
    %c6_i32_407 = arith.constant 6 : i32
    %849 = tpu.dynamic_rotate %848 by %c6_i32_407 dim 1 : vector<8x256xf32>, i32 -> vector<8x256xf32>
    %850 = arith.index_cast %c0_i32_404 : i32 to index
    %c0_408 = arith.constant 0 : index
    %c0_409 = arith.constant 0 : index
    %851 = vector.load %arg5[%850, %c0_408, %c0_409] : memref<8x8x256xf32, #tpu.memory_space<vmem>>, vector<1x8x256xf32>
    %852 = vector.shape_cast %851 : vector<1x8x256xf32> to vector<8x256xf32>
    %853 = arith.subf %852, %849 : vector<8x256xf32>
    %854 = math.absf %853 : vector<8x256xf32>
    %855 = arith.addf %845, %854 : vector<8x256xf32>
    %c1_i32_410 = arith.constant 1 : i32
    %856 = arith.index_cast %c1_i32_410 : i32 to index
    %c0_411 = arith.constant 0 : index
    %c0_412 = arith.constant 0 : index
    %857 = vector.load %arg6[%856, %c0_411, %c0_412] : memref<8x8x256xf32, #tpu.memory_space<vmem>>, vector<1x8x256xf32>
    %858 = vector.shape_cast %857 : vector<1x8x256xf32> to vector<8x256xf32>
    %c6_i32_413 = arith.constant 6 : i32
    %859 = tpu.dynamic_rotate %858 by %c6_i32_413 dim 1 : vector<8x256xf32>, i32 -> vector<8x256xf32>
    %860 = arith.index_cast %c1_i32_410 : i32 to index
    %c0_414 = arith.constant 0 : index
    %c0_415 = arith.constant 0 : index
    %861 = vector.load %arg5[%860, %c0_414, %c0_415] : memref<8x8x256xf32, #tpu.memory_space<vmem>>, vector<1x8x256xf32>
    %862 = vector.shape_cast %861 : vector<1x8x256xf32> to vector<8x256xf32>
    %863 = arith.subf %862, %859 : vector<8x256xf32>
    %864 = math.absf %863 : vector<8x256xf32>
    %865 = arith.addf %855, %864 : vector<8x256xf32>
    %c2_i32_416 = arith.constant 2 : i32
    %866 = arith.index_cast %c2_i32_416 : i32 to index
    %c0_417 = arith.constant 0 : index
    %c0_418 = arith.constant 0 : index
    %867 = vector.load %arg6[%866, %c0_417, %c0_418] : memref<8x8x256xf32, #tpu.memory_space<vmem>>, vector<1x8x256xf32>
    %868 = vector.shape_cast %867 : vector<1x8x256xf32> to vector<8x256xf32>
    %c6_i32_419 = arith.constant 6 : i32
    %869 = tpu.dynamic_rotate %868 by %c6_i32_419 dim 1 : vector<8x256xf32>, i32 -> vector<8x256xf32>
    %870 = arith.index_cast %c2_i32_416 : i32 to index
    %c0_420 = arith.constant 0 : index
    %c0_421 = arith.constant 0 : index
    %871 = vector.load %arg5[%870, %c0_420, %c0_421] : memref<8x8x256xf32, #tpu.memory_space<vmem>>, vector<1x8x256xf32>
    %872 = vector.shape_cast %871 : vector<1x8x256xf32> to vector<8x256xf32>
    %873 = arith.subf %872, %869 : vector<8x256xf32>
    %874 = math.absf %873 : vector<8x256xf32>
    %875 = arith.addf %865, %874 : vector<8x256xf32>
    %c3_i32_422 = arith.constant 3 : i32
    %876 = arith.index_cast %c3_i32_422 : i32 to index
    %c0_423 = arith.constant 0 : index
    %c0_424 = arith.constant 0 : index
    %877 = vector.load %arg6[%876, %c0_423, %c0_424] : memref<8x8x256xf32, #tpu.memory_space<vmem>>, vector<1x8x256xf32>
    %878 = vector.shape_cast %877 : vector<1x8x256xf32> to vector<8x256xf32>
    %c6_i32_425 = arith.constant 6 : i32
    %879 = tpu.dynamic_rotate %878 by %c6_i32_425 dim 1 : vector<8x256xf32>, i32 -> vector<8x256xf32>
    %880 = arith.index_cast %c3_i32_422 : i32 to index
    %c0_426 = arith.constant 0 : index
    %c0_427 = arith.constant 0 : index
    %881 = vector.load %arg5[%880, %c0_426, %c0_427] : memref<8x8x256xf32, #tpu.memory_space<vmem>>, vector<1x8x256xf32>
    %882 = vector.shape_cast %881 : vector<1x8x256xf32> to vector<8x256xf32>
    %883 = arith.subf %882, %879 : vector<8x256xf32>
    %884 = math.absf %883 : vector<8x256xf32>
    %885 = arith.addf %875, %884 : vector<8x256xf32>
    %c4_i32_428 = arith.constant 4 : i32
    %886 = arith.index_cast %c4_i32_428 : i32 to index
    %c0_429 = arith.constant 0 : index
    %c0_430 = arith.constant 0 : index
    %887 = vector.load %arg6[%886, %c0_429, %c0_430] : memref<8x8x256xf32, #tpu.memory_space<vmem>>, vector<1x8x256xf32>
    %888 = vector.shape_cast %887 : vector<1x8x256xf32> to vector<8x256xf32>
    %c6_i32_431 = arith.constant 6 : i32
    %889 = tpu.dynamic_rotate %888 by %c6_i32_431 dim 1 : vector<8x256xf32>, i32 -> vector<8x256xf32>
    %890 = arith.index_cast %c4_i32_428 : i32 to index
    %c0_432 = arith.constant 0 : index
    %c0_433 = arith.constant 0 : index
    %891 = vector.load %arg5[%890, %c0_432, %c0_433] : memref<8x8x256xf32, #tpu.memory_space<vmem>>, vector<1x8x256xf32>
    %892 = vector.shape_cast %891 : vector<1x8x256xf32> to vector<8x256xf32>
    %893 = arith.subf %892, %889 : vector<8x256xf32>
    %894 = math.absf %893 : vector<8x256xf32>
    %895 = arith.addf %885, %894 : vector<8x256xf32>
    %c5_i32_434 = arith.constant 5 : i32
    %896 = arith.index_cast %c5_i32_434 : i32 to index
    %c0_435 = arith.constant 0 : index
    %c0_436 = arith.constant 0 : index
    %897 = vector.load %arg6[%896, %c0_435, %c0_436] : memref<8x8x256xf32, #tpu.memory_space<vmem>>, vector<1x8x256xf32>
    %898 = vector.shape_cast %897 : vector<1x8x256xf32> to vector<8x256xf32>
    %c6_i32_437 = arith.constant 6 : i32
    %899 = tpu.dynamic_rotate %898 by %c6_i32_437 dim 1 : vector<8x256xf32>, i32 -> vector<8x256xf32>
    %900 = arith.index_cast %c5_i32_434 : i32 to index
    %c0_438 = arith.constant 0 : index
    %c0_439 = arith.constant 0 : index
    %901 = vector.load %arg5[%900, %c0_438, %c0_439] : memref<8x8x256xf32, #tpu.memory_space<vmem>>, vector<1x8x256xf32>
    %902 = vector.shape_cast %901 : vector<1x8x256xf32> to vector<8x256xf32>
    %903 = arith.subf %902, %899 : vector<8x256xf32>
    %904 = math.absf %903 : vector<8x256xf32>
    %905 = arith.addf %895, %904 : vector<8x256xf32>
    %c6_i32_440 = arith.constant 6 : i32
    %906 = arith.index_cast %c6_i32_440 : i32 to index
    %c0_441 = arith.constant 0 : index
    %c0_442 = arith.constant 0 : index
    %907 = vector.load %arg6[%906, %c0_441, %c0_442] : memref<8x8x256xf32, #tpu.memory_space<vmem>>, vector<1x8x256xf32>
    %908 = vector.shape_cast %907 : vector<1x8x256xf32> to vector<8x256xf32>
    %c6_i32_443 = arith.constant 6 : i32
    %909 = tpu.dynamic_rotate %908 by %c6_i32_443 dim 1 : vector<8x256xf32>, i32 -> vector<8x256xf32>
    %910 = arith.index_cast %c6_i32_440 : i32 to index
    %c0_444 = arith.constant 0 : index
    %c0_445 = arith.constant 0 : index
    %911 = vector.load %arg5[%910, %c0_444, %c0_445] : memref<8x8x256xf32, #tpu.memory_space<vmem>>, vector<1x8x256xf32>
    %912 = vector.shape_cast %911 : vector<1x8x256xf32> to vector<8x256xf32>
    %913 = arith.subf %912, %909 : vector<8x256xf32>
    %914 = math.absf %913 : vector<8x256xf32>
    %915 = arith.addf %905, %914 : vector<8x256xf32>
    %c7_i32_446 = arith.constant 7 : i32
    %916 = arith.index_cast %c7_i32_446 : i32 to index
    %c0_447 = arith.constant 0 : index
    %c0_448 = arith.constant 0 : index
    %917 = vector.load %arg6[%916, %c0_447, %c0_448] : memref<8x8x256xf32, #tpu.memory_space<vmem>>, vector<1x8x256xf32>
    %918 = vector.shape_cast %917 : vector<1x8x256xf32> to vector<8x256xf32>
    %c6_i32_449 = arith.constant 6 : i32
    %919 = tpu.dynamic_rotate %918 by %c6_i32_449 dim 1 : vector<8x256xf32>, i32 -> vector<8x256xf32>
    %920 = arith.index_cast %c7_i32_446 : i32 to index
    %c0_450 = arith.constant 0 : index
    %c0_451 = arith.constant 0 : index
    %921 = vector.load %arg5[%920, %c0_450, %c0_451] : memref<8x8x256xf32, #tpu.memory_space<vmem>>, vector<1x8x256xf32>
    %922 = vector.shape_cast %921 : vector<1x8x256xf32> to vector<8x256xf32>
    %923 = arith.subf %922, %919 : vector<8x256xf32>
    %924 = math.absf %923 : vector<8x256xf32>
    %925 = arith.addf %915, %924 : vector<8x256xf32>
    %c8_i32_452 = arith.constant 8 : i32
    %cst_453 = arith.constant 0.000000e+00 : f32
    %926 = vector.broadcast %cst_453 : f32 to vector<8x256xf32>
    %927 = arith.subf %926, %925 : vector<8x256xf32>
    %928 = math.exp %927 : vector<8x256xf32>
    %c6_i32_454 = arith.constant 6 : i32
    %929 = vector.broadcast %c6_i32_454 : i32 to vector<8x256xi32>
    %930 = arith.cmpi sge, %300, %929 : vector<8x256xi32>
    %931 = arith.extui %930 : vector<8x256xi1> to vector<8x256xi32>
    %932 = arith.sitofp %931 : vector<8x256xi32> to vector<8x256xf32>
    %933 = arith.mulf %928, %932 : vector<8x256xf32>
    %cst_455 = arith.constant 6.000000e+00 : f32
    %934 = vector.broadcast %cst_455 : f32 to vector<8x256xf32>
    %935 = arith.mulf %934, %933 : vector<8x256xf32>
    %936 = arith.addf %843, %935 : vector<8x256xf32>
    %937 = arith.addf %844, %933 : vector<8x256xf32>
    %cst_456 = arith.constant 0.000000e+00 : f32
    %938 = vector.broadcast %cst_456 : f32 to vector<8x256xf32>
    %c0_i32_457 = arith.constant 0 : i32
    %939 = arith.index_cast %c0_i32_457 : i32 to index
    %c0_458 = arith.constant 0 : index
    %c0_459 = arith.constant 0 : index
    %940 = vector.load %arg6[%939, %c0_458, %c0_459] : memref<8x8x256xf32, #tpu.memory_space<vmem>>, vector<1x8x256xf32>
    %941 = vector.shape_cast %940 : vector<1x8x256xf32> to vector<8x256xf32>
    %c7_i32_460 = arith.constant 7 : i32
    %942 = tpu.dynamic_rotate %941 by %c7_i32_460 dim 1 : vector<8x256xf32>, i32 -> vector<8x256xf32>
    %943 = arith.index_cast %c0_i32_457 : i32 to index
    %c0_461 = arith.constant 0 : index
    %c0_462 = arith.constant 0 : index
    %944 = vector.load %arg5[%943, %c0_461, %c0_462] : memref<8x8x256xf32, #tpu.memory_space<vmem>>, vector<1x8x256xf32>
    %945 = vector.shape_cast %944 : vector<1x8x256xf32> to vector<8x256xf32>
    %946 = arith.subf %945, %942 : vector<8x256xf32>
    %947 = math.absf %946 : vector<8x256xf32>
    %948 = arith.addf %938, %947 : vector<8x256xf32>
    %c1_i32_463 = arith.constant 1 : i32
    %949 = arith.index_cast %c1_i32_463 : i32 to index
    %c0_464 = arith.constant 0 : index
    %c0_465 = arith.constant 0 : index
    %950 = vector.load %arg6[%949, %c0_464, %c0_465] : memref<8x8x256xf32, #tpu.memory_space<vmem>>, vector<1x8x256xf32>
    %951 = vector.shape_cast %950 : vector<1x8x256xf32> to vector<8x256xf32>
    %c7_i32_466 = arith.constant 7 : i32
    %952 = tpu.dynamic_rotate %951 by %c7_i32_466 dim 1 : vector<8x256xf32>, i32 -> vector<8x256xf32>
    %953 = arith.index_cast %c1_i32_463 : i32 to index
    %c0_467 = arith.constant 0 : index
    %c0_468 = arith.constant 0 : index
    %954 = vector.load %arg5[%953, %c0_467, %c0_468] : memref<8x8x256xf32, #tpu.memory_space<vmem>>, vector<1x8x256xf32>
    %955 = vector.shape_cast %954 : vector<1x8x256xf32> to vector<8x256xf32>
    %956 = arith.subf %955, %952 : vector<8x256xf32>
    %957 = math.absf %956 : vector<8x256xf32>
    %958 = arith.addf %948, %957 : vector<8x256xf32>
    %c2_i32_469 = arith.constant 2 : i32
    %959 = arith.index_cast %c2_i32_469 : i32 to index
    %c0_470 = arith.constant 0 : index
    %c0_471 = arith.constant 0 : index
    %960 = vector.load %arg6[%959, %c0_470, %c0_471] : memref<8x8x256xf32, #tpu.memory_space<vmem>>, vector<1x8x256xf32>
    %961 = vector.shape_cast %960 : vector<1x8x256xf32> to vector<8x256xf32>
    %c7_i32_472 = arith.constant 7 : i32
    %962 = tpu.dynamic_rotate %961 by %c7_i32_472 dim 1 : vector<8x256xf32>, i32 -> vector<8x256xf32>
    %963 = arith.index_cast %c2_i32_469 : i32 to index
    %c0_473 = arith.constant 0 : index
    %c0_474 = arith.constant 0 : index
    %964 = vector.load %arg5[%963, %c0_473, %c0_474] : memref<8x8x256xf32, #tpu.memory_space<vmem>>, vector<1x8x256xf32>
    %965 = vector.shape_cast %964 : vector<1x8x256xf32> to vector<8x256xf32>
    %966 = arith.subf %965, %962 : vector<8x256xf32>
    %967 = math.absf %966 : vector<8x256xf32>
    %968 = arith.addf %958, %967 : vector<8x256xf32>
    %c3_i32_475 = arith.constant 3 : i32
    %969 = arith.index_cast %c3_i32_475 : i32 to index
    %c0_476 = arith.constant 0 : index
    %c0_477 = arith.constant 0 : index
    %970 = vector.load %arg6[%969, %c0_476, %c0_477] : memref<8x8x256xf32, #tpu.memory_space<vmem>>, vector<1x8x256xf32>
    %971 = vector.shape_cast %970 : vector<1x8x256xf32> to vector<8x256xf32>
    %c7_i32_478 = arith.constant 7 : i32
    %972 = tpu.dynamic_rotate %971 by %c7_i32_478 dim 1 : vector<8x256xf32>, i32 -> vector<8x256xf32>
    %973 = arith.index_cast %c3_i32_475 : i32 to index
    %c0_479 = arith.constant 0 : index
    %c0_480 = arith.constant 0 : index
    %974 = vector.load %arg5[%973, %c0_479, %c0_480] : memref<8x8x256xf32, #tpu.memory_space<vmem>>, vector<1x8x256xf32>
    %975 = vector.shape_cast %974 : vector<1x8x256xf32> to vector<8x256xf32>
    %976 = arith.subf %975, %972 : vector<8x256xf32>
    %977 = math.absf %976 : vector<8x256xf32>
    %978 = arith.addf %968, %977 : vector<8x256xf32>
    %c4_i32_481 = arith.constant 4 : i32
    %979 = arith.index_cast %c4_i32_481 : i32 to index
    %c0_482 = arith.constant 0 : index
    %c0_483 = arith.constant 0 : index
    %980 = vector.load %arg6[%979, %c0_482, %c0_483] : memref<8x8x256xf32, #tpu.memory_space<vmem>>, vector<1x8x256xf32>
    %981 = vector.shape_cast %980 : vector<1x8x256xf32> to vector<8x256xf32>
    %c7_i32_484 = arith.constant 7 : i32
    %982 = tpu.dynamic_rotate %981 by %c7_i32_484 dim 1 : vector<8x256xf32>, i32 -> vector<8x256xf32>
    %983 = arith.index_cast %c4_i32_481 : i32 to index
    %c0_485 = arith.constant 0 : index
    %c0_486 = arith.constant 0 : index
    %984 = vector.load %arg5[%983, %c0_485, %c0_486] : memref<8x8x256xf32, #tpu.memory_space<vmem>>, vector<1x8x256xf32>
    %985 = vector.shape_cast %984 : vector<1x8x256xf32> to vector<8x256xf32>
    %986 = arith.subf %985, %982 : vector<8x256xf32>
    %987 = math.absf %986 : vector<8x256xf32>
    %988 = arith.addf %978, %987 : vector<8x256xf32>
    %c5_i32_487 = arith.constant 5 : i32
    %989 = arith.index_cast %c5_i32_487 : i32 to index
    %c0_488 = arith.constant 0 : index
    %c0_489 = arith.constant 0 : index
    %990 = vector.load %arg6[%989, %c0_488, %c0_489] : memref<8x8x256xf32, #tpu.memory_space<vmem>>, vector<1x8x256xf32>
    %991 = vector.shape_cast %990 : vector<1x8x256xf32> to vector<8x256xf32>
    %c7_i32_490 = arith.constant 7 : i32
    %992 = tpu.dynamic_rotate %991 by %c7_i32_490 dim 1 : vector<8x256xf32>, i32 -> vector<8x256xf32>
    %993 = arith.index_cast %c5_i32_487 : i32 to index
    %c0_491 = arith.constant 0 : index
    %c0_492 = arith.constant 0 : index
    %994 = vector.load %arg5[%993, %c0_491, %c0_492] : memref<8x8x256xf32, #tpu.memory_space<vmem>>, vector<1x8x256xf32>
    %995 = vector.shape_cast %994 : vector<1x8x256xf32> to vector<8x256xf32>
    %996 = arith.subf %995, %992 : vector<8x256xf32>
    %997 = math.absf %996 : vector<8x256xf32>
    %998 = arith.addf %988, %997 : vector<8x256xf32>
    %c6_i32_493 = arith.constant 6 : i32
    %999 = arith.index_cast %c6_i32_493 : i32 to index
    %c0_494 = arith.constant 0 : index
    %c0_495 = arith.constant 0 : index
    %1000 = vector.load %arg6[%999, %c0_494, %c0_495] : memref<8x8x256xf32, #tpu.memory_space<vmem>>, vector<1x8x256xf32>
    %1001 = vector.shape_cast %1000 : vector<1x8x256xf32> to vector<8x256xf32>
    %c7_i32_496 = arith.constant 7 : i32
    %1002 = tpu.dynamic_rotate %1001 by %c7_i32_496 dim 1 : vector<8x256xf32>, i32 -> vector<8x256xf32>
    %1003 = arith.index_cast %c6_i32_493 : i32 to index
    %c0_497 = arith.constant 0 : index
    %c0_498 = arith.constant 0 : index
    %1004 = vector.load %arg5[%1003, %c0_497, %c0_498] : memref<8x8x256xf32, #tpu.memory_space<vmem>>, vector<1x8x256xf32>
    %1005 = vector.shape_cast %1004 : vector<1x8x256xf32> to vector<8x256xf32>
    %1006 = arith.subf %1005, %1002 : vector<8x256xf32>
    %1007 = math.absf %1006 : vector<8x256xf32>
    %1008 = arith.addf %998, %1007 : vector<8x256xf32>
    %c7_i32_499 = arith.constant 7 : i32
    %1009 = arith.index_cast %c7_i32_499 : i32 to index
    %c0_500 = arith.constant 0 : index
    %c0_501 = arith.constant 0 : index
    %1010 = vector.load %arg6[%1009, %c0_500, %c0_501] : memref<8x8x256xf32, #tpu.memory_space<vmem>>, vector<1x8x256xf32>
    %1011 = vector.shape_cast %1010 : vector<1x8x256xf32> to vector<8x256xf32>
    %c7_i32_502 = arith.constant 7 : i32
    %1012 = tpu.dynamic_rotate %1011 by %c7_i32_502 dim 1 : vector<8x256xf32>, i32 -> vector<8x256xf32>
    %1013 = arith.index_cast %c7_i32_499 : i32 to index
    %c0_503 = arith.constant 0 : index
    %c0_504 = arith.constant 0 : index
    %1014 = vector.load %arg5[%1013, %c0_503, %c0_504] : memref<8x8x256xf32, #tpu.memory_space<vmem>>, vector<1x8x256xf32>
    %1015 = vector.shape_cast %1014 : vector<1x8x256xf32> to vector<8x256xf32>
    %1016 = arith.subf %1015, %1012 : vector<8x256xf32>
    %1017 = math.absf %1016 : vector<8x256xf32>
    %1018 = arith.addf %1008, %1017 : vector<8x256xf32>
    %c8_i32_505 = arith.constant 8 : i32
    %cst_506 = arith.constant 0.000000e+00 : f32
    %1019 = vector.broadcast %cst_506 : f32 to vector<8x256xf32>
    %1020 = arith.subf %1019, %1018 : vector<8x256xf32>
    %1021 = math.exp %1020 : vector<8x256xf32>
    %c7_i32_507 = arith.constant 7 : i32
    %1022 = vector.broadcast %c7_i32_507 : i32 to vector<8x256xi32>
    %1023 = arith.cmpi sge, %300, %1022 : vector<8x256xi32>
    %1024 = arith.extui %1023 : vector<8x256xi1> to vector<8x256xi32>
    %1025 = arith.sitofp %1024 : vector<8x256xi32> to vector<8x256xf32>
    %1026 = arith.mulf %1021, %1025 : vector<8x256xf32>
    %cst_508 = arith.constant 7.000000e+00 : f32
    %1027 = vector.broadcast %cst_508 : f32 to vector<8x256xf32>
    %1028 = arith.mulf %1027, %1026 : vector<8x256xf32>
    %1029 = arith.addf %936, %1028 : vector<8x256xf32>
    %1030 = arith.addf %937, %1026 : vector<8x256xf32>
    %1031 = tpu.reciprocal %1030 : vector<8x256xf32> -> vector<8x256xf32>
    %1032 = arith.mulf %1029, %1031 : vector<8x256xf32>
    %c0_509 = arith.constant 0 : index
    %c0_510 = arith.constant 0 : index
    %1033 = vector.load %arg4[%c0_509, %c0_510] : memref<8x256xf32, #tpu.memory_space<vmem>>, vector<8x256xf32>
    tpu.vector_store %arg4[%c0_509, %c0_510], %1032 {strides = array<i32>} : memref<8x256xf32, #tpu.memory_space<vmem>>, vector<8x256xf32>,
    return
  }
  func.func @transform_0(%arg0: i32) -> i32 {
    %c0_i32 = arith.constant 0 : i32
    %c0_i32_0 = arith.constant 0 : i32
    return %c0_i32 : i32
  }
  func.func @transform_1(%arg0: i32) -> (i32, i32, i32) {
    %c0_i32 = arith.constant 0 : i32
    %c0_i32_0 = arith.constant 0 : i32
    %c0_i32_1 = arith.constant 0 : i32
    return %c0_i32, %arg0, %c0_i32_0 : i32, i32, i32
  }
  func.func @transform_2(%arg0: i32) -> (i32, i32, i32) {
    %c0_i32 = arith.constant 0 : i32
    %c0_i32_0 = arith.constant 0 : i32
    %c0_i32_1 = arith.constant 0 : i32
    return %c0_i32, %arg0, %c0_i32_0 : i32, i32, i32
  }
  func.func @transform_3(%arg0: i32) -> (i32, i32) {
    %c0_i32 = arith.constant 0 : i32
    %c0_i32_0 = arith.constant 0 : i32
    return %arg0, %c0_i32 : i32, i32
  }
}

</mosaic_0001>

<bundles_post_ra>
// kernel: tpu_custom_call.1
= control target key start
LH: loop header
LB: loop body
LE: loop exit
PB: predicated region body
PF: predicated region fallthrough
CT: control target
= control target key end

     0   :  { %8 = vsyncpa [#allocation7], 0  ;;  %s2725_s0 = inlined_call_operand.hbm [shape: f32[32], index: 0, kind: input, shape index: {}]   ;;  %s2726_s1 = inlined_call_operand.hbm [shape: f32[3,8,256], index: 1, kind: input, shape index: {}]   ;;  %s2727_s2 = inlined_call_operand.hbm [shape: f32[3,8,256], index: 2, kind: input, shape index: {}]   ;;  %s2728_s3 = inlined_call_operand.hbm [shape: f32[8,256], index: 3, kind: output, shape index: {}]  }
   0x1   :  { %9 = vsyncpa [#allocation5], 0 }
   0x2   :  { %10 = vsyncpa [#allocation10], 0 }
   0x3   :  { %11 = vsyncpa [#allocation6], 0  ;;  %s1593_s12 = smov [#allocation4]   ;;  %s1594_s15 = smov [#allocation8]  }
   0x4   :  { %19 = dma.hbm_to_smem %s2725_s0, 16, %s1593_s12, [#allocation7]  }
   0x5   :  { %s25_s16 = sshll.u32 %s1594_s15, 4  ;;  %s26_s16 = int_to_ptr.vmem [resolvable:$true] %s25_s16 }
   0x6   :  { %s1533_s17 = scalar_lea.vmem %s26_s16, 768  ;;  %p1538_p1 = scmp.lt.s32.totalorder %s26_s16, %s26_s16 }
   0x7   :  { %p1534_p0 = scmp.ne.s32.totalorder %s26_s16, %s1533_s17  ;;  %p1539_p2 = scmp.lt.s32.totalorder %s1533_s17, %s1533_s17 }
   0x9   :  { %p1540_p3 = por %p1539_p2, %p1538_p1 }
   0xb   :  { %p1541_p4 = pnand %p1540_p3, %p1534_p0 }
   0xd   :  { %1544 = shalt.err (!%p1541_p4)
}
   0xe   :  { %s1595_s18 = smov 256   ;;  %s1596_s19 = smov 16  }
   0xf   :  { %31 = dma.hbm_to_vmem [thread:$0]  %s2726_s1, 768, %s26_s16, [#allocation5], %s1595_s18, %s1595_s18, %s1596_s19  }
  0x10   :  { %s1597_s22 = smov [#allocation9]  }
  0x11   :  { %s37_s23 = sshll.u32 %s1597_s22, 4  ;;  %s38_s23 = int_to_ptr.vmem [resolvable:$true] %s37_s23 }
  0x12   :  { %s1553_s0 = scalar_lea.vmem %s38_s23, 768  ;;  %p1558_p6 = scmp.lt.s32.totalorder %s38_s23, %s38_s23 }
  0x13   :  { %p1554_p5 = scmp.ne.s32.totalorder %s38_s23, %s1553_s0  ;;  %p1559_p7 = scmp.lt.s32.totalorder %s1553_s0, %s1553_s0 }
  0x15   :  { %p1560_p8 = por %p1559_p7, %p1558_p6 }
  0x17   :  { %p1561_p9 = pnand %p1560_p8, %p1554_p5 }
  0x19   :  { %1564 = shalt.err (!%p1561_p9)
}
  0x1a   :  { %43 = dma.hbm_to_vmem [thread:$0]  %s2727_s2, 768, %s38_s23, [#allocation10], %s1595_s18, %s1595_s18, %s1596_s19  }
  0x1b   :  { %1585 = dma.done.wait [#allocation7], 16  }
  0x1c   :  { %1586 = vsyncadd [#allocation7], 4294967280 }
  0x1d   :  { %1587 = dma.done.wait [#allocation5], 768  }
  0x1e   :  { %1588 = vsyncadd [#allocation5], 4294966528 }
  0x1f   :  { %1589 = dma.done.wait [#allocation10], 768  }
  0x20   :  { %1590 = vsyncadd [#allocation10], 4294966528 }
  0x21   :  { %53 = sfence }
  0x22   :  { %s1425_s1 = sld [smem:[#allocation4 + $0x4]]  ;;  %v1636_v0 = vld [vmem:[#allocation9] sm:$0xff]  ;;  %v1638_v1 = vld [vmem:[#allocation9 + $0x8] sm:$0xff]  ;;  %v1640_v2 = vld [vmem:[#allocation9 + $0x10] sm:$0xff]  ;;  %s1598_s13 = smov 1  }
  0x23   :  { %s1426_s26 = sld [smem:[#allocation4 + $0x5]]  ;;  %v1642_v3 = vld [vmem:[#allocation9 + $0x18] sm:$0xff]  ;;  %v1644_v4 = vld [vmem:[#allocation9 + $0x20] sm:$0xff]  ;;  %v1646_v6 = vld [vmem:[#allocation9 + $0x28] sm:$0xff] }
  0x24   :  { %s1427_s27 = sld [smem:[#allocation4 + $0x6]]  ;;  %v1648_v7 = vld [vmem:[#allocation8] sm:$0xff]  ;;  %v1654_v11 = vld [vmem:[#allocation8 + $0x8] sm:$0xff]  ;;  %v1662_v15 = vld [vmem:[#allocation8 + $0x10] sm:$0xff] }
  0x25   :  { %s1428_s28 = sld [smem:[#allocation4 + $0x7]] }
  0x26   :  { %s253_s29 = sld [smem:[#allocation4]] }
  0x27   :  { %s1422_s30 = sld [smem:[#allocation4 + $0x1]] }
  0x28   :  { %v276_v5 = vstv %s1425_s1  ;;  %s1423_s2 = sld [smem:[#allocation4 + $0x2]] }
  0x29   :  { %v277_v8 = vmul.f32 %v276_v5, %v1636_v0  ;;  %v1651_v9 = vstv %s1426_s26  ;;  %s1424_s4 = sld [smem:[#allocation4 + $0x3]]  ;;  %v278_v10 = vmul.f32 %v276_v5, %v1638_v1  ;;  %v1671_v19 = vmul.f32 %v276_v5, %v1648_v7 }
  0x2a   :  { %v281_v12 = vmul.f32 %v1651_v9, %v1640_v2  ;;  %v1658_v13 = vstv %s1427_s27  ;;  %v282_v14 = vmul.f32 %v1651_v9, %v1642_v3  ;;  %s1429_s5 = sld [smem:[#allocation4 + $0x8]]  ;;  %v1678_v23 = vmul.f32 %v276_v5, %v1654_v11 }
  0x2b   :  { %v287_v16 = vmul.f32 %v1658_v13, %v1644_v4  ;;  %v1666_v17 = vstv %s1428_s28  ;;  %v288_v18 = vmul.f32 %v1658_v13, %v1646_v6  ;;  %s1430_s6 = sld [smem:[#allocation4 + $0x9]]  ;;  %v1690_v27 = vmul.f32 %v1651_v9, %v1662_v15  ;;  %s1599_s28 = smov 2  }
  0x2c   :  { %v283_v20 = vadd.f32 %v281_v12, %v277_v8  ;;  %v1673_v21 = vstv %s253_s29  ;;  %v284_v22 = vadd.f32 %v282_v14, %v278_v10  ;;  %s1675_s7 = sld [smem:[#allocation4 + $0xa]]  ;;  %s1600_s29 = smov 3  }
  0x2d   :  { %v255_v24 = vmul.f32 %v1673_v21, %v1636_v0  ;;  %v1682_v25 = vstv %s1422_s30  ;;  %v256_v26 = vmul.f32 %v1673_v21, %v1638_v1  ;;  %s1686_s8 = sld [smem:[#allocation4 + $0xb]]  ;;  %s1601_s30 = smov 4  }
  0x2e   :  { %v289_v28 = vadd.f32 %v287_v16, %v283_v20  ;;  %v259_v29 = vmul.f32 %v1682_v25, %v1640_v2  ;;  %v1694_v30 = vstv %s1423_s2  ;;  %v290_v31 = vadd.f32 %v288_v18, %v284_v22  ;;  %s1696_s9 = sld [smem:[#allocation4 + $0xc]]  ;;  %s1602_s2 = smov 5  }
  0x2f   :  { %v265_v32 = vmul.f32 %v1694_v30, %v1644_v4  ;;  %v1700_v33 = vstv %s1424_s4  ;;  %v260_v34 = vmul.f32 %v1682_v25, %v1642_v3  ;;  %v266_v35 = vmul.f32 %v1694_v30, %v1646_v6  ;;  %s1434_s10 = sld [smem:[#allocation4 + $0xd]]  ;;  %s1603_s4 = smov 6  }
  0x30   :  { %v1707_v36 = vadd.f32 %v1666_v17, %v289_v28  ;;  %v261_v37 = vadd.f32 %v259_v29, %v255_v24  ;;  %v1710_v38 = vadd.f32 %v1666_v17, %v290_v31  ;;  %v1712_v39 = vstv %s1429_s5  ;;  %s1714_s11 = sld [smem:[#allocation4 + $0xe]]  ;;  %s1604_s5 = smov 7  }
  0x31   :  { %v262_v40 = vadd.f32 %v260_v34, %v256_v26  ;;  %v301_v41 = vmul.f32 %v1712_v39, %v1638_v1  ;;  %v1718_v42 = vstv %s1430_s6  ;;  %v300_v43 = vmul.f32 %v1712_v39, %v1636_v0  ;;  %s1722_s12 = sld [smem:[#allocation4 + $0xf]]  ;;  %s1606_s6 = smov [#allocation11]  }
  0x32   :  { %564 = vrot.lane.b32.xlu1 %v1707_v36, %s1598_s13  ;;  %v267_v44 = vadd.f32 %v265_v32, %v261_v37  ;;  %v305_v45 = vmul.f32 %v1718_v42, %v1642_v3  ;;  %v1729_v46 = vstv %s1675_s7  ;;  %v304_v47 = vmul.f32 %v1718_v42, %v1640_v2  ;;  %s1733_s14 = sld [smem:[#allocation4 + $0x10]]  ;;  %s1380_s7 = sshll.u32 %s1606_s6, 4  ;;  %s1381_s7 = int_to_ptr.vmem [resolvable:$true] %s1380_s7 }
  0x33   :  { %v268_v48 = vadd.f32 %v266_v35, %v262_v40  ;;  %v311_v49 = vmul.f32 %v1729_v46, %v1646_v6  ;;  %v1738_v50 = vstv %s1686_s8  ;;  %v310_v51 = vmul.f32 %v1729_v46, %v1644_v4  ;;  %s1438_s15 = sld [smem:[#allocation4 + $0x11]]  ;;  %s1565_s8 = scalar_lea.vmem %s1381_s7, 256 }
  0x34   :  { %v1743_v52 = vadd.f32 %v1700_v33, %v267_v44  ;;  %v307_v53 = vadd.f32 %v305_v45, %v301_v41  ;;  %v306_v54 = vadd.f32 %v304_v47, %v300_v43  ;;  %v1746_v55 = vstv %s1696_s9  ;;  %s1748_s16 = sld [smem:[#allocation4 + $0x12]]  ;;  %p1566_p10 = scmp.ne.s32.totalorder %s1381_s7, %s1565_s8 }
  0x35   :  { %v1751_v56 = vadd.f32 %v1700_v33, %v268_v48  ;;  %v324_v57 = vmul.f32 %v1746_v55, %v1638_v1  ;;  %v1755_v58 = vstv %s1434_s10  ;;  %v323_v59 = vmul.f32 %v1746_v55, %v1636_v0  ;;  %s1759_s17 = sld [smem:[#allocation4 + $0x13]]  ;;  %p1570_p11 = scmp.lt.s32.totalorder %s1381_s7, %s1381_s7 }
  0x36   :  { %551 = vrot.lane.b32.xlu0 %v1743_v52, %s1598_s13  ;;  %566 = vrot.lane.b32.xlu1 %v1710_v38, %s1598_s13  ;;  %v313_v60 = vadd.f32 %v311_v49, %v307_v53  ;;  %v312_v61 = vadd.f32 %v310_v51, %v306_v54  ;;  %v328_v62 = vmul.f32 %v1755_v58, %v1642_v3  ;;  %v1768_v63 = vstv %s1714_s11  ;;  %s1770_s18 = sld [smem:[#allocation4 + $0x14]]  ;;  %p1571_p12 = scmp.lt.s32.totalorder %s1565_s8, %s1565_s8 }
  0x37   :  { %v334_v5 = vmul.f32 %v1768_v63, %v1646_v6  ;;  %v1775_v8 = vstv %s1722_s12  ;;  %v327_v10 = vmul.f32 %v1755_v58, %v1640_v2  ;;  %v333_v12 = vmul.f32 %v1768_v63, %v1644_v4  ;;  %s1442_s19 = sld [smem:[#allocation4 + $0x15]] }
  0x38   :  { %v1782_v14 = vadd.f32 %v1738_v50, %v313_v60  ;;  %v1785_v16 = vadd.f32 %v1738_v50, %v312_v61  ;;  %v330_v18 = vadd.f32 %v328_v62, %v324_v57  ;;  %v1788_v20 = vstv %s1733_s14  ;;  %s1790_s20 = sld [smem:[#allocation4 + $0x16]]  ;;  %p1572_p13 = por %p1571_p12, %p1570_p11 }
  0x39   :  { %v329_v22 = vadd.f32 %v327_v10, %v323_v59  ;;  %v347_v24 = vmul.f32 %v1788_v20, %v1638_v1  ;;  %v1794_v26 = vstv %s1438_s15  ;;  %v346_v28 = vmul.f32 %v1788_v20, %v1636_v0  ;;  %s1798_s21 = sld [smem:[#allocation4 + $0x17]] }
  0x3a   :  { %553 = vrot.lane.b32.xlu0 %v1751_v56, %s1598_s13  ;;  %578 = vrot.lane.b32.xlu1 %v1782_v14, %s1598_s13  ;;  %v336_v29 = vadd.f32 %v334_v5, %v330_v18  ;;  %v351_v31 = vmul.f32 %v1794_v26, %v1642_v3  ;;  %v1807_v32 = vstv %s1748_s16  ;;  %v350_v34 = vmul.f32 %v1794_v26, %v1640_v2  ;;  %s1811_s22 = sld [smem:[#allocation4 + $0x18]]  ;;  %p1573_p0 = pnand %p1572_p13, %p1566_p10 }
  0x3b   :  { %v335_v35 = vadd.f32 %v333_v12, %v329_v22  ;;  %v357_v37 = vmul.f32 %v1807_v32, %v1646_v6  ;;  %v1816_v40 = vstv %s1759_s17  ;;  %v356_v41 = vmul.f32 %v1807_v32, %v1644_v4  ;;  %s1446_s23 = sld [smem:[#allocation4 + $0x19]] }
  0x3c   :  { %v1821_v43 = vadd.f32 %v1775_v8, %v336_v29  ;;  %v353_v44 = vadd.f32 %v351_v31, %v347_v24  ;;  %v352_v45 = vadd.f32 %v350_v34, %v346_v28  ;;  %v1824_v47 = vstv %s1770_s18  ;;  %s1826_s0 = sld [smem:[#allocation4 + $0x1a]] }
  0x3d   :  { %v1829_v48 = vadd.f32 %v1775_v8, %v335_v35  ;;  %v370_v49 = vmul.f32 %v1824_v47, %v1638_v1  ;;  %v1833_v51 = vstv %s1442_s19  ;;  %v369_v53 = vmul.f32 %v1824_v47, %v1636_v0  ;;  %s1837_s24 = sld [smem:[#allocation4 + $0x1b]] }
  0x3e   :  { %576 = vrot.lane.b32.xlu0 %v1785_v16, %s1598_s13  ;;  %590 = vrot.lane.b32.xlu1 %v1821_v43, %s1598_s13  ;;  %v359_v54 = vadd.f32 %v357_v37, %v353_v44  ;;  %v358_v57 = vadd.f32 %v356_v41, %v352_v45  ;;  %v374_v59 = vmul.f32 %v1833_v51, %v1642_v3  ;;  %v1846_v60 = vstv %s1790_s20  ;;  %s1449_s25 = sld [smem:[#allocation4 + $0x1c]] }
  0x3f   :  { %2737 = vst [vmem:[#allocation16_spill] sm:$0xff] %v1829_v48  ;;  %v380_v61 = vmul.f32 %v1846_v60, %v1646_v6  ;;  %v1851_v62 = vstv %s1798_s21  ;;  %v373_v5 = vmul.f32 %v1833_v51, %v1640_v2  ;;  %v379_v10 = vmul.f32 %v1846_v60, %v1644_v4  ;;  %s1450_s1 = sld [smem:[#allocation4 + $0x1d]] }
  0x40   :  { %v1858_v12 = vadd.f32 %v1816_v40, %v359_v54  ;;  %v1861_v18 = vadd.f32 %v1816_v40, %v358_v57  ;;  %v376_v22 = vadd.f32 %v374_v59, %v370_v49  ;;  %v1864_v24 = vstv %s1811_s22  ;;  %s1451_s26 = sld [smem:[#allocation4 + $0x1e]] }
  0x41   :  { %v375_v28 = vadd.f32 %v373_v5, %v369_v53  ;;  %v393_v29 = vmul.f32 %v1864_v24, %v1638_v1  ;;  %v1868_v31 = vstv %s1446_s23  ;;  %v392_v34 = vmul.f32 %v1864_v24, %v1636_v0  ;;  %s1452_s27 = sld [smem:[#allocation4 + $0x1f]] }
  0x42   :  { %2738 = vst [vmem:[#allocation17_spill] sm:$0xff] %v1858_v12  ;;  %2739 = vst [vmem:[#allocation18_spill] sm:$0xff] %v1861_v18  ;;  %588 = vrot.lane.b32.xlu0 %v1829_v48, %s1598_s13  ;;  %602 = vrot.lane.b32.xlu1 %v1858_v12, %s1598_s13  ;;  %v382_v35 = vadd.f32 %v380_v61, %v376_v22  ;;  %v397_v37 = vmul.f32 %v1868_v31, %v1642_v3  ;;  %v1879_v41 = vstv %s1826_s0  ;;  %v1904_v48 = vld [vmem:[#allocation8 + $0x18] sm:$0xff] }
  0x43   :  { %v396_v44 = vmul.f32 %v1868_v31, %v1640_v2  ;;  %v381_v45 = vadd.f32 %v379_v10, %v375_v28  ;;  %v403_v49 = vmul.f32 %v1879_v41, %v1646_v6  ;;  %v1886_v53 = vstv %s1837_s24 }
  0x44   :  { %v402_v54 = vmul.f32 %v1879_v41, %v1644_v4  ;;  %v1891_v57 = vadd.f32 %v1851_v62, %v382_v35  ;;  %v399_v59 = vadd.f32 %v397_v37, %v393_v29  ;;  %v1893_v5 = vstv %s1449_s25 }
  0x45   :  { %v398_v61 = vadd.f32 %v396_v44, %v392_v34  ;;  %v1896_v22 = vadd.f32 %v1851_v62, %v381_v45  ;;  %v416_v10 = vmul.f32 %v1893_v5, %v1638_v1  ;;  %v1900_v28 = vstv %s1450_s1  ;;  %v1914_v1 = vld [vmem:[#allocation8 + $0x20] sm:$0xff]  ;;  %v1916_v44 = vld [vmem:[#allocation8 + $0x28] sm:$0xff] }
  0x46   :  { %2740 = vst [vmem:[#allocation19_spill] sm:$0xff] %v1891_v57  ;;  %v415_v12 = vmul.f32 %v1893_v5, %v1636_v0  ;;  %600 = vrot.lane.b32.xlu0 %v1861_v18, %s1598_s13  ;;  %614 = vrot.lane.b32.xlu1 %v1891_v57, %s1598_s13  ;;  %v405_v29 = vadd.f32 %v403_v49, %v399_v59  ;;  %v1912_v37 = vstv %s1451_s26 }
  0x47   :  { %v404_v34 = vadd.f32 %v402_v54, %v398_v61  ;;  %v420_v35 = vmul.f32 %v1900_v28, %v1642_v3  ;;  %v426_v0 = vmul.f32 %v1912_v37, %v1646_v6  ;;  %v1920_v45 = vstv %s1452_s27 }
  0x48   :  { %v419_v18 = vmul.f32 %v1900_v28, %v1640_v2  ;;  %v425_v49 = vmul.f32 %v1912_v37, %v1644_v4  ;;  %v1927_v54 = vadd.f32 %v1886_v53, %v405_v29  ;;  %v91_v61 = vmul.f32 %v1651_v9, %v1904_v48 }
  0x49   :  { %v1930_v3 = vadd.f32 %v1886_v53, %v404_v34  ;;  %v422_v59 = vadd.f32 %v420_v35, %v416_v10  ;;  %v92_v6 = vadd.f32 %v1690_v27, %v1671_v19  ;;  %v96_v2 = vmul.f32 %v1658_v13, %v1914_v1 }
  0x4a   :  { %v421_v57 = vadd.f32 %v419_v18, %v415_v12  ;;  %v97_v4 = vmul.f32 %v1658_v13, %v1916_v44  ;;  %612 = vrot.lane.b32.xlu0 %v1896_v22, %s1598_s13  ;;  %626 = vrot.lane.b32.xlu1 %v1927_v54, %s1598_s13  ;;  %v93_v29 = vadd.f32 %v91_v61, %v1678_v23 }
  0x4b   :  { %v428_v10 = vadd.f32 %v426_v0, %v422_v59  ;;  %v64_v9 = vmul.f32 %v1673_v21, %v1648_v7  ;;  %v98_v19 = vadd.f32 %v96_v2, %v92_v6  ;;  %v65_v27 = vmul.f32 %v1673_v21, %v1654_v11 }
  0x4c   :  { %v427_v12 = vadd.f32 %v425_v49, %v421_v57  ;;  %v68_v13 = vmul.f32 %v1682_v25, %v1662_v15  ;;  %v99_v34 = vadd.f32 %v97_v4, %v93_v29  ;;  %v69_v35 = vmul.f32 %v1682_v25, %v1904_v48 }
  0x4d   :  { %v1952_v18 = vadd.f32 %v1920_v45, %v428_v10  ;;  %v74_v23 = vmul.f32 %v1694_v30, %v1914_v1  ;;  %v1962_v57 = vadd.f32 %v1666_v17, %v98_v19  ;;  %v75_v49 = vmul.f32 %v1694_v30, %v1916_v44 }
  0x4e   :  { %v1959_v0 = vadd.f32 %v1920_v45, %v427_v12  ;;  %v70_v21 = vadd.f32 %v68_v13, %v64_v9  ;;  %624 = vrot.lane.b32.xlu0 %v1930_v3, %s1598_s13  ;;  %v1971_v25 = vadd.f32 %v1666_v17, %v99_v34  ;;  %v71_v59 = vadd.f32 %v69_v35, %v65_v27 }
  0x4f   :  { %638 = vrot.lane.b32.xlu1 %v1952_v18, %s1598_s13  ;;  %v109_v61 = vmul.f32 %v1712_v39, %v1648_v7  ;;  %v110_v2 = vmul.f32 %v1712_v39, %v1654_v11  ;;  %v113_v30 = vmul.f32 %v1718_v42, %v1662_v15  ;;  %v114_v4 = vmul.f32 %v1718_v42, %v1904_v48 }
  0x50   :  { %v76_v6 = vadd.f32 %v74_v23, %v70_v21  ;;  %v77_v10 = vadd.f32 %v75_v49, %v71_v59  ;;  %v119_v29 = vmul.f32 %v1729_v46, %v1914_v1  ;;  %v120_v17 = vmul.f32 %v1729_v46, %v1916_v44 }
  0x51   :  { %v132_v9 = vmul.f32 %v1746_v55, %v1648_v7  ;;  %v115_v39 = vadd.f32 %v113_v30, %v109_v61  ;;  %v116_v19 = vadd.f32 %v114_v4, %v110_v2  ;;  %v133_v27 = vmul.f32 %v1746_v55, %v1654_v11 }
  0x52   :  { %v1988_v12 = vadd.f32 %v1700_v33, %v76_v6  ;;  %636 = vrot.lane.b32.xlu0 %v1959_v0, %s1598_s13  ;;  %v1997_v42 = vadd.f32 %v1700_v33, %v77_v10  ;;  %v136_v46 = vmul.f32 %v1755_v58, %v1662_v15  ;;  %v137_v13 = vmul.f32 %v1755_v58, %v1904_v48 }
  0x53   :  { %668 = vrot.lane.b32.xlu1 %v1751_v56, %s1599_s28  ;;  %v121_v34 = vadd.f32 %v119_v29, %v115_v39  ;;  %v122_v35 = vadd.f32 %v120_v17, %v116_v19  ;;  %v142_v55 = vmul.f32 %v1768_v63, %v1914_v1  ;;  %v143_v23 = vmul.f32 %v1768_v63, %v1916_v44 }
  0x54   :  { %v138_v21 = vadd.f32 %v136_v46, %v132_v9  ;;  %v139_v49 = vadd.f32 %v137_v13, %v133_v27  ;;  %v155_v33 = vmul.f32 %v1788_v20, %v1648_v7  ;;  %v156_v59 = vmul.f32 %v1788_v20, %v1654_v11 }
  0x55   :  { %v2012_v61 = vadd.f32 %v1738_v50, %v121_v34  ;;  %v2015_v58 = vadd.f32 %v1738_v50, %v122_v35  ;;  %v159_v6 = vmul.f32 %v1794_v26, %v1662_v15  ;;  %v160_v63 = vmul.f32 %v1794_v26, %v1904_v48 }
  0x56   :  { %666 = vrot.lane.b32.xlu0 %v1743_v52, %s1599_s28  ;;  %v144_v2 = vadd.f32 %v142_v55, %v138_v21  ;;  %v145_v20 = vadd.f32 %v143_v23, %v139_v49  ;;  %v165_v30 = vmul.f32 %v1807_v32, %v1914_v1  ;;  %v166_v10 = vmul.f32 %v1807_v32, %v1916_v44 }
  0x57   :  { %681 = vrot.lane.b32.xlu1 %v1710_v38, %s1599_s28  ;;  %v161_v4 = vadd.f32 %v159_v6, %v155_v33  ;;  %v162_v50 = vadd.f32 %v160_v63, %v156_v59  ;;  %v178_v29 = vmul.f32 %v1824_v47, %v1648_v7  ;;  %v179_v9 = vmul.f32 %v1824_v47, %v1654_v11 }
  0x58   :  { %v2032_v26 = vadd.f32 %v1775_v8, %v144_v2  ;;  %v2035_v17 = vadd.f32 %v1775_v8, %v145_v20  ;;  %v182_v39 = vmul.f32 %v1833_v51, %v1662_v15  ;;  %v183_v32 = vmul.f32 %v1833_v51, %v1904_v48 }
  0x59   :  { %v167_v19 = vadd.f32 %v165_v30, %v161_v4  ;;  %v168_v27 = vadd.f32 %v166_v10, %v162_v50  ;;  %v188_v46 = vmul.f32 %v1846_v60, %v1914_v1  ;;  %v189_v47 = vmul.f32 %v1846_v60, %v1916_v44 }
  0x5a   :  { %679 = vrot.lane.b32.xlu0 %v1707_v36, %s1599_s28  ;;  %v184_v8 = vadd.f32 %v182_v39, %v178_v29  ;;  %v201_v13 = vmul.f32 %v1864_v24, %v1648_v7  ;;  %v185_v35 = vadd.f32 %v183_v32, %v179_v9  ;;  %v202_v55 = vmul.f32 %v1864_v24, %v1654_v11 }
  0x5b   :  { %693 = vrot.lane.b32.xlu1 %v1782_v14, %s1599_s28  ;;  %v2054_v34 = vadd.f32 %v1816_v40, %v167_v19  ;;  %v2057_v51 = vadd.f32 %v1816_v40, %v168_v27  ;;  %v205_v21 = vmul.f32 %v1868_v31, %v1662_v15  ;;  %v206_v60 = vmul.f32 %v1868_v31, %v1904_v48 }
  0x5c   :  { %v190_v23 = vadd.f32 %v188_v46, %v184_v8  ;;  %v211_v49 = vmul.f32 %v1879_v41, %v1914_v1  ;;  %v191_v33 = vadd.f32 %v189_v47, %v185_v35  ;;  %v212_v59 = vmul.f32 %v1879_v41, %v1916_v44  ;;  %v2743_v35 = vld [vmem:[#allocation18_spill] sm:$0xff] }
  0x5d   :  { %v224_v40 = vmul.f32 %v1893_v5, %v1648_v7  ;;  %v225_v24 = vmul.f32 %v1893_v5, %v1654_v11  ;;  %v207_v6 = vadd.f32 %v205_v21, %v201_v13  ;;  %v208_v63 = vadd.f32 %v206_v60, %v202_v55  ;;  %v2744_v55 = vld [vmem:[#allocation19_spill] sm:$0xff] }
  0x5e   :  { %691 = vrot.lane.b32.xlu0 %v1785_v16, %s1599_s28  ;;  %v2078_v31 = vadd.f32 %v1851_v62, %v190_v23  ;;  %v2081_v2 = vadd.f32 %v1851_v62, %v191_v33  ;;  %v228_v7 = vmul.f32 %v1900_v28, %v1662_v15  ;;  %v229_v11 = vmul.f32 %v1900_v28, %v1904_v48  ;;  %v2741_v15 = vld [vmem:[#allocation16_spill] sm:$0xff]  ;;  %v2742_v48 = vld [vmem:[#allocation17_spill] sm:$0xff] }
  0x5f   :  { %705 = vrot.lane.b32.xlu1 %v1821_v43, %s1599_s28  ;;  %v234_v41 = vmul.f32 %v1912_v37, %v1914_v1  ;;  %v213_v5 = vadd.f32 %v211_v49, %v207_v6  ;;  %v214_v20 = vadd.f32 %v212_v59, %v208_v63  ;;  %v235_v30 = vmul.f32 %v1912_v37, %v1916_v44 }
  0x60   :  { %v230_v4 = vadd.f32 %v228_v7, %v224_v40  ;;  %v231_v50 = vadd.f32 %v229_v11, %v225_v24  ;;  %v467_v62 = vsub.f32 %v1988_v12, %v1743_v52  ;;  %v468_v10 = vsub.f32 %v1997_v42, %v1751_v56 }
  0x61   :  { %v2100_v28 = vadd.f32 %v1886_v53, %v213_v5  ;;  %v2103_v1 = vadd.f32 %v1886_v53, %v214_v20  ;;  %v477_v37 = vsub.f32 %v1962_v57, %v1707_v36  ;;  %v478_v19 = vsub.f32 %v1971_v25, %v1710_v38 }
  0x62   :  { %703 = vrot.lane.b32.xlu0 %v2741_v15, %s1599_s28  ;;  %v236_v44 = vadd.f32 %v234_v41, %v230_v4  ;;  %v237_v29 = vadd.f32 %v235_v30, %v231_v50  ;;  %v469_v9 = vand.u32 2147483647, %v467_v62  ;;  %v470_v39 = vand.u32 2147483647, %v468_v10 }
  0x63   :  { %717 = vrot.lane.b32.xlu1 %v2742_v48, %s1599_s28  ;;  %v479_v27 = vand.u32 2147483647, %v477_v37  ;;  %v487_v32 = vsub.f32 %v2012_v61, %v1785_v16  ;;  %v488_v46 = vsub.f32 %v2015_v58, %v1782_v14  ;;  %v497_v47 = vsub.f32 %v2032_v26, %v2741_v15 }
  0x64   :  { %v2114_v53 = vadd.f32 %v1920_v45, %v236_v44  ;;  %v2117_v8 = vadd.f32 %v1920_v45, %v237_v29  ;;  %v498_v13 = vsub.f32 %v2035_v17, %v1821_v43  ;;  %v480_v23 = vand.u32 2147483647, %v478_v19 }
  0x65   :  { %v481_v21 = vadd.f32 %v479_v27, %v469_v9  ;;  %v489_v60 = vand.u32 2147483647, %v487_v32  ;;  %v490_v49 = vand.u32 2147483647, %v488_v46  ;;  %v499_v33 = vand.u32 2147483647, %v497_v47 }
  0x66   :  { %715 = vrot.lane.b32.xlu0 %v2743_v35, %s1599_s28  ;;  %v500_v59 = vand.u32 2147483647, %v498_v13  ;;  %v507_v45 = vsub.f32 %v2054_v34, %v2743_v35  ;;  %v508_v40 = vsub.f32 %v2057_v51, %v2742_v48  ;;  %v482_v24 = vadd.f32 %v480_v23, %v470_v39 }
  0x67   :  { %729 = vrot.lane.b32.xlu1 %v2744_v55, %s1599_s28  ;;  %v491_v6 = vadd.f32 %v489_v60, %v481_v21  ;;  %v517_v63 = vsub.f32 %v2078_v31, %v1896_v22  ;;  %v518_v7 = vsub.f32 %v2081_v2, %v2744_v55  ;;  %v527_v41 = vsub.f32 %v2100_v28, %v1930_v3 }
  0x68   :  { %v509_v11 = vand.u32 2147483647, %v507_v45  ;;  %v492_v5 = vadd.f32 %v490_v49, %v482_v24  ;;  %v510_v30 = vand.u32 2147483647, %v508_v40  ;;  %v528_v62 = vsub.f32 %v2103_v1, %v1927_v54 }
  0x69   :  { %v501_v20 = vadd.f32 %v499_v33, %v491_v6  ;;  %v519_v4 = vand.u32 2147483647, %v517_v63  ;;  %v520_v50 = vand.u32 2147483647, %v518_v7  ;;  %v537_v10 = vsub.f32 %v2114_v53, %v1959_v0 }
  0x6a   :  { %727 = vrot.lane.b32.xlu0 %v1896_v22, %s1599_s28  ;;  %v502_v37 = vadd.f32 %v500_v59, %v492_v5  ;;  %v529_v29 = vand.u32 2147483647, %v527_v41  ;;  %v538_v9 = vsub.f32 %v2117_v8, %v1952_v18  ;;  %v530_v27 = vand.u32 2147483647, %v528_v62 }
  0x6b   :  { %741 = vrot.lane.b32.xlu1 %v1927_v54, %s1599_s28  ;;  %v511_v44 = vadd.f32 %v509_v11, %v501_v20  ;;  %v539_v32 = vand.u32 2147483647, %v537_v10  ;;  %v436_v49 = vlaneseq }
  0x6c   :  { %v512_v39 = vadd.f32 %v510_v30, %v502_v37  ;;  %v540_v13 = vand.u32 2147483647, %v538_v9 }
  0x6d   :  { %v521_v19 = vadd.f32 %v519_v4, %v511_v44  ;;  %v2191_v33 = vand.u32 127, %v436_v49 }
  0x6e   :  { %739 = vrot.lane.b32.xlu0 %v1930_v3, %s1599_s28  ;;  %v522_v46 = vadd.f32 %v520_v50, %v512_v39 }
  0x6f   :  { %753 = vrot.lane.b32.xlu1 %v1952_v18, %s1599_s28  ;;  %v531_v47 = vadd.f32 %v529_v29, %v521_v19  ;;  %vm555_vm0 = vcmp.lt.s32.totalorder %v2191_v33, 1  ;;  %vm670_vm1 = vcmp.lt.s32.totalorder %v2191_v33, 2  ;;  %vm787_vm4 = vcmp.lt.s32.totalorder %v2191_v33, 3 }
  0x70   :  { %v532_v23 = vadd.f32 %v530_v27, %v522_v46  ;;  %vm904_vm7 = vcmp.lt.s32.totalorder %v2191_v33, 4  ;;  %vm1021_vm8 = vcmp.lt.s32.totalorder %v2191_v33, 5  ;;  %vm1138_vm11 = vcmp.lt.s32.totalorder %v2191_v33, 6 }
  0x71   :  { %v2154_v21 = vadd.f32 %v539_v32, %v531_v47  ;;  %vm1255_vm12 = vcmp.lt.s32.totalorder %v2191_v33, 7 }
  0x72   :  { %751 = vrot.lane.b32.xlu0 %v1959_v0, %s1599_s28  ;;  %v2156_v60 = vadd.f32 %v540_v13, %v532_v23 }
  0x73   :  { %785 = vrot.lane.b32.xlu1 %v1751_v56, %s1600_s29 }
  0x76   :  { %783 = vrot.lane.b32.xlu0 %v1743_v52, %s1600_s29 }
  0x77   :  { %798 = vrot.lane.b32.xlu1 %v1710_v38, %s1600_s29 }
  0x7a   :  { %796 = vrot.lane.b32.xlu0 %v1707_v36, %s1600_s29 }
  0x7b   :  { %810 = vrot.lane.b32.xlu1 %v1782_v14, %s1600_s29 }
  0x7e   :  { %808 = vrot.lane.b32.xlu0 %v1785_v16, %s1600_s29 }
  0x7f   :  { %822 = vrot.lane.b32.xlu1 %v1821_v43, %s1600_s29 }
  0x82   :  { %820 = vrot.lane.b32.xlu0 %v2741_v15, %s1600_s29 }
  0x83   :  { %834 = vrot.lane.b32.xlu1 %v2742_v48, %s1600_s29 }
  0x86   :  { %832 = vrot.lane.b32.xlu0 %v2743_v35, %s1600_s29 }
  0x87   :  { %846 = vrot.lane.b32.xlu1 %v2744_v55, %s1600_s29 }
  0x8a   :  { %844 = vrot.lane.b32.xlu0 %v1896_v22, %s1600_s29 }
  0x8b   :  { %858 = vrot.lane.b32.xlu1 %v1927_v54, %s1600_s29 }
  0x8e   :  { %856 = vrot.lane.b32.xlu0 %v1930_v3, %s1600_s29 }
  0x8f   :  { %870 = vrot.lane.b32.xlu1 %v1952_v18, %s1600_s29 }
  0x92   :  { %868 = vrot.lane.b32.xlu0 %v1959_v0, %s1600_s29 }
  0x93   :  { %902 = vrot.lane.b32.xlu1 %v1751_v56, %s1601_s30 }
  0x96   :  { %900 = vrot.lane.b32.xlu0 %v1743_v52, %s1601_s30 }
  0x97   :  { %915 = vrot.lane.b32.xlu1 %v1710_v38, %s1601_s30 }
  0x9a   :  { %913 = vrot.lane.b32.xlu0 %v1707_v36, %s1601_s30 }
  0x9b   :  { %927 = vrot.lane.b32.xlu1 %v1782_v14, %s1601_s30 }
  0x9e   :  { %925 = vrot.lane.b32.xlu0 %v1785_v16, %s1601_s30 }
  0x9f   :  { %1019 = vrot.lane.b32.xlu1 %v1751_v56, %s1602_s2 }
  0xa2   :  { %1017 = vrot.lane.b32.xlu0 %v1743_v52, %s1602_s2 }
  0xa3   :  { %1032 = vrot.lane.b32.xlu1 %v1710_v38, %s1602_s2 }
  0xa4   :  { %v565_v59 = vpop.permute.xlu1 %564 }
  0xa6   :  { %1030 = vrot.lane.b32.xlu0 %v1707_v36, %s1602_s2 }
  0xa7   :  { %939 = vrot.lane.b32.xlu1 %v1821_v43, %s1601_s30 }
  0xa8   :  { %v552_v45 = vpop.permute.xlu0 %551  ;;  %v567_v40 = vpop.permute.xlu1 %566 }
  0xa9   :  { %v568_v24 = vsel %vm555_vm0, %v565_v59, %v567_v40  ;;  %v569_v6 = vsel %vm555_vm0, %v567_v40, %v565_v59 }
  0xaa   :  { %937 = vrot.lane.b32.xlu0 %v2741_v15, %s1601_s30  ;;  %v570_v63 = vsub.f32 %v1962_v57, %v569_v6  ;;  %v571_v7 = vsub.f32 %v1971_v25, %v568_v24 }
  0xab   :  { %1044 = vrot.lane.b32.xlu1 %v1782_v14, %s1602_s2 }
  0xac   :  { %v554_v11 = vpop.permute.xlu0 %553  ;;  %v579_v41 = vpop.permute.xlu1 %578  ;;  %v572_v30 = vand.u32 2147483647, %v570_v63  ;;  %v573_v4 = vand.u32 2147483647, %v571_v7 }
  0xad   :  { %v556_v5 = vsel %vm555_vm0, %v552_v45, %v554_v11  ;;  %v557_v20 = vsel %vm555_vm0, %v554_v11, %v552_v45 }
  0xae   :  { %v558_v50 = vsub.f32 %v1988_v12, %v557_v20  ;;  %v559_v62 = vsub.f32 %v1997_v42, %v556_v5  ;;  %1042 = vrot.lane.b32.xlu0 %v1785_v16, %s1602_s2 }
  0xaf   :  { %1136 = vrot.lane.b32.xlu1 %v1751_v56, %s1603_s4 }
  0xb0   :  { %v560_v10 = vand.u32 2147483647, %v558_v50  ;;  %v561_v37 = vand.u32 2147483647, %v559_v62  ;;  %v577_v44 = vpop.permute.xlu0 %576  ;;  %v591_v29 = vpop.permute.xlu1 %590 }
  0xb1   :  { %v580_v9 = vsel %vm555_vm0, %v577_v44, %v579_v41  ;;  %v581_v39 = vsel %vm555_vm0, %v579_v41, %v577_v44 }
  0xb2   :  { %v574_v19 = vadd.f32 %v572_v30, %v560_v10  ;;  %v575_v27 = vadd.f32 %v573_v4, %v561_v37  ;;  %v582_v32 = vsub.f32 %v2012_v61, %v581_v39  ;;  %v583_v46 = vsub.f32 %v2015_v58, %v580_v9  ;;  %1134 = vrot.lane.b32.xlu0 %v1743_v52, %s1603_s4 }
  0xb3   :  { %1149 = vrot.lane.b32.xlu1 %v1710_v38, %s1603_s4 }
  0xb4   :  { %v584_v47 = vand.u32 2147483647, %v582_v32  ;;  %v585_v13 = vand.u32 2147483647, %v583_v46  ;;  %v589_v23 = vpop.permute.xlu0 %588  ;;  %v603_v49 = vpop.permute.xlu1 %602 }
  0xb5   :  { %v592_v59 = vsel %vm555_vm0, %v589_v23, %v591_v29  ;;  %v593_v45 = vsel %vm555_vm0, %v591_v29, %v589_v23 }
  0xb6   :  { %v586_v40 = vadd.f32 %v584_v47, %v574_v19  ;;  %v587_v24 = vadd.f32 %v585_v13, %v575_v27  ;;  %v594_v6 = vsub.f32 %v2032_v26, %v593_v45  ;;  %v595_v63 = vsub.f32 %v2035_v17, %v592_v59  ;;  %1147 = vrot.lane.b32.xlu0 %v1707_v36, %s1603_s4 }
  0xb7   :  { %951 = vrot.lane.b32.xlu1 %v2742_v48, %s1601_s30 }
  0xb8   :  { %v596_v7 = vand.u32 2147483647, %v594_v6  ;;  %v597_v11 = vand.u32 2147483647, %v595_v63  ;;  %v601_v41 = vpop.permute.xlu0 %600  ;;  %v615_v5 = vpop.permute.xlu1 %614 }
  0xb9   :  { %v604_v20 = vsel %vm555_vm0, %v601_v41, %v603_v49  ;;  %v605_v30 = vsel %vm555_vm0, %v603_v49, %v601_v41 }
  0xba   :  { %v598_v4 = vadd.f32 %v596_v7, %v586_v40  ;;  %v599_v50 = vadd.f32 %v597_v11, %v587_v24  ;;  %v606_v62 = vsub.f32 %v2054_v34, %v605_v30  ;;  %v607_v10 = vsub.f32 %v2057_v51, %v604_v20  ;;  %949 = vrot.lane.b32.xlu0 %v2743_v35, %s1601_s30 }
  0xbb   :  { %1056 = vrot.lane.b32.xlu1 %v1821_v43, %s1602_s2 }
  0xbc   :  { %v608_v37 = vand.u32 2147483647, %v606_v62  ;;  %v609_v44 = vand.u32 2147483647, %v607_v10  ;;  %v613_v29 = vpop.permute.xlu0 %612  ;;  %v627_v9 = vpop.permute.xlu1 %626 }
  0xbd   :  { %v616_v39 = vsel %vm555_vm0, %v613_v29, %v615_v5  ;;  %v617_v19 = vsel %vm555_vm0, %v615_v5, %v613_v29 }
  0xbe   :  { %v610_v27 = vadd.f32 %v608_v37, %v598_v4  ;;  %v611_v32 = vadd.f32 %v609_v44, %v599_v50  ;;  %v618_v46 = vsub.f32 %v2078_v31, %v617_v19  ;;  %v619_v47 = vsub.f32 %v2081_v2, %v616_v39  ;;  %1054 = vrot.lane.b32.xlu0 %v2741_v15, %s1602_s2 }
  0xbf   :  { %1161 = vrot.lane.b32.xlu1 %v1782_v14, %s1603_s4  ;;  %v543_v50 = vsub.f32 0.0, %v2154_v21  ;;  %v544_v44 = vsub.f32 0.0, %v2156_v60 }
  0xc0   :  { %v620_v13 = vand.u32 2147483647, %v618_v46  ;;  %v621_v23 = vand.u32 2147483647, %v619_v47  ;;  %v625_v49 = vpop.permute.xlu0 %624 }
  0xc1   :  { %v639_v59 = vpop.permute.xlu1 %638  ;;  %v628_v45 = vsel %vm555_vm0, %v625_v49, %v627_v9  ;;  %v629_v40 = vsel %vm555_vm0, %v627_v9, %v625_v49 }
  0xc2   :  { %v622_v24 = vadd.f32 %v620_v13, %v610_v27  ;;  %v623_v6 = vadd.f32 %v621_v23, %v611_v32  ;;  %v630_v63 = vsub.f32 %v2100_v28, %v629_v40  ;;  %v631_v7 = vsub.f32 %v2103_v1, %v628_v45  ;;  %1159 = vrot.lane.b32.xlu0 %v1785_v16, %s1603_s4 }
  0xc3   :  { %1253 = vrot.lane.b32.xlu1 %v1751_v56, %s1604_s5  ;;  %v545_v32 = vmul.f32 1.442695, %v543_v50 }
  0xc4   :  { %v632_v11 = vand.u32 2147483647, %v630_v63  ;;  %v633_v41 = vand.u32 2147483647, %v631_v7  ;;  %v637_v5 = vpop.permute.xlu0 %636 }
  0xc5   :  { %v669_v20 = vpop.permute.xlu1 %668  ;;  %v640_v30 = vsel %vm555_vm0, %v637_v5, %v639_v59  ;;  %v641_v4 = vsel %vm555_vm0, %v639_v59, %v637_v5  ;;  %1481 = vpow2.f32 %v545_v32 }
  0xc6   :  { %v634_v62 = vadd.f32 %v632_v11, %v622_v24  ;;  %v635_v10 = vadd.f32 %v633_v41, %v623_v6  ;;  %v642_v37 = vsub.f32 %v2114_v53, %v641_v4  ;;  %v643_v56 = vsub.f32 %v2117_v8, %v640_v30  ;;  %1251 = vrot.lane.b32.xlu0 %v1743_v52, %s1604_s5 }
  0xc7   :  { %1266 = vrot.lane.b32.xlu1 %v1710_v38, %s1604_s5  ;;  %v547_v38 = vmul.f32 1.442695, %v544_v44 }
  0xc8   :  { %v644_v29 = vand.u32 2147483647, %v642_v37  ;;  %v645_v9 = vand.u32 2147483647, %v643_v56  ;;  %v667_v39 = vpop.permute.xlu0 %666 }
  0xc9   :  { %v682_v19 = vpop.permute.xlu1 %681  ;;  %v671_v21 = vsel %vm670_vm1, %v667_v39, %v669_v20  ;;  %v672_v27 = vsel %vm670_vm1, %v669_v20, %v667_v39  ;;  %1483 = vpow2.f32 %v547_v38 }
  0xca   :  { %v646_v46 = vadd.f32 %v644_v29, %v634_v62  ;;  %v647_v47 = vadd.f32 %v645_v9, %v635_v10  ;;  %v673_v52 = vsub.f32 %v1988_v12, %v672_v27  ;;  %v674_v13 = vsub.f32 %v1997_v42, %v671_v21  ;;  %1264 = vrot.lane.b32.xlu0 %v1707_v36, %s1604_s5 }
  0xcb   :  { %963 = vrot.lane.b32.xlu1 %v2744_v55, %s1601_s30  ;;  %v438_v62 = vadd.s32 128, %v2191_v33  ;;  %v2313_v21 = vand.u32 15, %v2191_v33 }
  0xcc   :  { %v648_v60 = vsub.f32 0.0, %v646_v46  ;;  %v649_v23 = vsub.f32 0.0, %v647_v47  ;;  %v680_v49 = vpop.permute.xlu0 %679  ;;  %v675_v7 = vand.u32 2147483647, %v673_v52  ;;  %v676_v11 = vand.u32 2147483647, %v674_v13 }
  0xcd   :  { %v694_v59 = vpop.permute.xlu1 %693  ;;  %v683_v45 = vsel %vm670_vm1, %v680_v49, %v682_v19  ;;  %v684_v40 = vsel %vm670_vm1, %v682_v19, %v680_v49  ;;  %v2319_v46 = vand.u32 15, %v438_v62  ;;  %vm654_vm2 = vcmp.ge.s32.totalorder %v2313_v21, 1 }
  0xce   :  { %v650_v24 = vmul.f32 1.442695, %v648_v60  ;;  %v652_v6 = vmul.f32 1.442695, %v649_v23  ;;  %v685_v63 = vsub.f32 %v1962_v57, %v684_v40  ;;  %v686_v36 = vsub.f32 %v1971_v25, %v683_v45  ;;  %961 = vrot.lane.b32.xlu0 %v1896_v22, %s1601_s30 }
  0xcf   :  { %1068 = vrot.lane.b32.xlu1 %v2742_v48, %s1602_s2  ;;  %vm655_vm3 = vcmp.ge.s32.totalorder %v2319_v46, 1  ;;  %vm769_vm5 = vcmp.ge.s32.totalorder %v2313_v21, 2  ;;  %vm770_vm6 = vcmp.ge.s32.totalorder %v2319_v46, 2  ;;  %vm886_vm9 = vcmp.ge.s32.totalorder %v2313_v21, 3 }
  0xd0   :  { %1485 = vpow2.f32 %v650_v24  ;;  %v687_v41 = vand.u32 2147483647, %v685_v63  ;;  %v688_v5 = vand.u32 2147483647, %v686_v36  ;;  %v692_v20 = vpop.permute.xlu0 %691  ;;  %vm887_vm10 = vcmp.ge.s32.totalorder %v2319_v46, 3 }
  0xd1   :  { %v706_v30 = vpop.permute.xlu1 %705  ;;  %1487 = vpow2.f32 %v652_v6  ;;  %v695_v4 = vsel %vm670_vm1, %v692_v20, %v694_v59  ;;  %v696_v50 = vsel %vm670_vm1, %v694_v59, %v692_v20  ;;  %vm1003_vm13 = vcmp.ge.s32.totalorder %v2313_v21, 4 }
  0xd2   :  { %v689_v10 = vadd.f32 %v687_v41, %v675_v7  ;;  %v690_v37 = vadd.f32 %v688_v5, %v676_v11  ;;  %v697_v56 = vsub.f32 %v2012_v61, %v696_v50  ;;  %v698_v44 = vsub.f32 %v2015_v58, %v695_v4  ;;  %1066 = vrot.lane.b32.xlu0 %v2743_v35, %s1602_s2  ;;  %v1482_v24 = vpop.eup %1481 }
  0xd3   :  { %1173 = vrot.lane.b32.xlu1 %v1821_v43, %s1603_s4  ;;  %vm1004_vm14 = vcmp.ge.s32.totalorder %v2319_v46, 4  ;;  %vm1120_vm15 = vcmp.ge.s32.totalorder %v2313_v21, 5  ;;  %vm1121_vm0 = vcmp.ge.s32.totalorder %v2319_v46, 5 }
  0xd4   :  { %v699_v29 = vand.u32 2147483647, %v697_v56  ;;  %v700_v9 = vand.u32 2147483647, %v698_v44  ;;  %v704_v39 = vpop.permute.xlu0 %703 }
  0xd5   :  { %v718_v19 = vpop.permute.xlu1 %717  ;;  %v707_v27 = vsel %vm670_vm1, %v704_v39, %v706_v30  ;;  %v708_v32 = vsel %vm670_vm1, %v706_v30, %v704_v39  ;;  %v1605_v30 = vmov 0.0  }
  0xd6   :  { %v701_v47 = vadd.f32 %v699_v29, %v689_v10  ;;  %v702_v52 = vadd.f32 %v700_v9, %v690_v37  ;;  %v709_v13 = vsub.f32 %v2032_v26, %v708_v32  ;;  %v710_v38 = vsub.f32 %v2035_v17, %v707_v27  ;;  %1171 = vrot.lane.b32.xlu0 %v2741_v15, %s1603_s4  ;;  %v1484_v7 = vpop.eup %1483 }
  0xd7   :  { %1278 = vrot.lane.b32.xlu1 %v1782_v14, %s1604_s5  ;;  %v1453_v4 = vsel %vm654_vm2, 1.0, %v1605_v30  ;;  %v1454_v50 = vsel %vm655_vm3, 1.0, %v1605_v30  ;;  %vm1237_vm2 = vcmp.ge.s32.totalorder %v2313_v21, 6  ;;  %vm1354_vm3 = vcmp.ge.s32.totalorder %v2313_v21, 7 }
  0xd8   :  { %v711_v60 = vand.u32 2147483647, %v709_v13  ;;  %v712_v23 = vand.u32 2147483647, %v710_v38  ;;  %v716_v49 = vpop.permute.xlu0 %715 }
  0xd9   :  { %v730_v59 = vpop.permute.xlu1 %729  ;;  %v719_v45 = vsel %vm670_vm1, %v716_v49, %v718_v19  ;;  %v720_v40 = vsel %vm670_vm1, %v718_v19, %v716_v49 }
  0xda   :  { %v713_v6 = vadd.f32 %v711_v60, %v701_v47  ;;  %v714_v63 = vadd.f32 %v712_v23, %v702_v52  ;;  %v721_v36 = vsub.f32 %v2054_v34, %v720_v40  ;;  %v722_v14 = vsub.f32 %v2057_v51, %v719_v45  ;;  %1276 = vrot.lane.b32.xlu0 %v1785_v16, %s1604_s5 }
  0xdb   :  { %975 = vrot.lane.b32.xlu1 %v1927_v54, %s1601_s30 }
  0xdc   :  { %v723_v11 = vand.u32 2147483647, %v721_v36  ;;  %v724_v41 = vand.u32 2147483647, %v722_v14  ;;  %v728_v5 = vpop.permute.xlu0 %727 }
  0xdd   :  { %v742_v20 = vpop.permute.xlu1 %741  ;;  %v1486_v62 = vpop.eup %1485  ;;  %v731_v10 = vsel %vm670_vm1, %v728_v5, %v730_v59  ;;  %v732_v16 = vsel %vm670_vm1, %v730_v59, %v728_v5 }
  0xde   :  { %v1488_v37 = vpop.eup %1487  ;;  %v725_v56 = vadd.f32 %v723_v11, %v713_v6  ;;  %v726_v44 = vadd.f32 %v724_v41, %v714_v63  ;;  %v733_v29 = vsub.f32 %v2078_v31, %v732_v16  ;;  %v734_v9 = vsub.f32 %v2081_v2, %v731_v10  ;;  %973 = vrot.lane.b32.xlu0 %v1930_v3, %s1601_s30 }
  0xdf   :  { %1080 = vrot.lane.b32.xlu1 %v2744_v55, %s1602_s2  ;;  %v2353_v39 = vmul.f32 %v1486_v62, %v1453_v4  ;;  %v2355_v19 = vmul.f32 %v1488_v37, %v1454_v50 }
  0xe0   :  { %v735_v27 = vand.u32 2147483647, %v733_v29  ;;  %v736_v32 = vand.u32 2147483647, %v734_v9  ;;  %v740_v47 = vpop.permute.xlu0 %739 }
  0xe1   :  { %v754_v52 = vpop.permute.xlu1 %753  ;;  %v743_v13 = vsel %vm670_vm1, %v740_v47, %v742_v20  ;;  %v744_v38 = vsel %vm670_vm1, %v742_v20, %v740_v47  ;;  %v2362_v60 = vadd.f32 %v1482_v24, %v2353_v39  ;;  %v2365_v23 = vadd.f32 %v1484_v7, %v2355_v19 }
  0xe2   :  { %v737_v49 = vadd.f32 %v735_v27, %v725_v56  ;;  %v738_v59 = vadd.f32 %v736_v32, %v726_v44  ;;  %v745_v45 = vsub.f32 %v2100_v28, %v744_v38  ;;  %v746_v40 = vsub.f32 %v2103_v1, %v743_v13  ;;  %1078 = vrot.lane.b32.xlu0 %v1896_v22, %s1602_s2 }
  0xe3   :  { %1185 = vrot.lane.b32.xlu1 %v2742_v48, %s1603_s4 }
  0xe4   :  { %v747_v6 = vand.u32 2147483647, %v745_v45  ;;  %v748_v63 = vand.u32 2147483647, %v746_v40  ;;  %v752_v36 = vpop.permute.xlu0 %751 }
  0xe5   :  { %v786_v24 = vpop.permute.xlu1 %785  ;;  %v755_v14 = vsel %vm670_vm1, %v752_v36, %v754_v52  ;;  %v756_v7 = vsel %vm670_vm1, %v754_v52, %v752_v36  ;;  %vm1238_vm1 = vcmp.ge.s32.totalorder %v2319_v46, 6 }
  0xe6   :  { %v749_v11 = vadd.f32 %v747_v6, %v737_v49  ;;  %v750_v41 = vadd.f32 %v748_v63, %v738_v59  ;;  %v757_v5 = vsub.f32 %v2114_v53, %v756_v7  ;;  %v758_v20 = vsub.f32 %v2117_v8, %v755_v14  ;;  %1183 = vrot.lane.b32.xlu0 %v2743_v35, %s1603_s4 }
  0xe7   :  { %1290 = vrot.lane.b32.xlu1 %v1821_v43, %s1604_s5 }
  0xe8   :  { %v759_v4 = vand.u32 2147483647, %v757_v5  ;;  %v760_v50 = vand.u32 2147483647, %v758_v20  ;;  %v784_v62 = vpop.permute.xlu0 %783 }
  0xe9   :  { %v799_v10 = vpop.permute.xlu1 %798  ;;  %v788_v16 = vsel %vm787_vm4, %v784_v62, %v786_v24  ;;  %v789_v37 = vsel %vm787_vm4, %v786_v24, %v784_v62 }
  0xea   :  { %v761_v56 = vadd.f32 %v759_v4, %v749_v11  ;;  %v762_v44 = vadd.f32 %v760_v50, %v750_v41  ;;  %v790_v29 = vsub.f32 %v1988_v12, %v789_v37  ;;  %v791_v9 = vsub.f32 %v1997_v42, %v788_v16  ;;  %1288 = vrot.lane.b32.xlu0 %v2741_v15, %s1604_s5 }
  0xeb   :  { %987 = vrot.lane.b32.xlu1 %v1952_v18, %s1601_s30 }
  0xec   :  { %v763_v43 = vsub.f32 0.0, %v761_v56  ;;  %v764_v27 = vsub.f32 0.0, %v762_v44  ;;  %v797_v32 = vpop.permute.xlu0 %796  ;;  %v792_v15 = vand.u32 2147483647, %v790_v29  ;;  %v793_v40 = vand.u32 2147483647, %v791_v9 }
  0xed   :  { %v811_v47 = vpop.permute.xlu1 %810  ;;  %v800_v52 = vsel %vm787_vm4, %v797_v32, %v799_v10  ;;  %v801_v13 = vsel %vm787_vm4, %v799_v10, %v797_v32 }
  0xee   :  { %v765_v38 = vmul.f32 1.442695, %v763_v43  ;;  %v767_v49 = vmul.f32 1.442695, %v764_v27  ;;  %v802_v59 = vsub.f32 %v1962_v57, %v801_v13  ;;  %v803_v45 = vsub.f32 %v1971_v25, %v800_v52  ;;  %985 = vrot.lane.b32.xlu0 %v1959_v0, %s1601_s30 }
  0xef   :  { %1092 = vrot.lane.b32.xlu1 %v1927_v54, %s1602_s2 }
  0xf0   :  { %1489 = vpow2.f32 %v765_v38  ;;  %v804_v6 = vand.u32 2147483647, %v802_v59  ;;  %v805_v63 = vand.u32 2147483647, %v803_v45  ;;  %v809_v36 = vpop.permute.xlu0 %808 }
  0xf1   :  { %v823_v24 = vpop.permute.xlu1 %822  ;;  %1491 = vpow2.f32 %v767_v49  ;;  %v812_v14 = vsel %vm787_vm4, %v809_v36, %v811_v47  ;;  %v813_v7 = vsel %vm787_vm4, %v811_v47, %v809_v36  ;;  %v1456_v36 = vsel %vm770_vm6, 1.0, %v1605_v30 }
  0xf2   :  { %v806_v11 = vadd.f32 %v804_v6, %v792_v15  ;;  %v807_v41 = vadd.f32 %v805_v63, %v793_v40  ;;  %v814_v5 = vsub.f32 %v2012_v61, %v813_v7  ;;  %v815_v20 = vsub.f32 %v2015_v58, %v812_v14  ;;  %1090 = vrot.lane.b32.xlu0 %v1930_v3, %s1602_s2 }
  0xf3   :  { %1197 = vrot.lane.b32.xlu1 %v2744_v55, %s1603_s4  ;;  %v1455_v63 = vsel %vm769_vm5, 1.0, %v1605_v30 }
  0xf4   :  { %v816_v4 = vand.u32 2147483647, %v814_v5  ;;  %v817_v50 = vand.u32 2147483647, %v815_v20  ;;  %v821_v62 = vpop.permute.xlu0 %820 }
  0xf5   :  { %v835_v10 = vpop.permute.xlu1 %834  ;;  %v824_v16 = vsel %vm787_vm4, %v821_v62, %v823_v24  ;;  %v825_v37 = vsel %vm787_vm4, %v823_v24, %v821_v62 }
  0xf6   :  { %v818_v56 = vadd.f32 %v816_v4, %v806_v11  ;;  %v819_v44 = vadd.f32 %v817_v50, %v807_v41  ;;  %v826_v29 = vsub.f32 %v2032_v26, %v825_v37  ;;  %v827_v9 = vsub.f32 %v2035_v17, %v824_v16  ;;  %1195 = vrot.lane.b32.xlu0 %v1896_v22, %s1603_s4 }
  0xf7   :  { %1302 = vrot.lane.b32.xlu1 %v2742_v48, %s1604_s5 }
  0xf8   :  { %v828_v43 = vand.u32 2147483647, %v826_v29  ;;  %v829_v27 = vand.u32 2147483647, %v827_v9  ;;  %v833_v32 = vpop.permute.xlu0 %832 }
  0xf9   :  { %v847_v47 = vpop.permute.xlu1 %846  ;;  %v836_v52 = vsel %vm787_vm4, %v833_v32, %v835_v10  ;;  %v837_v13 = vsel %vm787_vm4, %v835_v10, %v833_v32 }
  0xfa   :  { %v830_v38 = vadd.f32 %v828_v43, %v818_v56  ;;  %v831_v49 = vadd.f32 %v829_v27, %v819_v44  ;;  %v838_v59 = vsub.f32 %v2054_v34, %v837_v13  ;;  %v839_v48 = vsub.f32 %v2057_v51, %v836_v52  ;;  %1300 = vrot.lane.b32.xlu0 %v2743_v35, %s1604_s5 }
  0xfb   :  { %1104 = vrot.lane.b32.xlu1 %v1952_v18, %s1602_s2 }
  0xfc   :  { %v840_v45 = vand.u32 2147483647, %v838_v59  ;;  %v841_v15 = vand.u32 2147483647, %v839_v48  ;;  %v845_v40 = vpop.permute.xlu0 %844 }
  0xfd   :  { %v859_v6 = vpop.permute.xlu1 %858  ;;  %v1490_v24 = vpop.eup %1489  ;;  %v848_v14 = vsel %vm787_vm4, %v845_v40, %v847_v47  ;;  %v849_v7 = vsel %vm787_vm4, %v847_v47, %v845_v40 }
  0xfe   :  { %v1492_v11 = vpop.eup %1491  ;;  %v842_v35 = vadd.f32 %v840_v45, %v830_v38  ;;  %v843_v41 = vadd.f32 %v841_v15, %v831_v49  ;;  %v850_v5 = vsub.f32 %v2078_v31, %v849_v7  ;;  %v851_v20 = vsub.f32 %v2081_v2, %v848_v14  ;;  %1102 = vrot.lane.b32.xlu0 %v1959_v0, %s1602_s2 }
  0xff   :  { %1209 = vrot.lane.b32.xlu1 %v1927_v54, %s1603_s4  ;;  %v775_v4 = vmul.f32 %v1490_v24, %v1455_v63  ;;  %v776_v50 = vmul.f32 %v1492_v11, %v1456_v36 }
 0x100   :  { %v852_v62 = vand.u32 2147483647, %v850_v5  ;;  %v853_v10 = vand.u32 2147483647, %v851_v20  ;;  %v857_v16 = vpop.permute.xlu0 %856 }
 0x101   :  { %v871_v37 = vpop.permute.xlu1 %870  ;;  %v860_v56 = vsel %vm787_vm4, %v857_v16, %v859_v6  ;;  %v861_v44 = vsel %vm787_vm4, %v859_v6, %v857_v16  ;;  %v777_v29 = vmul.f32 2.0, %v775_v4  ;;  %v778_v9 = vmul.f32 2.0, %v776_v50 }
 0x102   :  { %v854_v43 = vadd.f32 %v852_v62, %v842_v35  ;;  %v855_v27 = vadd.f32 %v853_v10, %v843_v41  ;;  %v862_v32 = vsub.f32 %v2100_v28, %v861_v44  ;;  %v863_v47 = vsub.f32 %v2103_v1, %v860_v56  ;;  %1207 = vrot.lane.b32.xlu0 %v1930_v3, %s1603_s4 }
 0x103   :  { %1314 = vrot.lane.b32.xlu1 %v2744_v55, %s1604_s5  ;;  %v2459_v52 = vadd.f32 %v777_v29, %v2353_v39  ;;  %v2462_v13 = vadd.f32 %v778_v9, %v2355_v19  ;;  %v2465_v38 = vadd.f32 %v775_v4, %v2362_v60  ;;  %v2468_v49 = vadd.f32 %v776_v50, %v2365_v23 }
 0x104   :  { %v864_v59 = vand.u32 2147483647, %v862_v32  ;;  %v865_v48 = vand.u32 2147483647, %v863_v47  ;;  %v869_v45 = vpop.permute.xlu0 %868 }
 0x105   :  { %v903_v15 = vpop.permute.xlu1 %902  ;;  %v872_v40 = vsel %vm787_vm4, %v869_v45, %v871_v37  ;;  %v873_v55 = vsel %vm787_vm4, %v871_v37, %v869_v45  ;;  %vm1355_vm4 = vcmp.ge.s32.totalorder %v2319_v46, 7 }
 0x106   :  { %v866_v39 = vadd.f32 %v864_v59, %v854_v43  ;;  %v867_v19 = vadd.f32 %v865_v48, %v855_v27  ;;  %v874_v60 = vsub.f32 %v2114_v53, %v873_v55  ;;  %v875_v6 = vsub.f32 %v2117_v8, %v872_v40  ;;  %1312 = vrot.lane.b32.xlu0 %v1896_v22, %s1604_s5 }
 0x107   :  { %1221 = vrot.lane.b32.xlu1 %v1952_v18, %s1603_s4 }
 0x108   :  { %v876_v23 = vand.u32 2147483647, %v874_v60  ;;  %v877_v63 = vand.u32 2147483647, %v875_v6  ;;  %v901_v36 = vpop.permute.xlu0 %900 }
 0x109   :  { %v916_v24 = vpop.permute.xlu1 %915  ;;  %v905_v14 = vsel %vm904_vm7, %v901_v36, %v903_v15  ;;  %v906_v7 = vsel %vm904_vm7, %v903_v15, %v901_v36 }
 0x10a   :  { %v878_v11 = vadd.f32 %v876_v23, %v866_v39  ;;  %v879_v35 = vadd.f32 %v877_v63, %v867_v19  ;;  %v907_v41 = vsub.f32 %v1988_v12, %v906_v7  ;;  %v908_v5 = vsub.f32 %v1997_v42, %v905_v14  ;;  %1219 = vrot.lane.b32.xlu0 %v1959_v0, %s1603_s4 }
 0x10b   :  { %1326 = vrot.lane.b32.xlu1 %v1927_v54, %s1604_s5 }
 0x10c   :  { %v880_v22 = vsub.f32 0.0, %v878_v11  ;;  %v881_v20 = vsub.f32 0.0, %v879_v35  ;;  %v914_v4 = vpop.permute.xlu0 %913  ;;  %v909_v54 = vand.u32 2147483647, %v907_v41  ;;  %v910_v29 = vand.u32 2147483647, %v908_v5 }
 0x10d   :  { %v928_v50 = vpop.permute.xlu1 %927  ;;  %v917_v62 = vsel %vm904_vm7, %v914_v4, %v916_v24  ;;  %v918_v10 = vsel %vm904_vm7, %v916_v24, %v914_v4  ;;  %v1457_v5 = vsel %vm886_vm9, 1.0, %v1605_v30 }
 0x10e   :  { %v882_v16 = vmul.f32 1.442695, %v880_v22  ;;  %v884_v37 = vmul.f32 1.442695, %v881_v20  ;;  %v919_v56 = vsub.f32 %v1962_v57, %v918_v10  ;;  %v920_v44 = vsub.f32 %v1971_v25, %v917_v62  ;;  %1324 = vrot.lane.b32.xlu0 %v1930_v3, %s1604_s5 }
 0x10f   :  { %1338 = vrot.lane.b32.xlu1 %v1952_v18, %s1604_s5  ;;  %v1458_v22 = vsel %vm887_vm10, 1.0, %v1605_v30 }
 0x110   :  { %1493 = vpow2.f32 %v882_v16  ;;  %v921_v9 = vand.u32 2147483647, %v919_v56  ;;  %v922_v43 = vand.u32 2147483647, %v920_v44  ;;  %v926_v27 = vpop.permute.xlu0 %925 }
 0x111   :  { %v1020_v32 = vpop.permute.xlu1 %1019  ;;  %1495 = vpow2.f32 %v884_v37  ;;  %v929_v47 = vsel %vm904_vm7, %v926_v27, %v928_v50  ;;  %v930_v59 = vsel %vm904_vm7, %v928_v50, %v926_v27 }
 0x112   :  { %v923_v3 = vadd.f32 %v921_v9, %v909_v54  ;;  %v924_v48 = vadd.f32 %v922_v43, %v910_v29  ;;  %v931_v45 = vsub.f32 %v2012_v61, %v930_v59  ;;  %v932_v18 = vsub.f32 %v2015_v58, %v929_v47  ;;  %1336 = vrot.lane.b32.xlu0 %v1959_v0, %s1604_s5 }
 0x114   :  { %v933_v15 = vand.u32 2147483647, %v931_v45  ;;  %v934_v40 = vand.u32 2147483647, %v932_v18  ;;  %v1018_v55 = vpop.permute.xlu0 %1017 }
 0x115   :  { %v1033_v39 = vpop.permute.xlu1 %1032  ;;  %v1022_v19 = vsel %vm1021_vm8, %v1018_v55, %v1020_v32  ;;  %v1023_v60 = vsel %vm1021_vm8, %v1020_v32, %v1018_v55 }
 0x116   :  { %v935_v6 = vadd.f32 %v933_v15, %v923_v3  ;;  %v936_v23 = vadd.f32 %v934_v40, %v924_v48  ;;  %v1024_v63 = vsub.f32 %v1988_v12, %v1023_v60  ;;  %v1025_v36 = vsub.f32 %v1997_v42, %v1022_v19 }
 0x118   :  { %v1031_v24 = vpop.permute.xlu0 %1030  ;;  %v1026_v41 = vand.u32 2147483647, %v1024_v63  ;;  %v1027_v20 = vand.u32 2147483647, %v1025_v36 }
 0x119   :  { %v940_v14 = vpop.permute.xlu1 %939  ;;  %v1034_v0 = vsel %vm1021_vm8, %v1031_v24, %v1033_v39  ;;  %v1035_v7 = vsel %vm1021_vm8, %v1033_v39, %v1031_v24 }
 0x11a   :  { %v1036_v11 = vsub.f32 %v1962_v57, %v1035_v7  ;;  %v1037_v35 = vsub.f32 %v1971_v25, %v1034_v0 }
 0x11c   :  { %v1038_v4 = vand.u32 2147483647, %v1036_v11  ;;  %v1039_v50 = vand.u32 2147483647, %v1037_v35  ;;  %v938_v62 = vpop.permute.xlu0 %937 }
 0x11d   :  { %v1045_v10 = vpop.permute.xlu1 %1044  ;;  %v1494_v16 = vpop.eup %1493  ;;  %v941_v37 = vsel %vm904_vm7, %v938_v62, %v940_v14  ;;  %v942_v56 = vsel %vm904_vm7, %v940_v14, %v938_v62 }
 0x11e   :  { %v1496_v44 = vpop.eup %1495  ;;  %v1040_v54 = vadd.f32 %v1038_v4, %v1026_v41  ;;  %v1041_v29 = vadd.f32 %v1039_v50, %v1027_v20  ;;  %v943_v9 = vsub.f32 %v2032_v26, %v942_v56  ;;  %v944_v43 = vsub.f32 %v2035_v17, %v941_v37 }
 0x11f   :  { %v892_v27 = vmul.f32 %v1494_v16, %v1457_v5  ;;  %v893_v32 = vmul.f32 %v1496_v44, %v1458_v22 }
 0x120   :  { %v945_v47 = vand.u32 2147483647, %v943_v9  ;;  %v946_v59 = vand.u32 2147483647, %v944_v43  ;;  %v1043_v3 = vpop.permute.xlu0 %1042 }
 0x121   :  { %v1137_v48 = vpop.permute.xlu1 %1136  ;;  %v1046_v45 = vsel %vm1021_vm8, %v1043_v3, %v1045_v10  ;;  %v1047_v18 = vsel %vm1021_vm8, %v1045_v10, %v1043_v3  ;;  %v894_v15 = vmul.f32 3.0, %v892_v27  ;;  %v895_v40 = vmul.f32 3.0, %v893_v32 }
 0x122   :  { %v947_v55 = vadd.f32 %v945_v47, %v935_v6  ;;  %v948_v39 = vadd.f32 %v946_v59, %v936_v23  ;;  %v1048_v19 = vsub.f32 %v2012_v61, %v1047_v18  ;;  %v1049_v60 = vsub.f32 %v2015_v58, %v1046_v45 }
 0x123   :  { %v2540_v63 = vadd.f32 %v894_v15, %v2459_v52  ;;  %v2543_v36 = vadd.f32 %v895_v40, %v2462_v13  ;;  %v2546_v24 = vadd.f32 %v892_v27, %v2465_v38  ;;  %v2549_v14 = vadd.f32 %v893_v32, %v2468_v49 }
 0x124   :  { %v1050_v0 = vand.u32 2147483647, %v1048_v19  ;;  %v1051_v7 = vand.u32 2147483647, %v1049_v60  ;;  %v1135_v6 = vpop.permute.xlu0 %1134 }
 0x125   :  { %v1139_v23 = vsel %vm1138_vm11, %v1135_v6, %v1137_v48  ;;  %v1140_v11 = vsel %vm1138_vm11, %v1137_v48, %v1135_v6  ;;  %v1150_v52 = vpop.permute.xlu1 %1149 }
 0x126   :  { %v1052_v35 = vadd.f32 %v1050_v0, %v1040_v54  ;;  %v1053_v41 = vadd.f32 %v1051_v7, %v1041_v29  ;;  %v1141_v13 = vsub.f32 %v1988_v12, %v1140_v11  ;;  %v1142_v38 = vsub.f32 %v1997_v42, %v1139_v23 }
 0x128   :  { %v1148_v5 = vpop.permute.xlu0 %1147  ;;  %v1143_v62 = vand.u32 2147483647, %v1141_v13  ;;  %v1144_v10 = vand.u32 2147483647, %v1142_v38 }
 0x129   :  { %v1151_v49 = vsel %vm1138_vm11, %v1148_v5, %v1150_v52  ;;  %v1152_v22 = vsel %vm1138_vm11, %v1150_v52, %v1148_v5  ;;  %v952_v20 = vpop.permute.xlu1 %951 }
 0x12a   :  { %v1153_v4 = vsub.f32 %v1962_v57, %v1152_v22  ;;  %v1154_v50 = vsub.f32 %v1971_v25, %v1151_v49 }
 0x12c   :  { %v1155_v16 = vand.u32 2147483647, %v1153_v4  ;;  %v1156_v37 = vand.u32 2147483647, %v1154_v50  ;;  %v950_v56 = vpop.permute.xlu0 %949 }
 0x12d   :  { %v953_v44 = vsel %vm904_vm7, %v950_v56, %v952_v20  ;;  %v954_v54 = vsel %vm904_vm7, %v952_v20, %v950_v56  ;;  %v1057_v29 = vpop.permute.xlu1 %1056 }
 0x12e   :  { %v1157_v9 = vadd.f32 %v1155_v16, %v1143_v62  ;;  %v1158_v43 = vadd.f32 %v1156_v37, %v1144_v10  ;;  %v955_v27 = vsub.f32 %v2054_v34, %v954_v54  ;;  %v956_v32 = vsub.f32 %v2057_v51, %v953_v44 }
 0x130   :  { %v957_v47 = vand.u32 2147483647, %v955_v27  ;;  %v958_v59 = vand.u32 2147483647, %v956_v32  ;;  %v1055_v3 = vpop.permute.xlu0 %1054 }
 0x131   :  { %v1058_v48 = vsel %vm1021_vm8, %v1055_v3, %v1057_v29  ;;  %v1059_v45 = vsel %vm1021_vm8, %v1057_v29, %v1055_v3  ;;  %v1162_v18 = vpop.permute.xlu1 %1161 }
 0x132   :  { %v959_v15 = vadd.f32 %v957_v47, %v947_v55  ;;  %v960_v40 = vadd.f32 %v958_v59, %v948_v39  ;;  %v1060_v19 = vsub.f32 %v2032_v26, %v1059_v45  ;;  %v1061_v60 = vsub.f32 %v2035_v17, %v1058_v48 }
 0x134   :  { %v1062_v0 = vand.u32 2147483647, %v1060_v19  ;;  %v1063_v7 = vand.u32 2147483647, %v1061_v60  ;;  %v1160_v6 = vpop.permute.xlu0 %1159 }
 0x135   :  { %v1163_v23 = vsel %vm1138_vm11, %v1160_v6, %v1162_v18  ;;  %v1164_v11 = vsel %vm1138_vm11, %v1162_v18, %v1160_v6  ;;  %v1254_v52 = vpop.permute.xlu1 %1253 }
 0x136   :  { %v1064_v13 = vadd.f32 %v1062_v0, %v1052_v35  ;;  %v1065_v38 = vadd.f32 %v1063_v7, %v1053_v41  ;;  %v1165_v55 = vsub.f32 %v2012_v61, %v1164_v11  ;;  %v1166_v39 = vsub.f32 %v2015_v58, %v1163_v23 }
 0x138   :  { %v1167_v5 = vand.u32 2147483647, %v1165_v55  ;;  %v1168_v49 = vand.u32 2147483647, %v1166_v39  ;;  %v1252_v22 = vpop.permute.xlu0 %1251 }
 0x139   :  { %v1256_v20 = vsel %vm1255_vm12, %v1252_v22, %v1254_v52  ;;  %v1257_v4 = vsel %vm1255_vm12, %v1254_v52, %v1252_v22  ;;  %v1267_v50 = vpop.permute.xlu1 %1266 }
 0x13a   :  { %v1169_v62 = vadd.f32 %v1167_v5, %v1157_v9  ;;  %v1170_v10 = vadd.f32 %v1168_v49, %v1158_v43  ;;  %v1258_v16 = vsub.f32 %v1988_v12, %v1257_v4  ;;  %v1259_v35 = vsub.f32 %v1997_v42, %v1256_v20 }
 0x13c   :  { %v1265_v41 = vpop.permute.xlu0 %1264  ;;  %v1260_v27 = vand.u32 2147483647, %v1258_v16  ;;  %v1261_v32 = vand.u32 2147483647, %v1259_v35 }
 0x13d   :  { %v1268_v37 = vsel %vm1255_vm12, %v1265_v41, %v1267_v50  ;;  %v1269_v56 = vsel %vm1255_vm12, %v1267_v50, %v1265_v41  ;;  %v964_v44 = vpop.permute.xlu1 %963 }
 0x13e   :  { %v1270_v54 = vsub.f32 %v1962_v57, %v1269_v56  ;;  %v1271_v29 = vsub.f32 %v1971_v25, %v1268_v37 }
 0x140   :  { %v1272_v9 = vand.u32 2147483647, %v1270_v54  ;;  %v1273_v43 = vand.u32 2147483647, %v1271_v29  ;;  %v962_v47 = vpop.permute.xlu0 %961 }
 0x141   :  { %v965_v12 = vsel %vm904_vm7, %v962_v47, %v964_v44  ;;  %v966_v42 = vsel %vm904_vm7, %v964_v44, %v962_v47  ;;  %v1069_v59 = vpop.permute.xlu1 %1068 }
 0x142   :  { %v1274_v3 = vadd.f32 %v1272_v9, %v1260_v27  ;;  %v1275_v48 = vadd.f32 %v1273_v43, %v1261_v32  ;;  %v967_v45 = vsub.f32 %v2078_v31, %v966_v42  ;;  %v968_v57 = vsub.f32 %v2081_v2, %v965_v12 }
 0x144   :  { %v969_v18 = vand.u32 2147483647, %v967_v45  ;;  %v970_v25 = vand.u32 2147483647, %v968_v57  ;;  %v1067_v19 = vpop.permute.xlu0 %1066 }
 0x145   :  { %v1070_v60 = vsel %vm1021_vm8, %v1067_v19, %v1069_v59  ;;  %v1071_v0 = vsel %vm1021_vm8, %v1069_v59, %v1067_v19  ;;  %v1174_v7 = vpop.permute.xlu1 %1173 }
 0x146   :  { %v971_v6 = vadd.f32 %v969_v18, %v959_v15  ;;  %v972_v23 = vadd.f32 %v970_v25, %v960_v40  ;;  %v1072_v11 = vsub.f32 %v2054_v34, %v1071_v0  ;;  %v1073_v52 = vsub.f32 %v2057_v51, %v1070_v60 }
 0x148   :  { %v1074_v55 = vand.u32 2147483647, %v1072_v11  ;;  %v1075_v39 = vand.u32 2147483647, %v1073_v52  ;;  %v1172_v5 = vpop.permute.xlu0 %1171 }
 0x149   :  { %v1175_v49 = vsel %vm1138_vm11, %v1172_v5, %v1174_v7  ;;  %v1176_v22 = vsel %vm1138_vm11, %v1174_v7, %v1172_v5  ;;  %v1279_v20 = vpop.permute.xlu1 %1278 }
 0x14a   :  { %v1076_v4 = vadd.f32 %v1074_v55, %v1064_v13  ;;  %v1077_v50 = vadd.f32 %v1075_v39, %v1065_v38  ;;  %v1177_v16 = vsub.f32 %v2032_v26, %v1176_v22  ;;  %v1178_v15 = vsub.f32 %v2035_v17, %v1175_v49 }
 0x14c   :  { %v1179_v40 = vand.u32 2147483647, %v1177_v16  ;;  %v1180_v35 = vand.u32 2147483647, %v1178_v15  ;;  %v1277_v41 = vpop.permute.xlu0 %1276 }
 0x14d   :  { %v1280_v37 = vsel %vm1255_vm12, %v1277_v41, %v1279_v20  ;;  %v1281_v56 = vsel %vm1255_vm12, %v1279_v20, %v1277_v41  ;;  %v976_v44 = vpop.permute.xlu1 %975 }
 0x14e   :  { %v1181_v54 = vadd.f32 %v1179_v40, %v1169_v62  ;;  %v1182_v29 = vadd.f32 %v1180_v35, %v1170_v10  ;;  %v1282_v27 = vsub.f32 %v2012_v61, %v1281_v56  ;;  %v1283_v13 = vsub.f32 %v2015_v58, %v1280_v37 }
 0x150   :  { %v1284_v38 = vand.u32 2147483647, %v1282_v27  ;;  %v1285_v32 = vand.u32 2147483647, %v1283_v13  ;;  %v974_v9 = vpop.permute.xlu0 %973 }
 0x151   :  { %v977_v43 = vsel %vm904_vm7, %v974_v9, %v976_v44  ;;  %v978_v47 = vsel %vm904_vm7, %v976_v44, %v974_v9  ;;  %v1081_v12 = vpop.permute.xlu1 %1080 }
 0x152   :  { %v1286_v42 = vadd.f32 %v1284_v38, %v1274_v3  ;;  %v1287_v59 = vadd.f32 %v1285_v32, %v1275_v48  ;;  %v979_v45 = vsub.f32 %v2100_v28, %v978_v47  ;;  %v980_v62 = vsub.f32 %v2103_v1, %v977_v43 }
 0x154   :  { %v981_v10 = vand.u32 2147483647, %v979_v45  ;;  %v982_v61 = vand.u32 2147483647, %v980_v62  ;;  %v1079_v57 = vpop.permute.xlu0 %1078 }
 0x155   :  { %v1082_v58 = vsel %vm1021_vm8, %v1079_v57, %v1081_v12  ;;  %v1083_v18 = vsel %vm1021_vm8, %v1081_v12, %v1079_v57  ;;  %v1186_v25 = vpop.permute.xlu1 %1185 }
 0x156   :  { %v983_v19 = vadd.f32 %v981_v10, %v971_v6  ;;  %v984_v60 = vadd.f32 %v982_v61, %v972_v23  ;;  %v1084_v0 = vsub.f32 %v2078_v31, %v1083_v18  ;;  %v1085_v3 = vsub.f32 %v2081_v2, %v1082_v58 }
 0x158   :  { %v1086_v48 = vand.u32 2147483647, %v1084_v0  ;;  %v1087_v7 = vand.u32 2147483647, %v1085_v3  ;;  %v1184_v11 = vpop.permute.xlu0 %1183 }
 0x159   :  { %v1187_v52 = vsel %vm1138_vm11, %v1184_v11, %v1186_v25  ;;  %v1188_v55 = vsel %vm1138_vm11, %v1186_v25, %v1184_v11  ;;  %v1291_v39 = vpop.permute.xlu1 %1290 }
 0x15a   :  { %v1088_v5 = vadd.f32 %v1086_v48, %v1076_v4  ;;  %v1089_v49 = vadd.f32 %v1087_v7, %v1077_v50  ;;  %v1189_v22 = vsub.f32 %v2054_v34, %v1188_v55  ;;  %v1190_v6 = vsub.f32 %v2057_v51, %v1187_v52 }
 0x15c   :  { %v1191_v23 = vand.u32 2147483647, %v1189_v22  ;;  %v1192_v20 = vand.u32 2147483647, %v1190_v6  ;;  %v1289_v16 = vpop.permute.xlu0 %1288 }
 0x15d   :  { %v1292_v15 = vsel %vm1255_vm12, %v1289_v16, %v1291_v39  ;;  %v1293_v40 = vsel %vm1255_vm12, %v1291_v39, %v1289_v16  ;;  %v988_v35 = vpop.permute.xlu1 %987 }
 0x15e   :  { %v1193_v41 = vadd.f32 %v1191_v23, %v1181_v54  ;;  %v1194_v37 = vadd.f32 %v1192_v20, %v1182_v29  ;;  %v1294_v56 = vsub.f32 %v2032_v26, %v1293_v40  ;;  %v1295_v4 = vsub.f32 %v2035_v17, %v1292_v15 }
 0x160   :  { %v1296_v50 = vand.u32 2147483647, %v1294_v56  ;;  %v1297_v44 = vand.u32 2147483647, %v1295_v4  ;;  %v986_v27 = vpop.permute.xlu0 %985 }
 0x161   :  { %v989_v13 = vsel %vm904_vm7, %v986_v27, %v988_v35  ;;  %v990_v38 = vsel %vm904_vm7, %v988_v35, %v986_v27  ;;  %v1093_v32 = vpop.permute.xlu1 %1092 }
 0x162   :  { %v1298_v9 = vadd.f32 %v1296_v50, %v1286_v42  ;;  %v1299_v43 = vadd.f32 %v1297_v44, %v1287_v59  ;;  %v991_v47 = vsub.f32 %v2114_v53, %v990_v38  ;;  %v992_v54 = vsub.f32 %v2117_v8, %v989_v13 }
 0x164   :  { %v993_v29 = vand.u32 2147483647, %v991_v47  ;;  %v994_v26 = vand.u32 2147483647, %v992_v54  ;;  %v1091_v12 = vpop.permute.xlu0 %1090 }
 0x165   :  { %v1094_v17 = vsel %vm1021_vm8, %v1091_v12, %v1093_v32  ;;  %v1095_v45 = vsel %vm1021_vm8, %v1093_v32, %v1091_v12  ;;  %v1198_v62 = vpop.permute.xlu1 %1197 }
 0x166   :  { %v995_v10 = vadd.f32 %v993_v29, %v983_v19  ;;  %v996_v61 = vadd.f32 %v994_v26, %v984_v60  ;;  %v1096_v57 = vsub.f32 %v2100_v28, %v1095_v45  ;;  %v1097_v42 = vsub.f32 %v2103_v1, %v1094_v17 }
 0x167   :  { %v1459_v45 = vsel %vm1003_vm13, 1.0, %v1605_v30 }
 0x168   :  { %v997_v59 = vsub.f32 0.0, %v995_v10  ;;  %v998_v58 = vsub.f32 0.0, %v996_v61  ;;  %v1098_v18 = vand.u32 2147483647, %v1096_v57  ;;  %v1099_v25 = vand.u32 2147483647, %v1097_v42  ;;  %v1196_v0 = vpop.permute.xlu0 %1195 }
 0x169   :  { %v1199_v3 = vsel %vm1138_vm11, %v1196_v0, %v1198_v62  ;;  %v1200_v48 = vsel %vm1138_vm11, %v1198_v62, %v1196_v0  ;;  %v1303_v7 = vpop.permute.xlu1 %1302  ;;  %v1460_v62 = vsel %vm1004_vm14, 1.0, %v1605_v30 }
 0x16a   :  { %v999_v11 = vmul.f32 1.442695, %v997_v59  ;;  %v1001_v52 = vmul.f32 1.442695, %v998_v58  ;;  %v1100_v19 = vadd.f32 %v1098_v18, %v1088_v5  ;;  %v1101_v60 = vadd.f32 %v1099_v25, %v1089_v49 }
 0x16b   :  { %v1201_v55 = vsub.f32 %v2078_v31, %v1200_v48  ;;  %v1202_v39 = vsub.f32 %v2081_v2, %v1199_v3 }
 0x16c   :  { %1497 = vpow2.f32 %v999_v11  ;;  %v1301_v22 = vpop.permute.xlu0 %1300 }
 0x16d   :  { %1499 = vpow2.f32 %v1001_v52  ;;  %v1203_v6 = vand.u32 2147483647, %v1201_v55  ;;  %v1204_v23 = vand.u32 2147483647, %v1202_v39  ;;  %v1304_v20 = vsel %vm1255_vm12, %v1301_v22, %v1303_v7  ;;  %v1105_v16 = vpop.permute.xlu1 %1104 }
 0x16e   :  { %v1305_v15 = vsel %vm1255_vm12, %v1303_v7, %v1301_v22  ;;  %v1307_v40 = vsub.f32 %v2057_v51, %v1304_v20 }
 0x16f   :  { %v1205_v5 = vadd.f32 %v1203_v6, %v1193_v41  ;;  %v1206_v49 = vadd.f32 %v1204_v23, %v1194_v37  ;;  %v1306_v35 = vsub.f32 %v2054_v34, %v1305_v15 }
 0x170   :  { %v1309_v56 = vand.u32 2147483647, %v1307_v40  ;;  %v1103_v4 = vpop.permute.xlu0 %1102 }
 0x171   :  { %v1308_v50 = vand.u32 2147483647, %v1306_v35  ;;  %v1106_v44 = vsel %vm1021_vm8, %v1103_v4, %v1105_v16  ;;  %v1107_v27 = vsel %vm1021_vm8, %v1105_v16, %v1103_v4  ;;  %v1210_v13 = vpop.permute.xlu1 %1209 }
 0x172   :  { %v1311_v38 = vadd.f32 %v1309_v56, %v1299_v43  ;;  %v1108_v32 = vsub.f32 %v2114_v53, %v1107_v27  ;;  %v1109_v47 = vsub.f32 %v2117_v8, %v1106_v44 }
 0x173   :  { %v1310_v51 = vadd.f32 %v1308_v50, %v1298_v9 }
 0x174   :  { %v1110_v41 = vand.u32 2147483647, %v1108_v32  ;;  %v1111_v37 = vand.u32 2147483647, %v1109_v47  ;;  %v1208_v54 = vpop.permute.xlu0 %1207 }
 0x175   :  { %v1211_v34 = vsel %vm1138_vm11, %v1208_v54, %v1210_v13  ;;  %v1212_v29 = vsel %vm1138_vm11, %v1210_v13, %v1208_v54  ;;  %v1315_v26 = vpop.permute.xlu1 %1314 }
 0x176   :  { %v1112_v43 = vadd.f32 %v1110_v41, %v1100_v19  ;;  %v1113_v12 = vadd.f32 %v1111_v37, %v1101_v60  ;;  %v1213_v17 = vsub.f32 %v2100_v28, %v1212_v29  ;;  %v1214_v9 = vsub.f32 %v2103_v1, %v1211_v34 }
 0x178   :  { %v1114_v10 = vsub.f32 0.0, %v1112_v43  ;;  %v1115_v61 = vsub.f32 0.0, %v1113_v12  ;;  %v1215_v57 = vand.u32 2147483647, %v1213_v17  ;;  %v1216_v42 = vand.u32 2147483647, %v1214_v9  ;;  %v1313_v59 = vpop.permute.xlu0 %1312 }
 0x179   :  { %v1498_v58 = vpop.eup %1497  ;;  %v1316_v18 = vsel %vm1255_vm12, %v1313_v59, %v1315_v26  ;;  %v1317_v25 = vsel %vm1255_vm12, %v1315_v26, %v1313_v59  ;;  %v1222_v0 = vpop.permute.xlu1 %1221 }
 0x17a   :  { %v1500_v3 = vpop.eup %1499  ;;  %v1116_v48 = vmul.f32 1.442695, %v1114_v10  ;;  %v1118_v7 = vmul.f32 1.442695, %v1115_v61  ;;  %v1217_v11 = vadd.f32 %v1215_v57, %v1205_v5  ;;  %v1218_v52 = vadd.f32 %v1216_v42, %v1206_v49 }
 0x17b   :  { %v1318_v19 = vsub.f32 %v2078_v31, %v1317_v25  ;;  %v1319_v60 = vsub.f32 %v2081_v2, %v1316_v18  ;;  %v1009_v55 = vmul.f32 %v1498_v58, %v1459_v45  ;;  %v1010_v39 = vmul.f32 %v1500_v3, %v1460_v62 }
 0x17c   :  { %1501 = vpow2.f32 %v1116_v48  ;;  %v1220_v22 = vpop.permute.xlu0 %1219  ;;  %v1461_v62 = vsel %vm1120_vm15, 1.0, %v1605_v30  ;;  %v1462_v61 = vsel %vm1121_vm0, 1.0, %v1605_v30 }
 0x17d   :  { %1503 = vpow2.f32 %v1118_v7  ;;  %v1320_v6 = vand.u32 2147483647, %v1318_v19  ;;  %v1321_v23 = vand.u32 2147483647, %v1319_v60  ;;  %v1223_v20 = vsel %vm1138_vm11, %v1220_v22, %v1222_v0  ;;  %v1327_v16 = vpop.permute.xlu1 %1326 }
 0x17e   :  { %v1224_v15 = vsel %vm1138_vm11, %v1222_v0, %v1220_v22  ;;  %v1226_v40 = vsub.f32 %v2117_v8, %v1223_v20  ;;  %v1011_v5 = vmul.f32 4.0, %v1009_v55  ;;  %v1012_v31 = vmul.f32 4.0, %v1010_v39 }
 0x17f   :  { %v1322_v49 = vadd.f32 %v1320_v6, %v1310_v51  ;;  %v1323_v2 = vadd.f32 %v1321_v23, %v1311_v38  ;;  %v1225_v35 = vsub.f32 %v2114_v53, %v1224_v15  ;;  %v1015_v56 = vadd.f32 %v1009_v55, %v2546_v24 }
 0x180   :  { %v1228_v4 = vand.u32 2147483647, %v1226_v40  ;;  %v1325_v50 = vpop.permute.xlu0 %1324  ;;  %v1013_v44 = vadd.f32 %v1011_v5, %v2540_v63  ;;  %v1014_v27 = vadd.f32 %v1012_v31, %v2543_v36  ;;  %v1016_v13 = vadd.f32 %v1010_v39, %v2549_v14 }
 0x181   :  { %v1227_v32 = vand.u32 2147483647, %v1225_v35  ;;  %v1328_v47 = vsel %vm1255_vm12, %v1325_v50, %v1327_v16  ;;  %v1329_v51 = vsel %vm1255_vm12, %v1327_v16, %v1325_v50  ;;  %v1339_v37 = vpop.permute.xlu1 %1338  ;;  %v1464_v55 = vsel %vm1238_vm1, 1.0, %v1605_v30 }
 0x182   :  { %v1230_v38 = vadd.f32 %v1228_v4, %v1218_v52  ;;  %v1330_v41 = vsub.f32 %v2100_v28, %v1329_v51  ;;  %v1331_v24 = vsub.f32 %v2103_v1, %v1328_v47  ;;  %v1463_v39 = vsel %vm1237_vm2, 1.0, %v1605_v30 }
 0x183   :  { %v1229_v54 = vadd.f32 %v1227_v32, %v1217_v11  ;;  %v1466_v35 = vsel %vm1355_vm4, 1.0, %v1605_v30 }
 0x184   :  { %v1232_v34 = vsub.f32 0.0, %v1230_v38  ;;  %v1332_v63 = vand.u32 2147483647, %v1330_v41  ;;  %v1333_v29 = vand.u32 2147483647, %v1331_v24  ;;  %v1337_v36 = vpop.permute.xlu0 %1336 }
 0x185   :  { %v1231_v14 = vsub.f32 0.0, %v1229_v54  ;;  %v1340_v26 = vsel %vm1255_vm12, %v1337_v36, %v1339_v37  ;;  %v1341_v43 = vsel %vm1255_vm12, %v1339_v37, %v1337_v36 }
 0x186   :  { %v1235_v28 = vmul.f32 1.442695, %v1232_v34  ;;  %v1334_v12 = vadd.f32 %v1332_v63, %v1322_v49  ;;  %v1335_v1 = vadd.f32 %v1333_v29, %v1323_v2  ;;  %v1342_v17 = vsub.f32 %v2114_v53, %v1341_v43 }
 0x187   :  { %v1233_v9 = vmul.f32 1.442695, %v1231_v14  ;;  %v1343_v45 = vsub.f32 %v2117_v8, %v1340_v26  ;;  %v1465_v2 = vsel %vm1354_vm3, 1.0, %v1605_v30 }
 0x188   :  { %1505 = vpow2.f32 %v1235_v28  ;;  %v1344_v10 = vand.u32 2147483647, %v1342_v17 }
 0x189   :  { %v1502_v57 = vpop.eup %1501  ;;  %1507 = vpow2.f32 %v1233_v9  ;;  %v1345_v33 = vand.u32 2147483647, %v1343_v45 }
 0x18a   :  { %v1504_v42 = vpop.eup %1503  ;;  %v1346_v59 = vadd.f32 %v1344_v10, %v1334_v12  ;;  %v1126_v58 = vmul.f32 %v1502_v57, %v1461_v62 }
 0x18b   :  { %v1347_v18 = vadd.f32 %v1345_v33, %v1335_v1  ;;  %v1127_v25 = vmul.f32 %v1504_v42, %v1462_v61 }
 0x18c   :  { %v1348_v0 = vsub.f32 0.0, %v1346_v59  ;;  %v1128_v3 = vmul.f32 5.0, %v1126_v58  ;;  %v1132_v53 = vadd.f32 %v1126_v58, %v1015_v56 }
 0x18d   :  { %v1349_v48 = vsub.f32 0.0, %v1347_v18  ;;  %v1129_v7 = vmul.f32 5.0, %v1127_v25  ;;  %v1133_v8 = vadd.f32 %v1127_v25, %v1016_v13 }
 0x18e   :  { %v1350_v11 = vmul.f32 1.442695, %v1348_v0  ;;  %v1130_v52 = vadd.f32 %v1128_v3, %v1013_v44 }
 0x18f   :  { %v1352_v19 = vmul.f32 1.442695, %v1349_v48  ;;  %v1131_v60 = vadd.f32 %v1129_v7, %v1014_v27 }
 0x190   :  { %1509 = vpow2.f32 %v1350_v11 }
 0x191   :  { %1511 = vpow2.f32 %v1352_v19 }
 0x195   :  { %v1506_v22 = vpop.eup %1505 }
 0x196   :  { %v1508_v6 = vpop.eup %1507  ;;  %v1244_v23 = vmul.f32 %v1506_v22, %v1464_v55 }
 0x197   :  { %v1243_v20 = vmul.f32 %v1508_v6, %v1463_v39 }
 0x198   :  { %v1246_v16 = vmul.f32 6.0, %v1244_v23  ;;  %v1250_v15 = vadd.f32 %v1244_v23, %v1133_v8 }
 0x199   :  { %v1245_v40 = vmul.f32 6.0, %v1243_v20  ;;  %v1249_v5 = vadd.f32 %v1243_v20, %v1132_v53 }
 0x19a   :  { %v1248_v31 = vadd.f32 %v1246_v16, %v1131_v60 }
 0x19b   :  { %v1247_v49 = vadd.f32 %v1245_v40, %v1130_v52 }
 0x19d   :  { %v1510_v56 = vpop.eup %1509 }
 0x19e   :  { %v1512_v4 = vpop.eup %1511  ;;  %v1360_v50 = vmul.f32 %v1510_v56, %v1465_v2 }
 0x19f   :  { %v1361_v44 = vmul.f32 %v1512_v4, %v1466_v35 }
 0x1a0   :  { %v1362_v27 = vmul.f32 7.0, %v1360_v50  ;;  %v1366_v13 = vadd.f32 %v1360_v50, %v1249_v5 }
 0x1a1   :  { %v1363_v32 = vmul.f32 7.0, %v1361_v44  ;;  %v1367_v47 = vadd.f32 %v1361_v44, %v1250_v15 }
 0x1a2   :  { %v1364_v51 = vadd.f32 %v1362_v27, %v1247_v49  ;;  %1513 = vrcp.f32 %v1366_v13 }
 0x1a3   :  { %v1365_v21 = vadd.f32 %v1363_v32, %v1248_v31  ;;  %1515 = vrcp.f32 %v1367_v47 }
 0x1af   :  { %v1514_v46 = vpop.eup %1513 }
 0x1b0   :  { %v1516_v38 = vpop.eup %1515  ;;  %v1370_v41 = vmul.f32 %v1514_v46, %v1364_v51 }
 0x1b1   :  { %v1371_v24 = vmul.f32 %v1516_v38, %v1365_v21 }
 0x1b2   :  { %1372 = vst [vmem:[#allocation11] sm:$0xff] %v1370_v41 }
 0x1b3   :  { %1373 = vst [vmem:[#allocation11 + $0x8] sm:$0xff] %v1371_v24 }
 0x1b4   :  { %1576 = shalt.err (!%p1573_p0)
}
 0x1b5   :  { %1383 = dma.vmem_to_hbm [thread:$0]  %s1381_s7, 256, %s2728_s3, [#allocation6]  }
 0x1b6   :  { %1591 = dma.done.wait [#allocation6], 256  }
 0x1b7   :  { %1592 = vsyncadd [#allocation6], 4294967040 }
 0x1b8   :  { %1387 = vsyncpa [#allocation5], 1 }
 0x1b9   :  { %1388 = vsyncpa [#allocation10], 1 }
 0x1ba   :  { %1389 = vsyncpa [#allocation6], 1 }
 0x1bb   :  { %1390 = vsyncpa [#allocation7], 1 }

</bundles_post_ra>
